<compile_context>
chip_gen: v5e
topology: v5e:2x2
jax: 0.10.0
libtpu: 0.0.40
codegen_flags: <defaults>
</compile_context>

<pallas_src>
import functools

import jax
import jax.numpy as jnp
from jax.experimental import pallas as pl
from jax.experimental.pallas import tpu as pltpu

V_TH_MAIN = 1.0
V_TH_TALK = 0.5   # talking_heads_lif uses v_threshold=0.5
BN_EPS = 1e-5


def _lif_step(x, mem_ref, v_th, first):
    """One multi-step LIF update (tau=2, decay_input, hard reset to 0).

    `first` is a trace-time bool: at t==0 the membrane is known to be 0, so we
    skip reading the (uninitialized) scratch and use h = x/2 directly.
    """
    if first:
        h = x * 0.5
    else:
        h = (mem_ref[...] + x) * 0.5          # v + (x - v)/tau with tau = 2
    spike = h >= v_th
    mem_ref[...] = jnp.where(spike, 0.0, h)
    return spike.astype(jnp.float32)


def _spike_gau_step(x_t, qkv_w_ref, qkv_shift, proj_w_ref, proj_shift,
                    ones_blk,
                    mem_first, mem_gate, mem_q, mem_k, mem_kv, first):
    """One SpikeGAU block for one timestep.  x_t: (C, B*N) float32."""
    c = x_t.shape[0]

    s_x = _lif_step(x_t, mem_first, V_TH_MAIN, first)      # first_lif

    # fused gate/q/k 1x1 convs (+bias, eval-mode BN folded into W / shift)
    qkv = jnp.dot(qkv_w_ref[...], s_x,
                  preferred_element_type=jnp.float32) + qkv_shift
    gate_spk = _lif_step(qkv[0:c], mem_gate, V_TH_MAIN, first)
    q_spk = _lif_step(qkv[c:2 * c], mem_q, V_TH_MAIN, first)
    k_spk = _lif_step(qkv[2 * c:3 * c], mem_k, V_TH_MAIN, first)

    # TODO(synk): `x_conv_out` is undefined in the reference forward; the module
    # has no v-branch, so v is taken as the first_lif spike output (the only
    # self-consistent interpretation).
    v_spk = s_x                                            # (C, B*N)

    # kv = (k*v).sum over spatial N per (batch, channel), broadcast back over
    # N, fused into ONE block-diagonal ones matmul on the MXU.  Operands are
    # exactly {0,1} so bf16 is lossless; accumulate in f32.
    kv_full = jnp.dot((k_spk * v_spk).astype(jnp.bfloat16), ones_blk,
                      preferred_element_type=jnp.float32)  # (C, B*N)
    # talking-heads LIF applied post-broadcast (elementwise -> bit-identical
    # to reducing first; membrane scratch is (C, B*N))
    kv_spk = _lif_step(kv_full, mem_kv, V_TH_TALK, first)

    gated = q_spk * kv_spk * gate_spk

    # proj conv(+bias)+BN folded, then residual with the pre-LIF identity
    proj = jnp.dot(proj_w_ref[...], gated,
                   preferred_element_type=jnp.float32) + proj_shift
    return proj + x_t, v_spk


def ms_block_gau_kernel(x_ref,
                        qkv_w1_ref, qkv_s1_ref, pw1_ref, ps1_ref,
                        qkv_w2_ref, qkv_s2_ref, pw2_ref, ps2_ref,
                        ones_ref,
                        out_ref, v_ref,
                        m1f, m1g, m1q, m1k, m1kv,
                        m2f, m2g, m2q, m2k, m2kv):
    num_t, c, bn = x_ref.shape

    ones_blk = ones_ref[...]                 # (BN, BN) bf16 block-diag ones

    # Hoist the per-channel shift lane-broadcasts out of the unrolled T loop
    # (JAX does not CSE broadcast_in_dim; previously re-broadcast 8x/call).
    qkv_sh1 = jnp.broadcast_to(qkv_s1_ref[...], (3 * c, bn))
    qkv_sh2 = jnp.broadcast_to(qkv_s2_ref[...], (3 * c, bn))
    proj_sh1 = jnp.broadcast_to(ps1_ref[...], (c, bn))
    proj_sh2 = jnp.broadcast_to(ps2_ref[...], (c, bn))

    # T is tiny (4) and static: unroll at trace time so the scheduler sees the
    # whole body; membranes carry across iterations via VMEM scratch refs.
    # t == 0 is specialized (no membrane init stores, h = x/2 on first charge).
    for t in range(num_t):
        first = (t == 0)
        x_t = x_ref[t]
        y1, _ = _spike_gau_step(x_t, qkv_w1_ref, qkv_sh1, pw1_ref, proj_sh1,
                                ones_blk, m1f, m1g, m1q, m1k, m1kv, first)
        y2, v2 = _spike_gau_step(y1, qkv_w2_ref, qkv_sh2, pw2_ref, proj_sh2,
                                 ones_blk, m2f, m2g, m2q, m2k, m2kv, first)
        out_ref[t] = y2.astype(out_ref.dtype)
        v_ref[t] = v2.astype(v_ref.dtype)    # bf16 spikes ({0,1} exact)


def ms_block_gau_pallas(x_tcp, params1, params2, batch):
    """Fused MS_Block_GAU.  x_tcp: (T, C, B*N) float32.  Returns (out, v2)."""
    T, C, BN = x_tcp.shape
    N = BN // batch

    # Block-diagonal ones matrix: fused segmented-sum over spatial N +
    # broadcast-back in a single MXU matmul.  Built under jit -> constant.
    seg = jnp.arange(BN, dtype=jnp.int32) // N
    ones_blk = (seg[:, None] == seg[None, :]).astype(jnp.bfloat16)  # (BN, BN)

    vmem = pl.BlockSpec(memory_space=pltpu.MemorySpace.VMEM)
    mem_big = pltpu.VMEM((C, BN), jnp.float32)

    out, v = pl.pallas_call(
        ms_block_gau_kernel,
        out_shape=(jax.ShapeDtypeStruct((T, C, BN), jnp.float32),
                   jax.ShapeDtypeStruct((T, C, BN), jnp.bfloat16)),
        in_specs=[vmem] * 10,
        out_specs=(vmem, vmem),
        scratch_shapes=[mem_big] * 5      # block 1 membranes
                      + [mem_big] * 5,    # block 2 membranes
    )(x_tcp,
      params1["qkv_w"], params1["qkv_shift"],
      params1["proj_w"], params1["proj_shift"],
      params2["qkv_w"], params2["qkv_shift"],
      params2["proj_w"], params2["proj_shift"],
      ones_blk)
    return out, v


def _fold_conv_bn(w, gamma, beta, mean, var, conv_bias=None):
    """Fold eval-mode BatchNorm (and conv bias) into the conv weight / a shift."""
    scale = gamma / jnp.sqrt(var + BN_EPS)          # (C,)
    w_folded = w * scale[:, None]                   # scale output channels
    shift = beta - mean * scale
    if conv_bias is not None:
        shift = shift + conv_bias * scale           # conv bias is applied pre-BN
    return w_folded, shift[:, None]                 # (C, C), (C, 1)


def init_spike_gau_params(key, dim):
    """Deterministic synthetic parameters for one SpikeGAU block (BN eval mode)."""
    ks = jax.random.split(key, 10)

    def conv_w(k):
        # 1x1 conv kernel (C_out, C_in, 1, 1) -> (C_out, C_in)
        return 0.1 * jax.random.normal(k, (dim, dim), jnp.float32)

    def bn_stats(k):
        k1, k2, k3, k4 = jax.random.split(k, 4)
        gamma = 1.0 + 0.1 * jax.random.normal(k1, (dim,), jnp.float32)
        beta = 0.1 * jax.random.normal(k2, (dim,), jnp.float32)
        mean = 0.1 * jax.random.normal(k3, (dim,), jnp.float32)
        var = jax.random.uniform(k4, (dim,), jnp.float32, minval=0.5, maxval=1.5)
        return gamma, beta, mean, var

    gate_bias = 0.1 * jax.random.normal(ks[0], (dim,), jnp.float32)
    proj_bias = 0.1 * jax.random.normal(ks[1], (dim,), jnp.float32)

    gate_w, gate_sh = _fold_conv_bn(conv_w(ks[6]), *bn_stats(ks[2]),
                                    conv_bias=gate_bias)
    q_w, q_sh = _fold_conv_bn(conv_w(ks[7]), *bn_stats(ks[3]))
    k_w, k_sh = _fold_conv_bn(conv_w(ks[8]), *bn_stats(ks[4]))
    proj_w, proj_sh = _fold_conv_bn(conv_w(ks[9]), *bn_stats(ks[5]),
                                    conv_bias=proj_bias)

    return {
        # gate / q / k 1x1 convs fused into one (3C, C) matmul
        "qkv_w": jnp.concatenate([gate_w, q_w, k_w], axis=0),
        "qkv_shift": jnp.concatenate([gate_sh, q_sh, k_sh], axis=0),
        "proj_w": proj_w,
        "proj_shift": proj_sh,
    }


@functools.partial(jax.jit, static_argnames=("num_heads",))
def ms_block_gau(x_nchw, params1, params2, num_heads):
    """MS_Block_GAU forward: two SpikeGAU blocks; returns (x, attn) like PyTorch."""
    T, B, C, H, W = x_nchw.shape
    N = H * W

    # NCHW -> lane-dense (T, C, B*N) kernel layout (B*N on the 128-lane axis)
    x_tcp = x_nchw.reshape(T, B, C, N).transpose(0, 2, 1, 3).reshape(T, C, B * N)

    out, v2 = ms_block_gau_pallas(x_tcp, params1, params2, B)

    # back to PyTorch shapes
    out_nchw = (out.reshape(T, C, B, N).transpose(0, 2, 1, 3)
                   .reshape(T, B, C, H, W))
    head_dim = C // num_heads
    attn = (v2.reshape(T, num_heads, head_dim, B, N)
              .transpose(0, 3, 1, 4, 2)            # (T, B, heads, N, head_dim)
              .astype(jnp.float32))                # spikes are {0,1}: exact
    return out_nchw, attn


if __name__ == "__main__":
    T, B, C, H, W = 4, 2, 32, 8, 8
    num_heads = 8

    key = jax.random.PRNGKey(0)
    kx, k1, k2 = jax.random.split(key, 3)
    x = 2.0 * jax.random.normal(kx, (T, B, C, H, W), jnp.float32)

    params1 = init_spike_gau_params(k1, C)
    params2 = init_spike_gau_params(k2, C)

    out, attn = ms_block_gau(x, params1, params2, num_heads)
    jax.block_until_ready((out, attn))

    assert out.shape == (T, B, C, H, W)
    assert attn.shape == (T, B, num_heads, H * W, C // num_heads)
    print("KERNEL_OK")
</pallas_src>

<mosaic_0001>
module attributes {stable_mosaic.version = 11 : i64} {
  func.func @ms_block_gau_kernel(%arg0: memref<4x32x128xf32, #tpu.memory_space<vmem>>, %arg1: memref<96x32xf32, #tpu.memory_space<vmem>>, %arg2: memref<96x1xf32, #tpu.memory_space<vmem>>, %arg3: memref<32x32xf32, #tpu.memory_space<vmem>>, %arg4: memref<32x1xf32, #tpu.memory_space<vmem>>, %arg5: memref<96x32xf32, #tpu.memory_space<vmem>>, %arg6: memref<96x1xf32, #tpu.memory_space<vmem>>, %arg7: memref<32x32xf32, #tpu.memory_space<vmem>>, %arg8: memref<32x1xf32, #tpu.memory_space<vmem>>, %arg9: memref<128x128xbf16, #tpu.memory_space<vmem>>, %arg10: memref<4x32x128xf32, #tpu.memory_space<vmem>>, %arg11: memref<4x32x128xbf16, #tpu.memory_space<vmem>>, %arg12: memref<32x128xf32, #tpu.memory_space<vmem>>, %arg13: memref<32x128xf32, #tpu.memory_space<vmem>>, %arg14: memref<32x128xf32, #tpu.memory_space<vmem>>, %arg15: memref<32x128xf32, #tpu.memory_space<vmem>>, %arg16: memref<32x128xf32, #tpu.memory_space<vmem>>, %arg17: memref<32x128xf32, #tpu.memory_space<vmem>>, %arg18: memref<32x128xf32, #tpu.memory_space<vmem>>, %arg19: memref<32x128xf32, #tpu.memory_space<vmem>>, %arg20: memref<32x128xf32, #tpu.memory_space<vmem>>, %arg21: memref<32x128xf32, #tpu.memory_space<vmem>>) attributes {dimension_semantics = [], scalar_prefetch = 0 : i64, scratch_operands = 10 : i64, tpu.core_type = #tpu.core_type<tc>} {
    %c0 = arith.constant 0 : index
    %c0_0 = arith.constant 0 : index
    %0 = vector.load %arg9[%c0, %c0_0] : memref<128x128xbf16, #tpu.memory_space<vmem>>, vector<128x128xbf16>
    %c0_1 = arith.constant 0 : index
    %c0_2 = arith.constant 0 : index
    %1 = vector.load %arg2[%c0_1, %c0_2] : memref<96x1xf32, #tpu.memory_space<vmem>>, vector<96x1xf32>
    %2 = vector.shape_cast %1 : vector<96x1xf32> to vector<96x1xf32>
    %3 = vector.broadcast %2 : vector<96x1xf32> to vector<96x128xf32>
    %c0_3 = arith.constant 0 : index
    %c0_4 = arith.constant 0 : index
    %4 = vector.load %arg6[%c0_3, %c0_4] : memref<96x1xf32, #tpu.memory_space<vmem>>, vector<96x1xf32>
    %5 = vector.shape_cast %4 : vector<96x1xf32> to vector<96x1xf32>
    %6 = vector.broadcast %5 : vector<96x1xf32> to vector<96x128xf32>
    %c0_5 = arith.constant 0 : index
    %c0_6 = arith.constant 0 : index
    %7 = vector.load %arg4[%c0_5, %c0_6] : memref<32x1xf32, #tpu.memory_space<vmem>>, vector<32x1xf32>
    %8 = vector.shape_cast %7 : vector<32x1xf32> to vector<32x1xf32>
    %9 = vector.broadcast %8 : vector<32x1xf32> to vector<32x128xf32>
    %c0_7 = arith.constant 0 : index
    %c0_8 = arith.constant 0 : index
    %10 = vector.load %arg8[%c0_7, %c0_8] : memref<32x1xf32, #tpu.memory_space<vmem>>, vector<32x1xf32>
    %11 = vector.shape_cast %10 : vector<32x1xf32> to vector<32x1xf32>
    %12 = vector.broadcast %11 : vector<32x1xf32> to vector<32x128xf32>
    %c0_9 = arith.constant 0 : index
    %c0_10 = arith.constant 0 : index
    %c0_11 = arith.constant 0 : index
    %13 = vector.load %arg0[%c0_9, %c0_10, %c0_11] : memref<4x32x128xf32, #tpu.memory_space<vmem>>, vector<1x32x128xf32>
    %14 = vector.shape_cast %13 : vector<1x32x128xf32> to vector<32x128xf32>
    %cst = arith.constant 5.000000e-01 : f32
    %15 = vector.broadcast %cst : f32 to vector<32x128xf32>
    %16 = arith.mulf %14, %15 : vector<32x128xf32>
    %cst_12 = arith.constant 1.000000e+00 : f32
    %17 = vector.broadcast %cst_12 : f32 to vector<32x128xf32>
    %18 = arith.cmpf oge, %16, %17 : vector<32x128xf32>
    %cst_13 = arith.constant 0.000000e+00 : f32
    %19 = vector.broadcast %cst_13 : f32 to vector<32x128xf32>
    %20 = arith.select %18, %19, %16 : vector<32x128xi1>, vector<32x128xf32>
    %c0_14 = arith.constant 0 : index
    %c0_15 = arith.constant 0 : index
    %21 = vector.load %arg12[%c0_14, %c0_15] : memref<32x128xf32, #tpu.memory_space<vmem>>, vector<32x128xf32>
    tpu.vector_store %arg12[%c0_14, %c0_15], %20 {strides = array<i32>} : memref<32x128xf32, #tpu.memory_space<vmem>>, vector<32x128xf32>,
    %22 = arith.extui %18 : vector<32x128xi1> to vector<32x128xi32>
    %23 = arith.sitofp %22 : vector<32x128xi32> to vector<32x128xf32>
    %c0_16 = arith.constant 0 : index
    %c0_17 = arith.constant 0 : index
    %24 = vector.load %arg1[%c0_16, %c0_17] : memref<96x32xf32, #tpu.memory_space<vmem>>, vector<96x32xf32>
    %cst_18 = arith.constant dense<0.000000e+00> : vector<96x128xf32>
    %25 = tpu.matmul %24, %23, %cst_18 {dimension_numbers = #tpu.dot_dimension_numbers<[1], [0], [0], [1], [0, 0, 1, 1], [], []>} : vector<96x32xf32>, vector<32x128xf32>, vector<96x128xf32> -> vector<96x128xf32>
    %26 = arith.addf %25, %3 : vector<96x128xf32>
    %27 = vector.extract_strided_slice %26 {offsets = [0, 0], sizes = [32, 128], strides = [1, 1]} : vector<96x128xf32> to vector<32x128xf32>
    %cst_19 = arith.constant 5.000000e-01 : f32
    %28 = vector.broadcast %cst_19 : f32 to vector<32x128xf32>
    %29 = arith.mulf %27, %28 : vector<32x128xf32>
    %cst_20 = arith.constant 1.000000e+00 : f32
    %30 = vector.broadcast %cst_20 : f32 to vector<32x128xf32>
    %31 = arith.cmpf oge, %29, %30 : vector<32x128xf32>
    %cst_21 = arith.constant 0.000000e+00 : f32
    %32 = vector.broadcast %cst_21 : f32 to vector<32x128xf32>
    %33 = arith.select %31, %32, %29 : vector<32x128xi1>, vector<32x128xf32>
    %c0_22 = arith.constant 0 : index
    %c0_23 = arith.constant 0 : index
    %34 = vector.load %arg13[%c0_22, %c0_23] : memref<32x128xf32, #tpu.memory_space<vmem>>, vector<32x128xf32>
    tpu.vector_store %arg13[%c0_22, %c0_23], %33 {strides = array<i32>} : memref<32x128xf32, #tpu.memory_space<vmem>>, vector<32x128xf32>,
    %35 = arith.extui %31 : vector<32x128xi1> to vector<32x128xi32>
    %36 = arith.sitofp %35 : vector<32x128xi32> to vector<32x128xf32>
    %37 = vector.extract_strided_slice %26 {offsets = [32, 0], sizes = [32, 128], strides = [1, 1]} : vector<96x128xf32> to vector<32x128xf32>
    %cst_24 = arith.constant 5.000000e-01 : f32
    %38 = vector.broadcast %cst_24 : f32 to vector<32x128xf32>
    %39 = arith.mulf %37, %38 : vector<32x128xf32>
    %cst_25 = arith.constant 1.000000e+00 : f32
    %40 = vector.broadcast %cst_25 : f32 to vector<32x128xf32>
    %41 = arith.cmpf oge, %39, %40 : vector<32x128xf32>
    %cst_26 = arith.constant 0.000000e+00 : f32
    %42 = vector.broadcast %cst_26 : f32 to vector<32x128xf32>
    %43 = arith.select %41, %42, %39 : vector<32x128xi1>, vector<32x128xf32>
    %c0_27 = arith.constant 0 : index
    %c0_28 = arith.constant 0 : index
    %44 = vector.load %arg14[%c0_27, %c0_28] : memref<32x128xf32, #tpu.memory_space<vmem>>, vector<32x128xf32>
    tpu.vector_store %arg14[%c0_27, %c0_28], %43 {strides = array<i32>} : memref<32x128xf32, #tpu.memory_space<vmem>>, vector<32x128xf32>,
    %45 = arith.extui %41 : vector<32x128xi1> to vector<32x128xi32>
    %46 = arith.sitofp %45 : vector<32x128xi32> to vector<32x128xf32>
    %47 = vector.extract_strided_slice %26 {offsets = [64, 0], sizes = [32, 128], strides = [1, 1]} : vector<96x128xf32> to vector<32x128xf32>
    %cst_29 = arith.constant 5.000000e-01 : f32
    %48 = vector.broadcast %cst_29 : f32 to vector<32x128xf32>
    %49 = arith.mulf %47, %48 : vector<32x128xf32>
    %cst_30 = arith.constant 1.000000e+00 : f32
    %50 = vector.broadcast %cst_30 : f32 to vector<32x128xf32>
    %51 = arith.cmpf oge, %49, %50 : vector<32x128xf32>
    %cst_31 = arith.constant 0.000000e+00 : f32
    %52 = vector.broadcast %cst_31 : f32 to vector<32x128xf32>
    %53 = arith.select %51, %52, %49 : vector<32x128xi1>, vector<32x128xf32>
    %c0_32 = arith.constant 0 : index
    %c0_33 = arith.constant 0 : index
    %54 = vector.load %arg15[%c0_32, %c0_33] : memref<32x128xf32, #tpu.memory_space<vmem>>, vector<32x128xf32>
    tpu.vector_store %arg15[%c0_32, %c0_33], %53 {strides = array<i32>} : memref<32x128xf32, #tpu.memory_space<vmem>>, vector<32x128xf32>,
    %55 = arith.extui %51 : vector<32x128xi1> to vector<32x128xi32>
    %56 = arith.sitofp %55 : vector<32x128xi32> to vector<32x128xf32>
    %57 = arith.mulf %56, %23 : vector<32x128xf32>
    %58 = arith.truncf %57 : vector<32x128xf32> to vector<32x128xbf16>
    %cst_34 = arith.constant dense<0.000000e+00> : vector<32x128xf32>
    %59 = tpu.matmul %58, %0, %cst_34 {dimension_numbers = #tpu.dot_dimension_numbers<[1], [0], [0], [1], [0, 0, 1, 1], [], []>} : vector<32x128xbf16>, vector<128x128xbf16>, vector<32x128xf32> -> vector<32x128xf32>
    %cst_35 = arith.constant 5.000000e-01 : f32
    %60 = vector.broadcast %cst_35 : f32 to vector<32x128xf32>
    %61 = arith.mulf %59, %60 : vector<32x128xf32>
    %cst_36 = arith.constant 5.000000e-01 : f32
    %62 = vector.broadcast %cst_36 : f32 to vector<32x128xf32>
    %63 = arith.cmpf oge, %61, %62 : vector<32x128xf32>
    %cst_37 = arith.constant 0.000000e+00 : f32
    %64 = vector.broadcast %cst_37 : f32 to vector<32x128xf32>
    %65 = arith.select %63, %64, %61 : vector<32x128xi1>, vector<32x128xf32>
    %c0_38 = arith.constant 0 : index
    %c0_39 = arith.constant 0 : index
    %66 = vector.load %arg16[%c0_38, %c0_39] : memref<32x128xf32, #tpu.memory_space<vmem>>, vector<32x128xf32>
    tpu.vector_store %arg16[%c0_38, %c0_39], %65 {strides = array<i32>} : memref<32x128xf32, #tpu.memory_space<vmem>>, vector<32x128xf32>,
    %67 = arith.extui %63 : vector<32x128xi1> to vector<32x128xi32>
    %68 = arith.sitofp %67 : vector<32x128xi32> to vector<32x128xf32>
    %69 = arith.mulf %46, %68 : vector<32x128xf32>
    %70 = arith.mulf %69, %36 : vector<32x128xf32>
    %c0_40 = arith.constant 0 : index
    %c0_41 = arith.constant 0 : index
    %71 = vector.load %arg3[%c0_40, %c0_41] : memref<32x32xf32, #tpu.memory_space<vmem>>, vector<32x32xf32>
    %cst_42 = arith.constant dense<0.000000e+00> : vector<32x128xf32>
    %72 = tpu.matmul %71, %70, %cst_42 {dimension_numbers = #tpu.dot_dimension_numbers<[1], [0], [0], [1], [0, 0, 1, 1], [], []>} : vector<32x32xf32>, vector<32x128xf32>, vector<32x128xf32> -> vector<32x128xf32>
    %73 = arith.addf %72, %9 : vector<32x128xf32>
    %74 = arith.addf %73, %14 : vector<32x128xf32>
    %cst_43 = arith.constant 5.000000e-01 : f32
    %75 = vector.broadcast %cst_43 : f32 to vector<32x128xf32>
    %76 = arith.mulf %74, %75 : vector<32x128xf32>
    %cst_44 = arith.constant 1.000000e+00 : f32
    %77 = vector.broadcast %cst_44 : f32 to vector<32x128xf32>
    %78 = arith.cmpf oge, %76, %77 : vector<32x128xf32>
    %cst_45 = arith.constant 0.000000e+00 : f32
    %79 = vector.broadcast %cst_45 : f32 to vector<32x128xf32>
    %80 = arith.select %78, %79, %76 : vector<32x128xi1>, vector<32x128xf32>
    %c0_46 = arith.constant 0 : index
    %c0_47 = arith.constant 0 : index
    %81 = vector.load %arg17[%c0_46, %c0_47] : memref<32x128xf32, #tpu.memory_space<vmem>>, vector<32x128xf32>
    tpu.vector_store %arg17[%c0_46, %c0_47], %80 {strides = array<i32>} : memref<32x128xf32, #tpu.memory_space<vmem>>, vector<32x128xf32>,
    %82 = arith.extui %78 : vector<32x128xi1> to vector<32x128xi32>
    %83 = arith.sitofp %82 : vector<32x128xi32> to vector<32x128xf32>
    %c0_48 = arith.constant 0 : index
    %c0_49 = arith.constant 0 : index
    %84 = vector.load %arg5[%c0_48, %c0_49] : memref<96x32xf32, #tpu.memory_space<vmem>>, vector<96x32xf32>
    %cst_50 = arith.constant dense<0.000000e+00> : vector<96x128xf32>
    %85 = tpu.matmul %84, %83, %cst_50 {dimension_numbers = #tpu.dot_dimension_numbers<[1], [0], [0], [1], [0, 0, 1, 1], [], []>} : vector<96x32xf32>, vector<32x128xf32>, vector<96x128xf32> -> vector<96x128xf32>
    %86 = arith.addf %85, %6 : vector<96x128xf32>
    %87 = vector.extract_strided_slice %86 {offsets = [0, 0], sizes = [32, 128], strides = [1, 1]} : vector<96x128xf32> to vector<32x128xf32>
    %cst_51 = arith.constant 5.000000e-01 : f32
    %88 = vector.broadcast %cst_51 : f32 to vector<32x128xf32>
    %89 = arith.mulf %87, %88 : vector<32x128xf32>
    %cst_52 = arith.constant 1.000000e+00 : f32
    %90 = vector.broadcast %cst_52 : f32 to vector<32x128xf32>
    %91 = arith.cmpf oge, %89, %90 : vector<32x128xf32>
    %cst_53 = arith.constant 0.000000e+00 : f32
    %92 = vector.broadcast %cst_53 : f32 to vector<32x128xf32>
    %93 = arith.select %91, %92, %89 : vector<32x128xi1>, vector<32x128xf32>
    %c0_54 = arith.constant 0 : index
    %c0_55 = arith.constant 0 : index
    %94 = vector.load %arg18[%c0_54, %c0_55] : memref<32x128xf32, #tpu.memory_space<vmem>>, vector<32x128xf32>
    tpu.vector_store %arg18[%c0_54, %c0_55], %93 {strides = array<i32>} : memref<32x128xf32, #tpu.memory_space<vmem>>, vector<32x128xf32>,
    %95 = arith.extui %91 : vector<32x128xi1> to vector<32x128xi32>
    %96 = arith.sitofp %95 : vector<32x128xi32> to vector<32x128xf32>
    %97 = vector.extract_strided_slice %86 {offsets = [32, 0], sizes = [32, 128], strides = [1, 1]} : vector<96x128xf32> to vector<32x128xf32>
    %cst_56 = arith.constant 5.000000e-01 : f32
    %98 = vector.broadcast %cst_56 : f32 to vector<32x128xf32>
    %99 = arith.mulf %97, %98 : vector<32x128xf32>
    %cst_57 = arith.constant 1.000000e+00 : f32
    %100 = vector.broadcast %cst_57 : f32 to vector<32x128xf32>
    %101 = arith.cmpf oge, %99, %100 : vector<32x128xf32>
    %cst_58 = arith.constant 0.000000e+00 : f32
    %102 = vector.broadcast %cst_58 : f32 to vector<32x128xf32>
    %103 = arith.select %101, %102, %99 : vector<32x128xi1>, vector<32x128xf32>
    %c0_59 = arith.constant 0 : index
    %c0_60 = arith.constant 0 : index
    %104 = vector.load %arg19[%c0_59, %c0_60] : memref<32x128xf32, #tpu.memory_space<vmem>>, vector<32x128xf32>
    tpu.vector_store %arg19[%c0_59, %c0_60], %103 {strides = array<i32>} : memref<32x128xf32, #tpu.memory_space<vmem>>, vector<32x128xf32>,
    %105 = arith.extui %101 : vector<32x128xi1> to vector<32x128xi32>
    %106 = arith.sitofp %105 : vector<32x128xi32> to vector<32x128xf32>
    %107 = vector.extract_strided_slice %86 {offsets = [64, 0], sizes = [32, 128], strides = [1, 1]} : vector<96x128xf32> to vector<32x128xf32>
    %cst_61 = arith.constant 5.000000e-01 : f32
    %108 = vector.broadcast %cst_61 : f32 to vector<32x128xf32>
    %109 = arith.mulf %107, %108 : vector<32x128xf32>
    %cst_62 = arith.constant 1.000000e+00 : f32
    %110 = vector.broadcast %cst_62 : f32 to vector<32x128xf32>
    %111 = arith.cmpf oge, %109, %110 : vector<32x128xf32>
    %cst_63 = arith.constant 0.000000e+00 : f32
    %112 = vector.broadcast %cst_63 : f32 to vector<32x128xf32>
    %113 = arith.select %111, %112, %109 : vector<32x128xi1>, vector<32x128xf32>
    %c0_64 = arith.constant 0 : index
    %c0_65 = arith.constant 0 : index
    %114 = vector.load %arg20[%c0_64, %c0_65] : memref<32x128xf32, #tpu.memory_space<vmem>>, vector<32x128xf32>
    tpu.vector_store %arg20[%c0_64, %c0_65], %113 {strides = array<i32>} : memref<32x128xf32, #tpu.memory_space<vmem>>, vector<32x128xf32>,
    %115 = arith.extui %111 : vector<32x128xi1> to vector<32x128xi32>
    %116 = arith.sitofp %115 : vector<32x128xi32> to vector<32x128xf32>
    %117 = arith.mulf %116, %83 : vector<32x128xf32>
    %118 = arith.truncf %117 : vector<32x128xf32> to vector<32x128xbf16>
    %cst_66 = arith.constant dense<0.000000e+00> : vector<32x128xf32>
    %119 = tpu.matmul %118, %0, %cst_66 {dimension_numbers = #tpu.dot_dimension_numbers<[1], [0], [0], [1], [0, 0, 1, 1], [], []>} : vector<32x128xbf16>, vector<128x128xbf16>, vector<32x128xf32> -> vector<32x128xf32>
    %cst_67 = arith.constant 5.000000e-01 : f32
    %120 = vector.broadcast %cst_67 : f32 to vector<32x128xf32>
    %121 = arith.mulf %119, %120 : vector<32x128xf32>
    %cst_68 = arith.constant 5.000000e-01 : f32
    %122 = vector.broadcast %cst_68 : f32 to vector<32x128xf32>
    %123 = arith.cmpf oge, %121, %122 : vector<32x128xf32>
    %cst_69 = arith.constant 0.000000e+00 : f32
    %124 = vector.broadcast %cst_69 : f32 to vector<32x128xf32>
    %125 = arith.select %123, %124, %121 : vector<32x128xi1>, vector<32x128xf32>
    %c0_70 = arith.constant 0 : index
    %c0_71 = arith.constant 0 : index
    %126 = vector.load %arg21[%c0_70, %c0_71] : memref<32x128xf32, #tpu.memory_space<vmem>>, vector<32x128xf32>
    tpu.vector_store %arg21[%c0_70, %c0_71], %125 {strides = array<i32>} : memref<32x128xf32, #tpu.memory_space<vmem>>, vector<32x128xf32>,
    %127 = arith.extui %123 : vector<32x128xi1> to vector<32x128xi32>
    %128 = arith.sitofp %127 : vector<32x128xi32> to vector<32x128xf32>
    %129 = arith.mulf %106, %128 : vector<32x128xf32>
    %130 = arith.mulf %129, %96 : vector<32x128xf32>
    %c0_72 = arith.constant 0 : index
    %c0_73 = arith.constant 0 : index
    %131 = vector.load %arg7[%c0_72, %c0_73] : memref<32x32xf32, #tpu.memory_space<vmem>>, vector<32x32xf32>
    %cst_74 = arith.constant dense<0.000000e+00> : vector<32x128xf32>
    %132 = tpu.matmul %131, %130, %cst_74 {dimension_numbers = #tpu.dot_dimension_numbers<[1], [0], [0], [1], [0, 0, 1, 1], [], []>} : vector<32x32xf32>, vector<32x128xf32>, vector<32x128xf32> -> vector<32x128xf32>
    %133 = arith.addf %132, %12 : vector<32x128xf32>
    %134 = arith.addf %133, %74 : vector<32x128xf32>
    %c0_75 = arith.constant 0 : index
    %c0_76 = arith.constant 0 : index
    %c0_77 = arith.constant 0 : index
    %135 = vector.load %arg10[%c0_75, %c0_76, %c0_77] : memref<4x32x128xf32, #tpu.memory_space<vmem>>, vector<1x32x128xf32>
    %136 = vector.shape_cast %135 : vector<1x32x128xf32> to vector<32x128xf32>
    %137 = vector.shape_cast %134 : vector<32x128xf32> to vector<1x32x128xf32>
    tpu.vector_store %arg10[%c0_75, %c0_76, %c0_77], %137 {strides = array<i32>} : memref<4x32x128xf32, #tpu.memory_space<vmem>>, vector<1x32x128xf32>,
    %138 = arith.truncf %83 : vector<32x128xf32> to vector<32x128xbf16>
    %c0_78 = arith.constant 0 : index
    %c0_79 = arith.constant 0 : index
    %c0_80 = arith.constant 0 : index
    %139 = vector.load %arg11[%c0_78, %c0_79, %c0_80] : memref<4x32x128xbf16, #tpu.memory_space<vmem>>, vector<1x32x128xbf16>
    %140 = vector.shape_cast %139 : vector<1x32x128xbf16> to vector<32x128xbf16>
    %141 = vector.shape_cast %138 : vector<32x128xbf16> to vector<1x32x128xbf16>
    tpu.vector_store %arg11[%c0_78, %c0_79, %c0_80], %141 {strides = array<i32>} : memref<4x32x128xbf16, #tpu.memory_space<vmem>>, vector<1x32x128xbf16>,
    %c1 = arith.constant 1 : index
    %c0_81 = arith.constant 0 : index
    %c0_82 = arith.constant 0 : index
    %142 = vector.load %arg0[%c1, %c0_81, %c0_82] : memref<4x32x128xf32, #tpu.memory_space<vmem>>, vector<1x32x128xf32>
    %143 = vector.shape_cast %142 : vector<1x32x128xf32> to vector<32x128xf32>
    %c0_83 = arith.constant 0 : index
    %c0_84 = arith.constant 0 : index
    %144 = vector.load %arg12[%c0_83, %c0_84] : memref<32x128xf32, #tpu.memory_space<vmem>>, vector<32x128xf32>
    %145 = arith.addf %144, %143 : vector<32x128xf32>
    %cst_85 = arith.constant 5.000000e-01 : f32
    %146 = vector.broadcast %cst_85 : f32 to vector<32x128xf32>
    %147 = arith.mulf %145, %146 : vector<32x128xf32>
    %cst_86 = arith.constant 1.000000e+00 : f32
    %148 = vector.broadcast %cst_86 : f32 to vector<32x128xf32>
    %149 = arith.cmpf oge, %147, %148 : vector<32x128xf32>
    %cst_87 = arith.constant 0.000000e+00 : f32
    %150 = vector.broadcast %cst_87 : f32 to vector<32x128xf32>
    %151 = arith.select %149, %150, %147 : vector<32x128xi1>, vector<32x128xf32>
    %c0_88 = arith.constant 0 : index
    %c0_89 = arith.constant 0 : index
    %152 = vector.load %arg12[%c0_88, %c0_89] : memref<32x128xf32, #tpu.memory_space<vmem>>, vector<32x128xf32>
    tpu.vector_store %arg12[%c0_88, %c0_89], %151 {strides = array<i32>} : memref<32x128xf32, #tpu.memory_space<vmem>>, vector<32x128xf32>,
    %153 = arith.extui %149 : vector<32x128xi1> to vector<32x128xi32>
    %154 = arith.sitofp %153 : vector<32x128xi32> to vector<32x128xf32>
    %c0_90 = arith.constant 0 : index
    %c0_91 = arith.constant 0 : index
    %155 = vector.load %arg1[%c0_90, %c0_91] : memref<96x32xf32, #tpu.memory_space<vmem>>, vector<96x32xf32>
    %cst_92 = arith.constant dense<0.000000e+00> : vector<96x128xf32>
    %156 = tpu.matmul %155, %154, %cst_92 {dimension_numbers = #tpu.dot_dimension_numbers<[1], [0], [0], [1], [0, 0, 1, 1], [], []>} : vector<96x32xf32>, vector<32x128xf32>, vector<96x128xf32> -> vector<96x128xf32>
    %157 = arith.addf %156, %3 : vector<96x128xf32>
    %158 = vector.extract_strided_slice %157 {offsets = [0, 0], sizes = [32, 128], strides = [1, 1]} : vector<96x128xf32> to vector<32x128xf32>
    %c0_93 = arith.constant 0 : index
    %c0_94 = arith.constant 0 : index
    %159 = vector.load %arg13[%c0_93, %c0_94] : memref<32x128xf32, #tpu.memory_space<vmem>>, vector<32x128xf32>
    %160 = arith.addf %159, %158 : vector<32x128xf32>
    %cst_95 = arith.constant 5.000000e-01 : f32
    %161 = vector.broadcast %cst_95 : f32 to vector<32x128xf32>
    %162 = arith.mulf %160, %161 : vector<32x128xf32>
    %cst_96 = arith.constant 1.000000e+00 : f32
    %163 = vector.broadcast %cst_96 : f32 to vector<32x128xf32>
    %164 = arith.cmpf oge, %162, %163 : vector<32x128xf32>
    %cst_97 = arith.constant 0.000000e+00 : f32
    %165 = vector.broadcast %cst_97 : f32 to vector<32x128xf32>
    %166 = arith.select %164, %165, %162 : vector<32x128xi1>, vector<32x128xf32>
    %c0_98 = arith.constant 0 : index
    %c0_99 = arith.constant 0 : index
    %167 = vector.load %arg13[%c0_98, %c0_99] : memref<32x128xf32, #tpu.memory_space<vmem>>, vector<32x128xf32>
    tpu.vector_store %arg13[%c0_98, %c0_99], %166 {strides = array<i32>} : memref<32x128xf32, #tpu.memory_space<vmem>>, vector<32x128xf32>,
    %168 = arith.extui %164 : vector<32x128xi1> to vector<32x128xi32>
    %169 = arith.sitofp %168 : vector<32x128xi32> to vector<32x128xf32>
    %170 = vector.extract_strided_slice %157 {offsets = [32, 0], sizes = [32, 128], strides = [1, 1]} : vector<96x128xf32> to vector<32x128xf32>
    %c0_100 = arith.constant 0 : index
    %c0_101 = arith.constant 0 : index
    %171 = vector.load %arg14[%c0_100, %c0_101] : memref<32x128xf32, #tpu.memory_space<vmem>>, vector<32x128xf32>
    %172 = arith.addf %171, %170 : vector<32x128xf32>
    %cst_102 = arith.constant 5.000000e-01 : f32
    %173 = vector.broadcast %cst_102 : f32 to vector<32x128xf32>
    %174 = arith.mulf %172, %173 : vector<32x128xf32>
    %cst_103 = arith.constant 1.000000e+00 : f32
    %175 = vector.broadcast %cst_103 : f32 to vector<32x128xf32>
    %176 = arith.cmpf oge, %174, %175 : vector<32x128xf32>
    %cst_104 = arith.constant 0.000000e+00 : f32
    %177 = vector.broadcast %cst_104 : f32 to vector<32x128xf32>
    %178 = arith.select %176, %177, %174 : vector<32x128xi1>, vector<32x128xf32>
    %c0_105 = arith.constant 0 : index
    %c0_106 = arith.constant 0 : index
    %179 = vector.load %arg14[%c0_105, %c0_106] : memref<32x128xf32, #tpu.memory_space<vmem>>, vector<32x128xf32>
    tpu.vector_store %arg14[%c0_105, %c0_106], %178 {strides = array<i32>} : memref<32x128xf32, #tpu.memory_space<vmem>>, vector<32x128xf32>,
    %180 = arith.extui %176 : vector<32x128xi1> to vector<32x128xi32>
    %181 = arith.sitofp %180 : vector<32x128xi32> to vector<32x128xf32>
    %182 = vector.extract_strided_slice %157 {offsets = [64, 0], sizes = [32, 128], strides = [1, 1]} : vector<96x128xf32> to vector<32x128xf32>
    %c0_107 = arith.constant 0 : index
    %c0_108 = arith.constant 0 : index
    %183 = vector.load %arg15[%c0_107, %c0_108] : memref<32x128xf32, #tpu.memory_space<vmem>>, vector<32x128xf32>
    %184 = arith.addf %183, %182 : vector<32x128xf32>
    %cst_109 = arith.constant 5.000000e-01 : f32
    %185 = vector.broadcast %cst_109 : f32 to vector<32x128xf32>
    %186 = arith.mulf %184, %185 : vector<32x128xf32>
    %cst_110 = arith.constant 1.000000e+00 : f32
    %187 = vector.broadcast %cst_110 : f32 to vector<32x128xf32>
    %188 = arith.cmpf oge, %186, %187 : vector<32x128xf32>
    %cst_111 = arith.constant 0.000000e+00 : f32
    %189 = vector.broadcast %cst_111 : f32 to vector<32x128xf32>
    %190 = arith.select %188, %189, %186 : vector<32x128xi1>, vector<32x128xf32>
    %c0_112 = arith.constant 0 : index
    %c0_113 = arith.constant 0 : index
    %191 = vector.load %arg15[%c0_112, %c0_113] : memref<32x128xf32, #tpu.memory_space<vmem>>, vector<32x128xf32>
    tpu.vector_store %arg15[%c0_112, %c0_113], %190 {strides = array<i32>} : memref<32x128xf32, #tpu.memory_space<vmem>>, vector<32x128xf32>,
    %192 = arith.extui %188 : vector<32x128xi1> to vector<32x128xi32>
    %193 = arith.sitofp %192 : vector<32x128xi32> to vector<32x128xf32>
    %194 = arith.mulf %193, %154 : vector<32x128xf32>
    %195 = arith.truncf %194 : vector<32x128xf32> to vector<32x128xbf16>
    %cst_114 = arith.constant dense<0.000000e+00> : vector<32x128xf32>
    %196 = tpu.matmul %195, %0, %cst_114 {dimension_numbers = #tpu.dot_dimension_numbers<[1], [0], [0], [1], [0, 0, 1, 1], [], []>} : vector<32x128xbf16>, vector<128x128xbf16>, vector<32x128xf32> -> vector<32x128xf32>
    %c0_115 = arith.constant 0 : index
    %c0_116 = arith.constant 0 : index
    %197 = vector.load %arg16[%c0_115, %c0_116] : memref<32x128xf32, #tpu.memory_space<vmem>>, vector<32x128xf32>
    %198 = arith.addf %197, %196 : vector<32x128xf32>
    %cst_117 = arith.constant 5.000000e-01 : f32
    %199 = vector.broadcast %cst_117 : f32 to vector<32x128xf32>
    %200 = arith.mulf %198, %199 : vector<32x128xf32>
    %cst_118 = arith.constant 5.000000e-01 : f32
    %201 = vector.broadcast %cst_118 : f32 to vector<32x128xf32>
    %202 = arith.cmpf oge, %200, %201 : vector<32x128xf32>
    %cst_119 = arith.constant 0.000000e+00 : f32
    %203 = vector.broadcast %cst_119 : f32 to vector<32x128xf32>
    %204 = arith.select %202, %203, %200 : vector<32x128xi1>, vector<32x128xf32>
    %c0_120 = arith.constant 0 : index
    %c0_121 = arith.constant 0 : index
    %205 = vector.load %arg16[%c0_120, %c0_121] : memref<32x128xf32, #tpu.memory_space<vmem>>, vector<32x128xf32>
    tpu.vector_store %arg16[%c0_120, %c0_121], %204 {strides = array<i32>} : memref<32x128xf32, #tpu.memory_space<vmem>>, vector<32x128xf32>,
    %206 = arith.extui %202 : vector<32x128xi1> to vector<32x128xi32>
    %207 = arith.sitofp %206 : vector<32x128xi32> to vector<32x128xf32>
    %208 = arith.mulf %181, %207 : vector<32x128xf32>
    %209 = arith.mulf %208, %169 : vector<32x128xf32>
    %c0_122 = arith.constant 0 : index
    %c0_123 = arith.constant 0 : index
    %210 = vector.load %arg3[%c0_122, %c0_123] : memref<32x32xf32, #tpu.memory_space<vmem>>, vector<32x32xf32>
    %cst_124 = arith.constant dense<0.000000e+00> : vector<32x128xf32>
    %211 = tpu.matmul %210, %209, %cst_124 {dimension_numbers = #tpu.dot_dimension_numbers<[1], [0], [0], [1], [0, 0, 1, 1], [], []>} : vector<32x32xf32>, vector<32x128xf32>, vector<32x128xf32> -> vector<32x128xf32>
    %212 = arith.addf %211, %9 : vector<32x128xf32>
    %213 = arith.addf %212, %143 : vector<32x128xf32>
    %c0_125 = arith.constant 0 : index
    %c0_126 = arith.constant 0 : index
    %214 = vector.load %arg17[%c0_125, %c0_126] : memref<32x128xf32, #tpu.memory_space<vmem>>, vector<32x128xf32>
    %215 = arith.addf %214, %213 : vector<32x128xf32>
    %cst_127 = arith.constant 5.000000e-01 : f32
    %216 = vector.broadcast %cst_127 : f32 to vector<32x128xf32>
    %217 = arith.mulf %215, %216 : vector<32x128xf32>
    %cst_128 = arith.constant 1.000000e+00 : f32
    %218 = vector.broadcast %cst_128 : f32 to vector<32x128xf32>
    %219 = arith.cmpf oge, %217, %218 : vector<32x128xf32>
    %cst_129 = arith.constant 0.000000e+00 : f32
    %220 = vector.broadcast %cst_129 : f32 to vector<32x128xf32>
    %221 = arith.select %219, %220, %217 : vector<32x128xi1>, vector<32x128xf32>
    %c0_130 = arith.constant 0 : index
    %c0_131 = arith.constant 0 : index
    %222 = vector.load %arg17[%c0_130, %c0_131] : memref<32x128xf32, #tpu.memory_space<vmem>>, vector<32x128xf32>
    tpu.vector_store %arg17[%c0_130, %c0_131], %221 {strides = array<i32>} : memref<32x128xf32, #tpu.memory_space<vmem>>, vector<32x128xf32>,
    %223 = arith.extui %219 : vector<32x128xi1> to vector<32x128xi32>
    %224 = arith.sitofp %223 : vector<32x128xi32> to vector<32x128xf32>
    %c0_132 = arith.constant 0 : index
    %c0_133 = arith.constant 0 : index
    %225 = vector.load %arg5[%c0_132, %c0_133] : memref<96x32xf32, #tpu.memory_space<vmem>>, vector<96x32xf32>
    %cst_134 = arith.constant dense<0.000000e+00> : vector<96x128xf32>
    %226 = tpu.matmul %225, %224, %cst_134 {dimension_numbers = #tpu.dot_dimension_numbers<[1], [0], [0], [1], [0, 0, 1, 1], [], []>} : vector<96x32xf32>, vector<32x128xf32>, vector<96x128xf32> -> vector<96x128xf32>
    %227 = arith.addf %226, %6 : vector<96x128xf32>
    %228 = vector.extract_strided_slice %227 {offsets = [0, 0], sizes = [32, 128], strides = [1, 1]} : vector<96x128xf32> to vector<32x128xf32>
    %c0_135 = arith.constant 0 : index
    %c0_136 = arith.constant 0 : index
    %229 = vector.load %arg18[%c0_135, %c0_136] : memref<32x128xf32, #tpu.memory_space<vmem>>, vector<32x128xf32>
    %230 = arith.addf %229, %228 : vector<32x128xf32>
    %cst_137 = arith.constant 5.000000e-01 : f32
    %231 = vector.broadcast %cst_137 : f32 to vector<32x128xf32>
    %232 = arith.mulf %230, %231 : vector<32x128xf32>
    %cst_138 = arith.constant 1.000000e+00 : f32
    %233 = vector.broadcast %cst_138 : f32 to vector<32x128xf32>
    %234 = arith.cmpf oge, %232, %233 : vector<32x128xf32>
    %cst_139 = arith.constant 0.000000e+00 : f32
    %235 = vector.broadcast %cst_139 : f32 to vector<32x128xf32>
    %236 = arith.select %234, %235, %232 : vector<32x128xi1>, vector<32x128xf32>
    %c0_140 = arith.constant 0 : index
    %c0_141 = arith.constant 0 : index
    %237 = vector.load %arg18[%c0_140, %c0_141] : memref<32x128xf32, #tpu.memory_space<vmem>>, vector<32x128xf32>
    tpu.vector_store %arg18[%c0_140, %c0_141], %236 {strides = array<i32>} : memref<32x128xf32, #tpu.memory_space<vmem>>, vector<32x128xf32>,
    %238 = arith.extui %234 : vector<32x128xi1> to vector<32x128xi32>
    %239 = arith.sitofp %238 : vector<32x128xi32> to vector<32x128xf32>
    %240 = vector.extract_strided_slice %227 {offsets = [32, 0], sizes = [32, 128], strides = [1, 1]} : vector<96x128xf32> to vector<32x128xf32>
    %c0_142 = arith.constant 0 : index
    %c0_143 = arith.constant 0 : index
    %241 = vector.load %arg19[%c0_142, %c0_143] : memref<32x128xf32, #tpu.memory_space<vmem>>, vector<32x128xf32>
    %242 = arith.addf %241, %240 : vector<32x128xf32>
    %cst_144 = arith.constant 5.000000e-01 : f32
    %243 = vector.broadcast %cst_144 : f32 to vector<32x128xf32>
    %244 = arith.mulf %242, %243 : vector<32x128xf32>
    %cst_145 = arith.constant 1.000000e+00 : f32
    %245 = vector.broadcast %cst_145 : f32 to vector<32x128xf32>
    %246 = arith.cmpf oge, %244, %245 : vector<32x128xf32>
    %cst_146 = arith.constant 0.000000e+00 : f32
    %247 = vector.broadcast %cst_146 : f32 to vector<32x128xf32>
    %248 = arith.select %246, %247, %244 : vector<32x128xi1>, vector<32x128xf32>
    %c0_147 = arith.constant 0 : index
    %c0_148 = arith.constant 0 : index
    %249 = vector.load %arg19[%c0_147, %c0_148] : memref<32x128xf32, #tpu.memory_space<vmem>>, vector<32x128xf32>
    tpu.vector_store %arg19[%c0_147, %c0_148], %248 {strides = array<i32>} : memref<32x128xf32, #tpu.memory_space<vmem>>, vector<32x128xf32>,
    %250 = arith.extui %246 : vector<32x128xi1> to vector<32x128xi32>
    %251 = arith.sitofp %250 : vector<32x128xi32> to vector<32x128xf32>
    %252 = vector.extract_strided_slice %227 {offsets = [64, 0], sizes = [32, 128], strides = [1, 1]} : vector<96x128xf32> to vector<32x128xf32>
    %c0_149 = arith.constant 0 : index
    %c0_150 = arith.constant 0 : index
    %253 = vector.load %arg20[%c0_149, %c0_150] : memref<32x128xf32, #tpu.memory_space<vmem>>, vector<32x128xf32>
    %254 = arith.addf %253, %252 : vector<32x128xf32>
    %cst_151 = arith.constant 5.000000e-01 : f32
    %255 = vector.broadcast %cst_151 : f32 to vector<32x128xf32>
    %256 = arith.mulf %254, %255 : vector<32x128xf32>
    %cst_152 = arith.constant 1.000000e+00 : f32
    %257 = vector.broadcast %cst_152 : f32 to vector<32x128xf32>
    %258 = arith.cmpf oge, %256, %257 : vector<32x128xf32>
    %cst_153 = arith.constant 0.000000e+00 : f32
    %259 = vector.broadcast %cst_153 : f32 to vector<32x128xf32>
    %260 = arith.select %258, %259, %256 : vector<32x128xi1>, vector<32x128xf32>
    %c0_154 = arith.constant 0 : index
    %c0_155 = arith.constant 0 : index
    %261 = vector.load %arg20[%c0_154, %c0_155] : memref<32x128xf32, #tpu.memory_space<vmem>>, vector<32x128xf32>
    tpu.vector_store %arg20[%c0_154, %c0_155], %260 {strides = array<i32>} : memref<32x128xf32, #tpu.memory_space<vmem>>, vector<32x128xf32>,
    %262 = arith.extui %258 : vector<32x128xi1> to vector<32x128xi32>
    %263 = arith.sitofp %262 : vector<32x128xi32> to vector<32x128xf32>
    %264 = arith.mulf %263, %224 : vector<32x128xf32>
    %265 = arith.truncf %264 : vector<32x128xf32> to vector<32x128xbf16>
    %cst_156 = arith.constant dense<0.000000e+00> : vector<32x128xf32>
    %266 = tpu.matmul %265, %0, %cst_156 {dimension_numbers = #tpu.dot_dimension_numbers<[1], [0], [0], [1], [0, 0, 1, 1], [], []>} : vector<32x128xbf16>, vector<128x128xbf16>, vector<32x128xf32> -> vector<32x128xf32>
    %c0_157 = arith.constant 0 : index
    %c0_158 = arith.constant 0 : index
    %267 = vector.load %arg21[%c0_157, %c0_158] : memref<32x128xf32, #tpu.memory_space<vmem>>, vector<32x128xf32>
    %268 = arith.addf %267, %266 : vector<32x128xf32>
    %cst_159 = arith.constant 5.000000e-01 : f32
    %269 = vector.broadcast %cst_159 : f32 to vector<32x128xf32>
    %270 = arith.mulf %268, %269 : vector<32x128xf32>
    %cst_160 = arith.constant 5.000000e-01 : f32
    %271 = vector.broadcast %cst_160 : f32 to vector<32x128xf32>
    %272 = arith.cmpf oge, %270, %271 : vector<32x128xf32>
    %cst_161 = arith.constant 0.000000e+00 : f32
    %273 = vector.broadcast %cst_161 : f32 to vector<32x128xf32>
    %274 = arith.select %272, %273, %270 : vector<32x128xi1>, vector<32x128xf32>
    %c0_162 = arith.constant 0 : index
    %c0_163 = arith.constant 0 : index
    %275 = vector.load %arg21[%c0_162, %c0_163] : memref<32x128xf32, #tpu.memory_space<vmem>>, vector<32x128xf32>
    tpu.vector_store %arg21[%c0_162, %c0_163], %274 {strides = array<i32>} : memref<32x128xf32, #tpu.memory_space<vmem>>, vector<32x128xf32>,
    %276 = arith.extui %272 : vector<32x128xi1> to vector<32x128xi32>
    %277 = arith.sitofp %276 : vector<32x128xi32> to vector<32x128xf32>
    %278 = arith.mulf %251, %277 : vector<32x128xf32>
    %279 = arith.mulf %278, %239 : vector<32x128xf32>
    %c0_164 = arith.constant 0 : index
    %c0_165 = arith.constant 0 : index
    %280 = vector.load %arg7[%c0_164, %c0_165] : memref<32x32xf32, #tpu.memory_space<vmem>>, vector<32x32xf32>
    %cst_166 = arith.constant dense<0.000000e+00> : vector<32x128xf32>
    %281 = tpu.matmul %280, %279, %cst_166 {dimension_numbers = #tpu.dot_dimension_numbers<[1], [0], [0], [1], [0, 0, 1, 1], [], []>} : vector<32x32xf32>, vector<32x128xf32>, vector<32x128xf32> -> vector<32x128xf32>
    %282 = arith.addf %281, %12 : vector<32x128xf32>
    %283 = arith.addf %282, %213 : vector<32x128xf32>
    %c1_167 = arith.constant 1 : index
    %c0_168 = arith.constant 0 : index
    %c0_169 = arith.constant 0 : index
    %284 = vector.load %arg10[%c1_167, %c0_168, %c0_169] : memref<4x32x128xf32, #tpu.memory_space<vmem>>, vector<1x32x128xf32>
    %285 = vector.shape_cast %284 : vector<1x32x128xf32> to vector<32x128xf32>
    %286 = vector.shape_cast %283 : vector<32x128xf32> to vector<1x32x128xf32>
    tpu.vector_store %arg10[%c1_167, %c0_168, %c0_169], %286 {strides = array<i32>} : memref<4x32x128xf32, #tpu.memory_space<vmem>>, vector<1x32x128xf32>,
    %287 = arith.truncf %224 : vector<32x128xf32> to vector<32x128xbf16>
    %c1_170 = arith.constant 1 : index
    %c0_171 = arith.constant 0 : index
    %c0_172 = arith.constant 0 : index
    %288 = vector.load %arg11[%c1_170, %c0_171, %c0_172] : memref<4x32x128xbf16, #tpu.memory_space<vmem>>, vector<1x32x128xbf16>
    %289 = vector.shape_cast %288 : vector<1x32x128xbf16> to vector<32x128xbf16>
    %290 = vector.shape_cast %287 : vector<32x128xbf16> to vector<1x32x128xbf16>
    tpu.vector_store %arg11[%c1_170, %c0_171, %c0_172], %290 {strides = array<i32>} : memref<4x32x128xbf16, #tpu.memory_space<vmem>>, vector<1x32x128xbf16>,
    %c2 = arith.constant 2 : index
    %c0_173 = arith.constant 0 : index
    %c0_174 = arith.constant 0 : index
    %291 = vector.load %arg0[%c2, %c0_173, %c0_174] : memref<4x32x128xf32, #tpu.memory_space<vmem>>, vector<1x32x128xf32>
    %292 = vector.shape_cast %291 : vector<1x32x128xf32> to vector<32x128xf32>
    %c0_175 = arith.constant 0 : index
    %c0_176 = arith.constant 0 : index
    %293 = vector.load %arg12[%c0_175, %c0_176] : memref<32x128xf32, #tpu.memory_space<vmem>>, vector<32x128xf32>
    %294 = arith.addf %293, %292 : vector<32x128xf32>
    %cst_177 = arith.constant 5.000000e-01 : f32
    %295 = vector.broadcast %cst_177 : f32 to vector<32x128xf32>
    %296 = arith.mulf %294, %295 : vector<32x128xf32>
    %cst_178 = arith.constant 1.000000e+00 : f32
    %297 = vector.broadcast %cst_178 : f32 to vector<32x128xf32>
    %298 = arith.cmpf oge, %296, %297 : vector<32x128xf32>
    %cst_179 = arith.constant 0.000000e+00 : f32
    %299 = vector.broadcast %cst_179 : f32 to vector<32x128xf32>
    %300 = arith.select %298, %299, %296 : vector<32x128xi1>, vector<32x128xf32>
    %c0_180 = arith.constant 0 : index
    %c0_181 = arith.constant 0 : index
    %301 = vector.load %arg12[%c0_180, %c0_181] : memref<32x128xf32, #tpu.memory_space<vmem>>, vector<32x128xf32>
    tpu.vector_store %arg12[%c0_180, %c0_181], %300 {strides = array<i32>} : memref<32x128xf32, #tpu.memory_space<vmem>>, vector<32x128xf32>,
    %302 = arith.extui %298 : vector<32x128xi1> to vector<32x128xi32>
    %303 = arith.sitofp %302 : vector<32x128xi32> to vector<32x128xf32>
    %c0_182 = arith.constant 0 : index
    %c0_183 = arith.constant 0 : index
    %304 = vector.load %arg1[%c0_182, %c0_183] : memref<96x32xf32, #tpu.memory_space<vmem>>, vector<96x32xf32>
    %cst_184 = arith.constant dense<0.000000e+00> : vector<96x128xf32>
    %305 = tpu.matmul %304, %303, %cst_184 {dimension_numbers = #tpu.dot_dimension_numbers<[1], [0], [0], [1], [0, 0, 1, 1], [], []>} : vector<96x32xf32>, vector<32x128xf32>, vector<96x128xf32> -> vector<96x128xf32>
    %306 = arith.addf %305, %3 : vector<96x128xf32>
    %307 = vector.extract_strided_slice %306 {offsets = [0, 0], sizes = [32, 128], strides = [1, 1]} : vector<96x128xf32> to vector<32x128xf32>
    %c0_185 = arith.constant 0 : index
    %c0_186 = arith.constant 0 : index
    %308 = vector.load %arg13[%c0_185, %c0_186] : memref<32x128xf32, #tpu.memory_space<vmem>>, vector<32x128xf32>
    %309 = arith.addf %308, %307 : vector<32x128xf32>
    %cst_187 = arith.constant 5.000000e-01 : f32
    %310 = vector.broadcast %cst_187 : f32 to vector<32x128xf32>
    %311 = arith.mulf %309, %310 : vector<32x128xf32>
    %cst_188 = arith.constant 1.000000e+00 : f32
    %312 = vector.broadcast %cst_188 : f32 to vector<32x128xf32>
    %313 = arith.cmpf oge, %311, %312 : vector<32x128xf32>
    %cst_189 = arith.constant 0.000000e+00 : f32
    %314 = vector.broadcast %cst_189 : f32 to vector<32x128xf32>
    %315 = arith.select %313, %314, %311 : vector<32x128xi1>, vector<32x128xf32>
    %c0_190 = arith.constant 0 : index
    %c0_191 = arith.constant 0 : index
    %316 = vector.load %arg13[%c0_190, %c0_191] : memref<32x128xf32, #tpu.memory_space<vmem>>, vector<32x128xf32>
    tpu.vector_store %arg13[%c0_190, %c0_191], %315 {strides = array<i32>} : memref<32x128xf32, #tpu.memory_space<vmem>>, vector<32x128xf32>,
    %317 = arith.extui %313 : vector<32x128xi1> to vector<32x128xi32>
    %318 = arith.sitofp %317 : vector<32x128xi32> to vector<32x128xf32>
    %319 = vector.extract_strided_slice %306 {offsets = [32, 0], sizes = [32, 128], strides = [1, 1]} : vector<96x128xf32> to vector<32x128xf32>
    %c0_192 = arith.constant 0 : index
    %c0_193 = arith.constant 0 : index
    %320 = vector.load %arg14[%c0_192, %c0_193] : memref<32x128xf32, #tpu.memory_space<vmem>>, vector<32x128xf32>
    %321 = arith.addf %320, %319 : vector<32x128xf32>
    %cst_194 = arith.constant 5.000000e-01 : f32
    %322 = vector.broadcast %cst_194 : f32 to vector<32x128xf32>
    %323 = arith.mulf %321, %322 : vector<32x128xf32>
    %cst_195 = arith.constant 1.000000e+00 : f32
    %324 = vector.broadcast %cst_195 : f32 to vector<32x128xf32>
    %325 = arith.cmpf oge, %323, %324 : vector<32x128xf32>
    %cst_196 = arith.constant 0.000000e+00 : f32
    %326 = vector.broadcast %cst_196 : f32 to vector<32x128xf32>
    %327 = arith.select %325, %326, %323 : vector<32x128xi1>, vector<32x128xf32>
    %c0_197 = arith.constant 0 : index
    %c0_198 = arith.constant 0 : index
    %328 = vector.load %arg14[%c0_197, %c0_198] : memref<32x128xf32, #tpu.memory_space<vmem>>, vector<32x128xf32>
    tpu.vector_store %arg14[%c0_197, %c0_198], %327 {strides = array<i32>} : memref<32x128xf32, #tpu.memory_space<vmem>>, vector<32x128xf32>,
    %329 = arith.extui %325 : vector<32x128xi1> to vector<32x128xi32>
    %330 = arith.sitofp %329 : vector<32x128xi32> to vector<32x128xf32>
    %331 = vector.extract_strided_slice %306 {offsets = [64, 0], sizes = [32, 128], strides = [1, 1]} : vector<96x128xf32> to vector<32x128xf32>
    %c0_199 = arith.constant 0 : index
    %c0_200 = arith.constant 0 : index
    %332 = vector.load %arg15[%c0_199, %c0_200] : memref<32x128xf32, #tpu.memory_space<vmem>>, vector<32x128xf32>
    %333 = arith.addf %332, %331 : vector<32x128xf32>
    %cst_201 = arith.constant 5.000000e-01 : f32
    %334 = vector.broadcast %cst_201 : f32 to vector<32x128xf32>
    %335 = arith.mulf %333, %334 : vector<32x128xf32>
    %cst_202 = arith.constant 1.000000e+00 : f32
    %336 = vector.broadcast %cst_202 : f32 to vector<32x128xf32>
    %337 = arith.cmpf oge, %335, %336 : vector<32x128xf32>
    %cst_203 = arith.constant 0.000000e+00 : f32
    %338 = vector.broadcast %cst_203 : f32 to vector<32x128xf32>
    %339 = arith.select %337, %338, %335 : vector<32x128xi1>, vector<32x128xf32>
    %c0_204 = arith.constant 0 : index
    %c0_205 = arith.constant 0 : index
    %340 = vector.load %arg15[%c0_204, %c0_205] : memref<32x128xf32, #tpu.memory_space<vmem>>, vector<32x128xf32>
    tpu.vector_store %arg15[%c0_204, %c0_205], %339 {strides = array<i32>} : memref<32x128xf32, #tpu.memory_space<vmem>>, vector<32x128xf32>,
    %341 = arith.extui %337 : vector<32x128xi1> to vector<32x128xi32>
    %342 = arith.sitofp %341 : vector<32x128xi32> to vector<32x128xf32>
    %343 = arith.mulf %342, %303 : vector<32x128xf32>
    %344 = arith.truncf %343 : vector<32x128xf32> to vector<32x128xbf16>
    %cst_206 = arith.constant dense<0.000000e+00> : vector<32x128xf32>
    %345 = tpu.matmul %344, %0, %cst_206 {dimension_numbers = #tpu.dot_dimension_numbers<[1], [0], [0], [1], [0, 0, 1, 1], [], []>} : vector<32x128xbf16>, vector<128x128xbf16>, vector<32x128xf32> -> vector<32x128xf32>
    %c0_207 = arith.constant 0 : index
    %c0_208 = arith.constant 0 : index
    %346 = vector.load %arg16[%c0_207, %c0_208] : memref<32x128xf32, #tpu.memory_space<vmem>>, vector<32x128xf32>
    %347 = arith.addf %346, %345 : vector<32x128xf32>
    %cst_209 = arith.constant 5.000000e-01 : f32
    %348 = vector.broadcast %cst_209 : f32 to vector<32x128xf32>
    %349 = arith.mulf %347, %348 : vector<32x128xf32>
    %cst_210 = arith.constant 5.000000e-01 : f32
    %350 = vector.broadcast %cst_210 : f32 to vector<32x128xf32>
    %351 = arith.cmpf oge, %349, %350 : vector<32x128xf32>
    %cst_211 = arith.constant 0.000000e+00 : f32
    %352 = vector.broadcast %cst_211 : f32 to vector<32x128xf32>
    %353 = arith.select %351, %352, %349 : vector<32x128xi1>, vector<32x128xf32>
    %c0_212 = arith.constant 0 : index
    %c0_213 = arith.constant 0 : index
    %354 = vector.load %arg16[%c0_212, %c0_213] : memref<32x128xf32, #tpu.memory_space<vmem>>, vector<32x128xf32>
    tpu.vector_store %arg16[%c0_212, %c0_213], %353 {strides = array<i32>} : memref<32x128xf32, #tpu.memory_space<vmem>>, vector<32x128xf32>,
    %355 = arith.extui %351 : vector<32x128xi1> to vector<32x128xi32>
    %356 = arith.sitofp %355 : vector<32x128xi32> to vector<32x128xf32>
    %357 = arith.mulf %330, %356 : vector<32x128xf32>
    %358 = arith.mulf %357, %318 : vector<32x128xf32>
    %c0_214 = arith.constant 0 : index
    %c0_215 = arith.constant 0 : index
    %359 = vector.load %arg3[%c0_214, %c0_215] : memref<32x32xf32, #tpu.memory_space<vmem>>, vector<32x32xf32>
    %cst_216 = arith.constant dense<0.000000e+00> : vector<32x128xf32>
    %360 = tpu.matmul %359, %358, %cst_216 {dimension_numbers = #tpu.dot_dimension_numbers<[1], [0], [0], [1], [0, 0, 1, 1], [], []>} : vector<32x32xf32>, vector<32x128xf32>, vector<32x128xf32> -> vector<32x128xf32>
    %361 = arith.addf %360, %9 : vector<32x128xf32>
    %362 = arith.addf %361, %292 : vector<32x128xf32>
    %c0_217 = arith.constant 0 : index
    %c0_218 = arith.constant 0 : index
    %363 = vector.load %arg17[%c0_217, %c0_218] : memref<32x128xf32, #tpu.memory_space<vmem>>, vector<32x128xf32>
    %364 = arith.addf %363, %362 : vector<32x128xf32>
    %cst_219 = arith.constant 5.000000e-01 : f32
    %365 = vector.broadcast %cst_219 : f32 to vector<32x128xf32>
    %366 = arith.mulf %364, %365 : vector<32x128xf32>
    %cst_220 = arith.constant 1.000000e+00 : f32
    %367 = vector.broadcast %cst_220 : f32 to vector<32x128xf32>
    %368 = arith.cmpf oge, %366, %367 : vector<32x128xf32>
    %cst_221 = arith.constant 0.000000e+00 : f32
    %369 = vector.broadcast %cst_221 : f32 to vector<32x128xf32>
    %370 = arith.select %368, %369, %366 : vector<32x128xi1>, vector<32x128xf32>
    %c0_222 = arith.constant 0 : index
    %c0_223 = arith.constant 0 : index
    %371 = vector.load %arg17[%c0_222, %c0_223] : memref<32x128xf32, #tpu.memory_space<vmem>>, vector<32x128xf32>
    tpu.vector_store %arg17[%c0_222, %c0_223], %370 {strides = array<i32>} : memref<32x128xf32, #tpu.memory_space<vmem>>, vector<32x128xf32>,
    %372 = arith.extui %368 : vector<32x128xi1> to vector<32x128xi32>
    %373 = arith.sitofp %372 : vector<32x128xi32> to vector<32x128xf32>
    %c0_224 = arith.constant 0 : index
    %c0_225 = arith.constant 0 : index
    %374 = vector.load %arg5[%c0_224, %c0_225] : memref<96x32xf32, #tpu.memory_space<vmem>>, vector<96x32xf32>
    %cst_226 = arith.constant dense<0.000000e+00> : vector<96x128xf32>
    %375 = tpu.matmul %374, %373, %cst_226 {dimension_numbers = #tpu.dot_dimension_numbers<[1], [0], [0], [1], [0, 0, 1, 1], [], []>} : vector<96x32xf32>, vector<32x128xf32>, vector<96x128xf32> -> vector<96x128xf32>
    %376 = arith.addf %375, %6 : vector<96x128xf32>
    %377 = vector.extract_strided_slice %376 {offsets = [0, 0], sizes = [32, 128], strides = [1, 1]} : vector<96x128xf32> to vector<32x128xf32>
    %c0_227 = arith.constant 0 : index
    %c0_228 = arith.constant 0 : index
    %378 = vector.load %arg18[%c0_227, %c0_228] : memref<32x128xf32, #tpu.memory_space<vmem>>, vector<32x128xf32>
    %379 = arith.addf %378, %377 : vector<32x128xf32>
    %cst_229 = arith.constant 5.000000e-01 : f32
    %380 = vector.broadcast %cst_229 : f32 to vector<32x128xf32>
    %381 = arith.mulf %379, %380 : vector<32x128xf32>
    %cst_230 = arith.constant 1.000000e+00 : f32
    %382 = vector.broadcast %cst_230 : f32 to vector<32x128xf32>
    %383 = arith.cmpf oge, %381, %382 : vector<32x128xf32>
    %cst_231 = arith.constant 0.000000e+00 : f32
    %384 = vector.broadcast %cst_231 : f32 to vector<32x128xf32>
    %385 = arith.select %383, %384, %381 : vector<32x128xi1>, vector<32x128xf32>
    %c0_232 = arith.constant 0 : index
    %c0_233 = arith.constant 0 : index
    %386 = vector.load %arg18[%c0_232, %c0_233] : memref<32x128xf32, #tpu.memory_space<vmem>>, vector<32x128xf32>
    tpu.vector_store %arg18[%c0_232, %c0_233], %385 {strides = array<i32>} : memref<32x128xf32, #tpu.memory_space<vmem>>, vector<32x128xf32>,
    %387 = arith.extui %383 : vector<32x128xi1> to vector<32x128xi32>
    %388 = arith.sitofp %387 : vector<32x128xi32> to vector<32x128xf32>
    %389 = vector.extract_strided_slice %376 {offsets = [32, 0], sizes = [32, 128], strides = [1, 1]} : vector<96x128xf32> to vector<32x128xf32>
    %c0_234 = arith.constant 0 : index
    %c0_235 = arith.constant 0 : index
    %390 = vector.load %arg19[%c0_234, %c0_235] : memref<32x128xf32, #tpu.memory_space<vmem>>, vector<32x128xf32>
    %391 = arith.addf %390, %389 : vector<32x128xf32>
    %cst_236 = arith.constant 5.000000e-01 : f32
    %392 = vector.broadcast %cst_236 : f32 to vector<32x128xf32>
    %393 = arith.mulf %391, %392 : vector<32x128xf32>
    %cst_237 = arith.constant 1.000000e+00 : f32
    %394 = vector.broadcast %cst_237 : f32 to vector<32x128xf32>
    %395 = arith.cmpf oge, %393, %394 : vector<32x128xf32>
    %cst_238 = arith.constant 0.000000e+00 : f32
    %396 = vector.broadcast %cst_238 : f32 to vector<32x128xf32>
    %397 = arith.select %395, %396, %393 : vector<32x128xi1>, vector<32x128xf32>
    %c0_239 = arith.constant 0 : index
    %c0_240 = arith.constant 0 : index
    %398 = vector.load %arg19[%c0_239, %c0_240] : memref<32x128xf32, #tpu.memory_space<vmem>>, vector<32x128xf32>
    tpu.vector_store %arg19[%c0_239, %c0_240], %397 {strides = array<i32>} : memref<32x128xf32, #tpu.memory_space<vmem>>, vector<32x128xf32>,
    %399 = arith.extui %395 : vector<32x128xi1> to vector<32x128xi32>
    %400 = arith.sitofp %399 : vector<32x128xi32> to vector<32x128xf32>
    %401 = vector.extract_strided_slice %376 {offsets = [64, 0], sizes = [32, 128], strides = [1, 1]} : vector<96x128xf32> to vector<32x128xf32>
    %c0_241 = arith.constant 0 : index
    %c0_242 = arith.constant 0 : index
    %402 = vector.load %arg20[%c0_241, %c0_242] : memref<32x128xf32, #tpu.memory_space<vmem>>, vector<32x128xf32>
    %403 = arith.addf %402, %401 : vector<32x128xf32>
    %cst_243 = arith.constant 5.000000e-01 : f32
    %404 = vector.broadcast %cst_243 : f32 to vector<32x128xf32>
    %405 = arith.mulf %403, %404 : vector<32x128xf32>
    %cst_244 = arith.constant 1.000000e+00 : f32
    %406 = vector.broadcast %cst_244 : f32 to vector<32x128xf32>
    %407 = arith.cmpf oge, %405, %406 : vector<32x128xf32>
    %cst_245 = arith.constant 0.000000e+00 : f32
    %408 = vector.broadcast %cst_245 : f32 to vector<32x128xf32>
    %409 = arith.select %407, %408, %405 : vector<32x128xi1>, vector<32x128xf32>
    %c0_246 = arith.constant 0 : index
    %c0_247 = arith.constant 0 : index
    %410 = vector.load %arg20[%c0_246, %c0_247] : memref<32x128xf32, #tpu.memory_space<vmem>>, vector<32x128xf32>
    tpu.vector_store %arg20[%c0_246, %c0_247], %409 {strides = array<i32>} : memref<32x128xf32, #tpu.memory_space<vmem>>, vector<32x128xf32>,
    %411 = arith.extui %407 : vector<32x128xi1> to vector<32x128xi32>
    %412 = arith.sitofp %411 : vector<32x128xi32> to vector<32x128xf32>
    %413 = arith.mulf %412, %373 : vector<32x128xf32>
    %414 = arith.truncf %413 : vector<32x128xf32> to vector<32x128xbf16>
    %cst_248 = arith.constant dense<0.000000e+00> : vector<32x128xf32>
    %415 = tpu.matmul %414, %0, %cst_248 {dimension_numbers = #tpu.dot_dimension_numbers<[1], [0], [0], [1], [0, 0, 1, 1], [], []>} : vector<32x128xbf16>, vector<128x128xbf16>, vector<32x128xf32> -> vector<32x128xf32>
    %c0_249 = arith.constant 0 : index
    %c0_250 = arith.constant 0 : index
    %416 = vector.load %arg21[%c0_249, %c0_250] : memref<32x128xf32, #tpu.memory_space<vmem>>, vector<32x128xf32>
    %417 = arith.addf %416, %415 : vector<32x128xf32>
    %cst_251 = arith.constant 5.000000e-01 : f32
    %418 = vector.broadcast %cst_251 : f32 to vector<32x128xf32>
    %419 = arith.mulf %417, %418 : vector<32x128xf32>
    %cst_252 = arith.constant 5.000000e-01 : f32
    %420 = vector.broadcast %cst_252 : f32 to vector<32x128xf32>
    %421 = arith.cmpf oge, %419, %420 : vector<32x128xf32>
    %cst_253 = arith.constant 0.000000e+00 : f32
    %422 = vector.broadcast %cst_253 : f32 to vector<32x128xf32>
    %423 = arith.select %421, %422, %419 : vector<32x128xi1>, vector<32x128xf32>
    %c0_254 = arith.constant 0 : index
    %c0_255 = arith.constant 0 : index
    %424 = vector.load %arg21[%c0_254, %c0_255] : memref<32x128xf32, #tpu.memory_space<vmem>>, vector<32x128xf32>
    tpu.vector_store %arg21[%c0_254, %c0_255], %423 {strides = array<i32>} : memref<32x128xf32, #tpu.memory_space<vmem>>, vector<32x128xf32>,
    %425 = arith.extui %421 : vector<32x128xi1> to vector<32x128xi32>
    %426 = arith.sitofp %425 : vector<32x128xi32> to vector<32x128xf32>
    %427 = arith.mulf %400, %426 : vector<32x128xf32>
    %428 = arith.mulf %427, %388 : vector<32x128xf32>
    %c0_256 = arith.constant 0 : index
    %c0_257 = arith.constant 0 : index
    %429 = vector.load %arg7[%c0_256, %c0_257] : memref<32x32xf32, #tpu.memory_space<vmem>>, vector<32x32xf32>
    %cst_258 = arith.constant dense<0.000000e+00> : vector<32x128xf32>
    %430 = tpu.matmul %429, %428, %cst_258 {dimension_numbers = #tpu.dot_dimension_numbers<[1], [0], [0], [1], [0, 0, 1, 1], [], []>} : vector<32x32xf32>, vector<32x128xf32>, vector<32x128xf32> -> vector<32x128xf32>
    %431 = arith.addf %430, %12 : vector<32x128xf32>
    %432 = arith.addf %431, %362 : vector<32x128xf32>
    %c2_259 = arith.constant 2 : index
    %c0_260 = arith.constant 0 : index
    %c0_261 = arith.constant 0 : index
    %433 = vector.load %arg10[%c2_259, %c0_260, %c0_261] : memref<4x32x128xf32, #tpu.memory_space<vmem>>, vector<1x32x128xf32>
    %434 = vector.shape_cast %433 : vector<1x32x128xf32> to vector<32x128xf32>
    %435 = vector.shape_cast %432 : vector<32x128xf32> to vector<1x32x128xf32>
    tpu.vector_store %arg10[%c2_259, %c0_260, %c0_261], %435 {strides = array<i32>} : memref<4x32x128xf32, #tpu.memory_space<vmem>>, vector<1x32x128xf32>,
    %436 = arith.truncf %373 : vector<32x128xf32> to vector<32x128xbf16>
    %c2_262 = arith.constant 2 : index
    %c0_263 = arith.constant 0 : index
    %c0_264 = arith.constant 0 : index
    %437 = vector.load %arg11[%c2_262, %c0_263, %c0_264] : memref<4x32x128xbf16, #tpu.memory_space<vmem>>, vector<1x32x128xbf16>
    %438 = vector.shape_cast %437 : vector<1x32x128xbf16> to vector<32x128xbf16>
    %439 = vector.shape_cast %436 : vector<32x128xbf16> to vector<1x32x128xbf16>
    tpu.vector_store %arg11[%c2_262, %c0_263, %c0_264], %439 {strides = array<i32>} : memref<4x32x128xbf16, #tpu.memory_space<vmem>>, vector<1x32x128xbf16>,
    %c3 = arith.constant 3 : index
    %c0_265 = arith.constant 0 : index
    %c0_266 = arith.constant 0 : index
    %440 = vector.load %arg0[%c3, %c0_265, %c0_266] : memref<4x32x128xf32, #tpu.memory_space<vmem>>, vector<1x32x128xf32>
    %441 = vector.shape_cast %440 : vector<1x32x128xf32> to vector<32x128xf32>
    %c0_267 = arith.constant 0 : index
    %c0_268 = arith.constant 0 : index
    %442 = vector.load %arg12[%c0_267, %c0_268] : memref<32x128xf32, #tpu.memory_space<vmem>>, vector<32x128xf32>
    %443 = arith.addf %442, %441 : vector<32x128xf32>
    %cst_269 = arith.constant 5.000000e-01 : f32
    %444 = vector.broadcast %cst_269 : f32 to vector<32x128xf32>
    %445 = arith.mulf %443, %444 : vector<32x128xf32>
    %cst_270 = arith.constant 1.000000e+00 : f32
    %446 = vector.broadcast %cst_270 : f32 to vector<32x128xf32>
    %447 = arith.cmpf oge, %445, %446 : vector<32x128xf32>
    %cst_271 = arith.constant 0.000000e+00 : f32
    %448 = vector.broadcast %cst_271 : f32 to vector<32x128xf32>
    %449 = arith.select %447, %448, %445 : vector<32x128xi1>, vector<32x128xf32>
    %c0_272 = arith.constant 0 : index
    %c0_273 = arith.constant 0 : index
    %450 = vector.load %arg12[%c0_272, %c0_273] : memref<32x128xf32, #tpu.memory_space<vmem>>, vector<32x128xf32>
    tpu.vector_store %arg12[%c0_272, %c0_273], %449 {strides = array<i32>} : memref<32x128xf32, #tpu.memory_space<vmem>>, vector<32x128xf32>,
    %451 = arith.extui %447 : vector<32x128xi1> to vector<32x128xi32>
    %452 = arith.sitofp %451 : vector<32x128xi32> to vector<32x128xf32>
    %c0_274 = arith.constant 0 : index
    %c0_275 = arith.constant 0 : index
    %453 = vector.load %arg1[%c0_274, %c0_275] : memref<96x32xf32, #tpu.memory_space<vmem>>, vector<96x32xf32>
    %cst_276 = arith.constant dense<0.000000e+00> : vector<96x128xf32>
    %454 = tpu.matmul %453, %452, %cst_276 {dimension_numbers = #tpu.dot_dimension_numbers<[1], [0], [0], [1], [0, 0, 1, 1], [], []>} : vector<96x32xf32>, vector<32x128xf32>, vector<96x128xf32> -> vector<96x128xf32>
    %455 = arith.addf %454, %3 : vector<96x128xf32>
    %456 = vector.extract_strided_slice %455 {offsets = [0, 0], sizes = [32, 128], strides = [1, 1]} : vector<96x128xf32> to vector<32x128xf32>
    %c0_277 = arith.constant 0 : index
    %c0_278 = arith.constant 0 : index
    %457 = vector.load %arg13[%c0_277, %c0_278] : memref<32x128xf32, #tpu.memory_space<vmem>>, vector<32x128xf32>
    %458 = arith.addf %457, %456 : vector<32x128xf32>
    %cst_279 = arith.constant 5.000000e-01 : f32
    %459 = vector.broadcast %cst_279 : f32 to vector<32x128xf32>
    %460 = arith.mulf %458, %459 : vector<32x128xf32>
    %cst_280 = arith.constant 1.000000e+00 : f32
    %461 = vector.broadcast %cst_280 : f32 to vector<32x128xf32>
    %462 = arith.cmpf oge, %460, %461 : vector<32x128xf32>
    %cst_281 = arith.constant 0.000000e+00 : f32
    %463 = vector.broadcast %cst_281 : f32 to vector<32x128xf32>
    %464 = arith.select %462, %463, %460 : vector<32x128xi1>, vector<32x128xf32>
    %c0_282 = arith.constant 0 : index
    %c0_283 = arith.constant 0 : index
    %465 = vector.load %arg13[%c0_282, %c0_283] : memref<32x128xf32, #tpu.memory_space<vmem>>, vector<32x128xf32>
    tpu.vector_store %arg13[%c0_282, %c0_283], %464 {strides = array<i32>} : memref<32x128xf32, #tpu.memory_space<vmem>>, vector<32x128xf32>,
    %466 = arith.extui %462 : vector<32x128xi1> to vector<32x128xi32>
    %467 = arith.sitofp %466 : vector<32x128xi32> to vector<32x128xf32>
    %468 = vector.extract_strided_slice %455 {offsets = [32, 0], sizes = [32, 128], strides = [1, 1]} : vector<96x128xf32> to vector<32x128xf32>
    %c0_284 = arith.constant 0 : index
    %c0_285 = arith.constant 0 : index
    %469 = vector.load %arg14[%c0_284, %c0_285] : memref<32x128xf32, #tpu.memory_space<vmem>>, vector<32x128xf32>
    %470 = arith.addf %469, %468 : vector<32x128xf32>
    %cst_286 = arith.constant 5.000000e-01 : f32
    %471 = vector.broadcast %cst_286 : f32 to vector<32x128xf32>
    %472 = arith.mulf %470, %471 : vector<32x128xf32>
    %cst_287 = arith.constant 1.000000e+00 : f32
    %473 = vector.broadcast %cst_287 : f32 to vector<32x128xf32>
    %474 = arith.cmpf oge, %472, %473 : vector<32x128xf32>
    %cst_288 = arith.constant 0.000000e+00 : f32
    %475 = vector.broadcast %cst_288 : f32 to vector<32x128xf32>
    %476 = arith.select %474, %475, %472 : vector<32x128xi1>, vector<32x128xf32>
    %c0_289 = arith.constant 0 : index
    %c0_290 = arith.constant 0 : index
    %477 = vector.load %arg14[%c0_289, %c0_290] : memref<32x128xf32, #tpu.memory_space<vmem>>, vector<32x128xf32>
    tpu.vector_store %arg14[%c0_289, %c0_290], %476 {strides = array<i32>} : memref<32x128xf32, #tpu.memory_space<vmem>>, vector<32x128xf32>,
    %478 = arith.extui %474 : vector<32x128xi1> to vector<32x128xi32>
    %479 = arith.sitofp %478 : vector<32x128xi32> to vector<32x128xf32>
    %480 = vector.extract_strided_slice %455 {offsets = [64, 0], sizes = [32, 128], strides = [1, 1]} : vector<96x128xf32> to vector<32x128xf32>
    %c0_291 = arith.constant 0 : index
    %c0_292 = arith.constant 0 : index
    %481 = vector.load %arg15[%c0_291, %c0_292] : memref<32x128xf32, #tpu.memory_space<vmem>>, vector<32x128xf32>
    %482 = arith.addf %481, %480 : vector<32x128xf32>
    %cst_293 = arith.constant 5.000000e-01 : f32
    %483 = vector.broadcast %cst_293 : f32 to vector<32x128xf32>
    %484 = arith.mulf %482, %483 : vector<32x128xf32>
    %cst_294 = arith.constant 1.000000e+00 : f32
    %485 = vector.broadcast %cst_294 : f32 to vector<32x128xf32>
    %486 = arith.cmpf oge, %484, %485 : vector<32x128xf32>
    %cst_295 = arith.constant 0.000000e+00 : f32
    %487 = vector.broadcast %cst_295 : f32 to vector<32x128xf32>
    %488 = arith.select %486, %487, %484 : vector<32x128xi1>, vector<32x128xf32>
    %c0_296 = arith.constant 0 : index
    %c0_297 = arith.constant 0 : index
    %489 = vector.load %arg15[%c0_296, %c0_297] : memref<32x128xf32, #tpu.memory_space<vmem>>, vector<32x128xf32>
    tpu.vector_store %arg15[%c0_296, %c0_297], %488 {strides = array<i32>} : memref<32x128xf32, #tpu.memory_space<vmem>>, vector<32x128xf32>,
    %490 = arith.extui %486 : vector<32x128xi1> to vector<32x128xi32>
    %491 = arith.sitofp %490 : vector<32x128xi32> to vector<32x128xf32>
    %492 = arith.mulf %491, %452 : vector<32x128xf32>
    %493 = arith.truncf %492 : vector<32x128xf32> to vector<32x128xbf16>
    %cst_298 = arith.constant dense<0.000000e+00> : vector<32x128xf32>
    %494 = tpu.matmul %493, %0, %cst_298 {dimension_numbers = #tpu.dot_dimension_numbers<[1], [0], [0], [1], [0, 0, 1, 1], [], []>} : vector<32x128xbf16>, vector<128x128xbf16>, vector<32x128xf32> -> vector<32x128xf32>
    %c0_299 = arith.constant 0 : index
    %c0_300 = arith.constant 0 : index
    %495 = vector.load %arg16[%c0_299, %c0_300] : memref<32x128xf32, #tpu.memory_space<vmem>>, vector<32x128xf32>
    %496 = arith.addf %495, %494 : vector<32x128xf32>
    %cst_301 = arith.constant 5.000000e-01 : f32
    %497 = vector.broadcast %cst_301 : f32 to vector<32x128xf32>
    %498 = arith.mulf %496, %497 : vector<32x128xf32>
    %cst_302 = arith.constant 5.000000e-01 : f32
    %499 = vector.broadcast %cst_302 : f32 to vector<32x128xf32>
    %500 = arith.cmpf oge, %498, %499 : vector<32x128xf32>
    %cst_303 = arith.constant 0.000000e+00 : f32
    %501 = vector.broadcast %cst_303 : f32 to vector<32x128xf32>
    %502 = arith.select %500, %501, %498 : vector<32x128xi1>, vector<32x128xf32>
    %c0_304 = arith.constant 0 : index
    %c0_305 = arith.constant 0 : index
    %503 = vector.load %arg16[%c0_304, %c0_305] : memref<32x128xf32, #tpu.memory_space<vmem>>, vector<32x128xf32>
    tpu.vector_store %arg16[%c0_304, %c0_305], %502 {strides = array<i32>} : memref<32x128xf32, #tpu.memory_space<vmem>>, vector<32x128xf32>,
    %504 = arith.extui %500 : vector<32x128xi1> to vector<32x128xi32>
    %505 = arith.sitofp %504 : vector<32x128xi32> to vector<32x128xf32>
    %506 = arith.mulf %479, %505 : vector<32x128xf32>
    %507 = arith.mulf %506, %467 : vector<32x128xf32>
    %c0_306 = arith.constant 0 : index
    %c0_307 = arith.constant 0 : index
    %508 = vector.load %arg3[%c0_306, %c0_307] : memref<32x32xf32, #tpu.memory_space<vmem>>, vector<32x32xf32>
    %cst_308 = arith.constant dense<0.000000e+00> : vector<32x128xf32>
    %509 = tpu.matmul %508, %507, %cst_308 {dimension_numbers = #tpu.dot_dimension_numbers<[1], [0], [0], [1], [0, 0, 1, 1], [], []>} : vector<32x32xf32>, vector<32x128xf32>, vector<32x128xf32> -> vector<32x128xf32>
    %510 = arith.addf %509, %9 : vector<32x128xf32>
    %511 = arith.addf %510, %441 : vector<32x128xf32>
    %c0_309 = arith.constant 0 : index
    %c0_310 = arith.constant 0 : index
    %512 = vector.load %arg17[%c0_309, %c0_310] : memref<32x128xf32, #tpu.memory_space<vmem>>, vector<32x128xf32>
    %513 = arith.addf %512, %511 : vector<32x128xf32>
    %cst_311 = arith.constant 5.000000e-01 : f32
    %514 = vector.broadcast %cst_311 : f32 to vector<32x128xf32>
    %515 = arith.mulf %513, %514 : vector<32x128xf32>
    %cst_312 = arith.constant 1.000000e+00 : f32
    %516 = vector.broadcast %cst_312 : f32 to vector<32x128xf32>
    %517 = arith.cmpf oge, %515, %516 : vector<32x128xf32>
    %cst_313 = arith.constant 0.000000e+00 : f32
    %518 = vector.broadcast %cst_313 : f32 to vector<32x128xf32>
    %519 = arith.select %517, %518, %515 : vector<32x128xi1>, vector<32x128xf32>
    %c0_314 = arith.constant 0 : index
    %c0_315 = arith.constant 0 : index
    %520 = vector.load %arg17[%c0_314, %c0_315] : memref<32x128xf32, #tpu.memory_space<vmem>>, vector<32x128xf32>
    tpu.vector_store %arg17[%c0_314, %c0_315], %519 {strides = array<i32>} : memref<32x128xf32, #tpu.memory_space<vmem>>, vector<32x128xf32>,
    %521 = arith.extui %517 : vector<32x128xi1> to vector<32x128xi32>
    %522 = arith.sitofp %521 : vector<32x128xi32> to vector<32x128xf32>
    %c0_316 = arith.constant 0 : index
    %c0_317 = arith.constant 0 : index
    %523 = vector.load %arg5[%c0_316, %c0_317] : memref<96x32xf32, #tpu.memory_space<vmem>>, vector<96x32xf32>
    %cst_318 = arith.constant dense<0.000000e+00> : vector<96x128xf32>
    %524 = tpu.matmul %523, %522, %cst_318 {dimension_numbers = #tpu.dot_dimension_numbers<[1], [0], [0], [1], [0, 0, 1, 1], [], []>} : vector<96x32xf32>, vector<32x128xf32>, vector<96x128xf32> -> vector<96x128xf32>
    %525 = arith.addf %524, %6 : vector<96x128xf32>
    %526 = vector.extract_strided_slice %525 {offsets = [0, 0], sizes = [32, 128], strides = [1, 1]} : vector<96x128xf32> to vector<32x128xf32>
    %c0_319 = arith.constant 0 : index
    %c0_320 = arith.constant 0 : index
    %527 = vector.load %arg18[%c0_319, %c0_320] : memref<32x128xf32, #tpu.memory_space<vmem>>, vector<32x128xf32>
    %528 = arith.addf %527, %526 : vector<32x128xf32>
    %cst_321 = arith.constant 5.000000e-01 : f32
    %529 = vector.broadcast %cst_321 : f32 to vector<32x128xf32>
    %530 = arith.mulf %528, %529 : vector<32x128xf32>
    %cst_322 = arith.constant 1.000000e+00 : f32
    %531 = vector.broadcast %cst_322 : f32 to vector<32x128xf32>
    %532 = arith.cmpf oge, %530, %531 : vector<32x128xf32>
    %cst_323 = arith.constant 0.000000e+00 : f32
    %533 = vector.broadcast %cst_323 : f32 to vector<32x128xf32>
    %534 = arith.select %532, %533, %530 : vector<32x128xi1>, vector<32x128xf32>
    %c0_324 = arith.constant 0 : index
    %c0_325 = arith.constant 0 : index
    %535 = vector.load %arg18[%c0_324, %c0_325] : memref<32x128xf32, #tpu.memory_space<vmem>>, vector<32x128xf32>
    tpu.vector_store %arg18[%c0_324, %c0_325], %534 {strides = array<i32>} : memref<32x128xf32, #tpu.memory_space<vmem>>, vector<32x128xf32>,
    %536 = arith.extui %532 : vector<32x128xi1> to vector<32x128xi32>
    %537 = arith.sitofp %536 : vector<32x128xi32> to vector<32x128xf32>
    %538 = vector.extract_strided_slice %525 {offsets = [32, 0], sizes = [32, 128], strides = [1, 1]} : vector<96x128xf32> to vector<32x128xf32>
    %c0_326 = arith.constant 0 : index
    %c0_327 = arith.constant 0 : index
    %539 = vector.load %arg19[%c0_326, %c0_327] : memref<32x128xf32, #tpu.memory_space<vmem>>, vector<32x128xf32>
    %540 = arith.addf %539, %538 : vector<32x128xf32>
    %cst_328 = arith.constant 5.000000e-01 : f32
    %541 = vector.broadcast %cst_328 : f32 to vector<32x128xf32>
    %542 = arith.mulf %540, %541 : vector<32x128xf32>
    %cst_329 = arith.constant 1.000000e+00 : f32
    %543 = vector.broadcast %cst_329 : f32 to vector<32x128xf32>
    %544 = arith.cmpf oge, %542, %543 : vector<32x128xf32>
    %cst_330 = arith.constant 0.000000e+00 : f32
    %545 = vector.broadcast %cst_330 : f32 to vector<32x128xf32>
    %546 = arith.select %544, %545, %542 : vector<32x128xi1>, vector<32x128xf32>
    %c0_331 = arith.constant 0 : index
    %c0_332 = arith.constant 0 : index
    %547 = vector.load %arg19[%c0_331, %c0_332] : memref<32x128xf32, #tpu.memory_space<vmem>>, vector<32x128xf32>
    tpu.vector_store %arg19[%c0_331, %c0_332], %546 {strides = array<i32>} : memref<32x128xf32, #tpu.memory_space<vmem>>, vector<32x128xf32>,
    %548 = arith.extui %544 : vector<32x128xi1> to vector<32x128xi32>
    %549 = arith.sitofp %548 : vector<32x128xi32> to vector<32x128xf32>
    %550 = vector.extract_strided_slice %525 {offsets = [64, 0], sizes = [32, 128], strides = [1, 1]} : vector<96x128xf32> to vector<32x128xf32>
    %c0_333 = arith.constant 0 : index
    %c0_334 = arith.constant 0 : index
    %551 = vector.load %arg20[%c0_333, %c0_334] : memref<32x128xf32, #tpu.memory_space<vmem>>, vector<32x128xf32>
    %552 = arith.addf %551, %550 : vector<32x128xf32>
    %cst_335 = arith.constant 5.000000e-01 : f32
    %553 = vector.broadcast %cst_335 : f32 to vector<32x128xf32>
    %554 = arith.mulf %552, %553 : vector<32x128xf32>
    %cst_336 = arith.constant 1.000000e+00 : f32
    %555 = vector.broadcast %cst_336 : f32 to vector<32x128xf32>
    %556 = arith.cmpf oge, %554, %555 : vector<32x128xf32>
    %cst_337 = arith.constant 0.000000e+00 : f32
    %557 = vector.broadcast %cst_337 : f32 to vector<32x128xf32>
    %558 = arith.select %556, %557, %554 : vector<32x128xi1>, vector<32x128xf32>
    %c0_338 = arith.constant 0 : index
    %c0_339 = arith.constant 0 : index
    %559 = vector.load %arg20[%c0_338, %c0_339] : memref<32x128xf32, #tpu.memory_space<vmem>>, vector<32x128xf32>
    tpu.vector_store %arg20[%c0_338, %c0_339], %558 {strides = array<i32>} : memref<32x128xf32, #tpu.memory_space<vmem>>, vector<32x128xf32>,
    %560 = arith.extui %556 : vector<32x128xi1> to vector<32x128xi32>
    %561 = arith.sitofp %560 : vector<32x128xi32> to vector<32x128xf32>
    %562 = arith.mulf %561, %522 : vector<32x128xf32>
    %563 = arith.truncf %562 : vector<32x128xf32> to vector<32x128xbf16>
    %cst_340 = arith.constant dense<0.000000e+00> : vector<32x128xf32>
    %564 = tpu.matmul %563, %0, %cst_340 {dimension_numbers = #tpu.dot_dimension_numbers<[1], [0], [0], [1], [0, 0, 1, 1], [], []>} : vector<32x128xbf16>, vector<128x128xbf16>, vector<32x128xf32> -> vector<32x128xf32>
    %c0_341 = arith.constant 0 : index
    %c0_342 = arith.constant 0 : index
    %565 = vector.load %arg21[%c0_341, %c0_342] : memref<32x128xf32, #tpu.memory_space<vmem>>, vector<32x128xf32>
    %566 = arith.addf %565, %564 : vector<32x128xf32>
    %cst_343 = arith.constant 5.000000e-01 : f32
    %567 = vector.broadcast %cst_343 : f32 to vector<32x128xf32>
    %568 = arith.mulf %566, %567 : vector<32x128xf32>
    %cst_344 = arith.constant 5.000000e-01 : f32
    %569 = vector.broadcast %cst_344 : f32 to vector<32x128xf32>
    %570 = arith.cmpf oge, %568, %569 : vector<32x128xf32>
    %cst_345 = arith.constant 0.000000e+00 : f32
    %571 = vector.broadcast %cst_345 : f32 to vector<32x128xf32>
    %572 = arith.select %570, %571, %568 : vector<32x128xi1>, vector<32x128xf32>
    %c0_346 = arith.constant 0 : index
    %c0_347 = arith.constant 0 : index
    %573 = vector.load %arg21[%c0_346, %c0_347] : memref<32x128xf32, #tpu.memory_space<vmem>>, vector<32x128xf32>
    tpu.vector_store %arg21[%c0_346, %c0_347], %572 {strides = array<i32>} : memref<32x128xf32, #tpu.memory_space<vmem>>, vector<32x128xf32>,
    %574 = arith.extui %570 : vector<32x128xi1> to vector<32x128xi32>
    %575 = arith.sitofp %574 : vector<32x128xi32> to vector<32x128xf32>
    %576 = arith.mulf %549, %575 : vector<32x128xf32>
    %577 = arith.mulf %576, %537 : vector<32x128xf32>
    %c0_348 = arith.constant 0 : index
    %c0_349 = arith.constant 0 : index
    %578 = vector.load %arg7[%c0_348, %c0_349] : memref<32x32xf32, #tpu.memory_space<vmem>>, vector<32x32xf32>
    %cst_350 = arith.constant dense<0.000000e+00> : vector<32x128xf32>
    %579 = tpu.matmul %578, %577, %cst_350 {dimension_numbers = #tpu.dot_dimension_numbers<[1], [0], [0], [1], [0, 0, 1, 1], [], []>} : vector<32x32xf32>, vector<32x128xf32>, vector<32x128xf32> -> vector<32x128xf32>
    %580 = arith.addf %579, %12 : vector<32x128xf32>
    %581 = arith.addf %580, %511 : vector<32x128xf32>
    %c3_351 = arith.constant 3 : index
    %c0_352 = arith.constant 0 : index
    %c0_353 = arith.constant 0 : index
    %582 = vector.load %arg10[%c3_351, %c0_352, %c0_353] : memref<4x32x128xf32, #tpu.memory_space<vmem>>, vector<1x32x128xf32>
    %583 = vector.shape_cast %582 : vector<1x32x128xf32> to vector<32x128xf32>
    %584 = vector.shape_cast %581 : vector<32x128xf32> to vector<1x32x128xf32>
    tpu.vector_store %arg10[%c3_351, %c0_352, %c0_353], %584 {strides = array<i32>} : memref<4x32x128xf32, #tpu.memory_space<vmem>>, vector<1x32x128xf32>,
    %585 = arith.truncf %522 : vector<32x128xf32> to vector<32x128xbf16>
    %c3_354 = arith.constant 3 : index
    %c0_355 = arith.constant 0 : index
    %c0_356 = arith.constant 0 : index
    %586 = vector.load %arg11[%c3_354, %c0_355, %c0_356] : memref<4x32x128xbf16, #tpu.memory_space<vmem>>, vector<1x32x128xbf16>
    %587 = vector.shape_cast %586 : vector<1x32x128xbf16> to vector<32x128xbf16>
    %588 = vector.shape_cast %585 : vector<32x128xbf16> to vector<1x32x128xbf16>
    tpu.vector_store %arg11[%c3_354, %c0_355, %c0_356], %588 {strides = array<i32>} : memref<4x32x128xbf16, #tpu.memory_space<vmem>>, vector<1x32x128xbf16>,
    return
  }
}

</mosaic_0001>

<bundles_post_ra>
// kernel: ms_block_gau.1
= control target key start
LH: loop header
LB: loop body
LE: loop exit
PB: predicated region body
PF: predicated region fallthrough
CT: control target
= control target key end

     0   :  { %v3496_v1 = vmov 0   ;;  %v6056_v11 = vmov 1.0   ;;  %vm285_vm4 = vcmask 261120   ;;  %s6044_s0 = inlined_call_operand.vmem [shape: f32[4,32,128], index: 0, kind: input, shape index: {}]   ;;  %s6045_s2 = inlined_call_operand.vmem [shape: f32[96,1], index: 2, kind: input, shape index: {}]   ;;  %s6046_s1 = inlined_call_operand.vmem [shape: f32[96,32], index: 1, kind: input, shape index: {}]   ;;  %s6047_s4 = inlined_call_operand.vmem [shape: f32[32,1], index: 4, kind: input, shape index: {}]   ;;  %s6048_s6 = inlined_call_operand.vmem [shape: f32[96,1], index: 6, kind: input, shape index: {}]   ;;  %s6049_s8 = inlined_call_operand.vmem [shape: f32[32,1], index: 8, kind: input, shape index: {}]   ;;  %s6050_s9 = inlined_call_operand.vmem [shape: bf16[128,128], index: 9, kind: input, shape index: {}]   ;;  %s6051_s3 = inlined_call_operand.vmem [shape: f32[32,32], index: 3, kind: input, shape index: {}]   ;;  %s6052_s11 = inlined_call_operand.vmem [shape: bf16[4,32,128], index: 11, kind: output, shape index: {1}]   ;;  %s6053_s5 = inlined_call_operand.vmem [shape: f32[96,32], index: 5, kind: input, shape index: {}]   ;;  %s6054_s7 = inlined_call_operand.vmem [shape: f32[32,32], index: 7, kind: input, shape index: {}]   ;;  %s6055_s10 = inlined_call_operand.vmem [shape: f32[4,32,128], index: 10, kind: output, shape index: {0}]  }
   0x1   :  { %v3562_v0 = vld [vmem:[%s6044_s0 + $0x18] sm:$0xff]  ;;  %3477 = vset.pattern.permute.xlu0 %v3496_v1  ;;  %v61_v2 = vld [vmem:[%s6045_s2 + $0x40] sm:$0xff]  ;;  %3479 = vset.pattern.permute.xlu2 %v3496_v1  ;;  %v3573_v4 = vld [vmem:[%s6044_s0 + $0x10] sm:$0xff] }
   0x2   :  { %v3568_v3 = vmul.f32 0.5, %v3562_v0  ;;  %107 = vperm.xlu0 %3477, %v61_v2   ;;  %v3578_v5 = vld [vmem:[%s6044_s0 + $0x8] sm:$0xff]  ;;  %3478 = vset.pattern.permute.xlu1 %v3496_v1  ;;  %v3581_v6 = vmul.f32 0.5, %v3573_v4  ;;  %v3589_v8 = vld [vmem:[%s6044_s0] sm:$0xff]  ;;  %v63_v12 = vld [vmem:[%s6045_s2 + $0x50] sm:$0xff] }
   0x3   :  { %v3584_v7 = vmul.f32 0.5, %v3578_v5  ;;  %v3593_v9 = vmul.f32 0.5, %v3589_v8  ;;  %v60_v13 = vld [vmem:[%s6045_s2 + $0x38] sm:$0xff]  ;;  %117 = vperm.xlu1 %3478, %v63_v12   ;;  %v62_v16 = vld [vmem:[%s6045_s2 + $0x48] sm:$0xff]  ;;  %v3639_v18 = vld [vmem:[%s6046_s1] sm:$0xff] }
   0x4   :  { %vm256_vm0 = vcmp.ge.f32.partialorder %v3568_v3, 1.0  ;;  %vm255_vm1 = vcmp.ge.f32.partialorder %v3581_v6, 1.0  ;;  %102 = vperm.xlu2 %3479, %v60_v13   ;;  %v64_v19 = vld [vmem:[%s6045_s2 + $0x58] sm:$0xff]  ;;  %v59_v21 = vld [vmem:[%s6045_s2 + $0x30] sm:$0xff]  ;;  %v3658_v22 = vld [vmem:[%s6046_s1 + $0x8] sm:$0xff] }
   0x5   :  { %v3598_v10 = vsel %vm256_vm0, 0.0, %v3568_v3  ;;  %3043 = vmatpush.msk.msra.mxu0 %vm256_vm0, %v6056_v11  ;;  %vm254_vm2 = vcmp.ge.f32.partialorder %v3584_v7, 1.0  ;;  %v3614_v14 = vsel %vm255_vm1, 0.0, %v3581_v6  ;;  %vm253_vm3 = vcmp.ge.f32.partialorder %v3593_v9, 1.0  ;;  %v56_v20 = vld [vmem:[%s6045_s2 + $0x18] sm:$0xff]  ;;  %v58_v23 = vld [vmem:[%s6045_s2 + $0x28] sm:$0xff] }
   0x6   :  { %v3619_v15 = vsel %vm254_vm2, 0.0, %v3584_v7  ;;  %v3631_v17 = vsel %vm253_vm3, 0.0, %v3593_v9  ;;  %v55_v24 = vld [vmem:[%s6045_s2 + $0x10] sm:$0xff]  ;;  %v54_v25 = vld [vmem:[%s6045_s2 + $0x8] sm:$0xff]  ;;  %v57_v27 = vld [vmem:[%s6045_s2 + $0x20] sm:$0xff] }
   0x7   :  { %3044 = vmatpush.msk.msra.mxu0 %vm255_vm1, %v6056_v11  ;;  %v3674_v26 = vld [vmem:[%s6046_s1 + $0x10] sm:$0xff]  ;;  %v53_v28 = vld [vmem:[%s6045_s2] sm:$0xff]  ;;  %v200_v29 = vld [vmem:[%s6047_s4 + $0x18] sm:$0xff] }
   0x8   :  { %v3690_v30 = vld [vmem:[%s6046_s1 + $0x18] sm:$0xff]  ;;  %v199_v31 = vld [vmem:[%s6047_s4 + $0x10] sm:$0xff]  ;;  %v197_v32 = vld [vmem:[%s6047_s4] sm:$0xff] }
   0x9   :  { %3045 = vmatpush.msk.msra.mxu0 %vm254_vm2, %v6056_v11  ;;  %v3703_v33 = vld [vmem:[%s6046_s1 + $0x20] sm:$0xff]  ;;  %v135_v35 = vld [vmem:[%s6048_s6 + $0x50] sm:$0xff]  ;;  %v3716_v36 = vld [vmem:[%s6046_s1 + $0x28] sm:$0xff] }
   0xa   :  { %112 = vperm.xlu0 %3477, %v62_v16   ;;  %v133_v34 = vld [vmem:[%s6048_s6 + $0x40] sm:$0xff]  ;;  %v136_v37 = vld [vmem:[%s6048_s6 + $0x58] sm:$0xff]  ;;  %v3729_v39 = vld [vmem:[%s6046_s1 + $0x30] sm:$0xff] }
   0xb   :  { %3046 = vmatpush.msk.msra.mxu0 %vm253_vm3, %v6056_v11  ;;  %122 = vperm.xlu1 %3478, %v64_v19   ;;  %v128_v38 = vld [vmem:[%s6048_s6 + $0x18] sm:$0xff]  ;;  %v131_v40 = vld [vmem:[%s6048_s6 + $0x30] sm:$0xff]  ;;  %v130_v41 = vld [vmem:[%s6048_s6 + $0x28] sm:$0xff] }
   0xc   :  { %3047 = vmatmul.msk.f32.vlgmr.msra.gmra.mxu0 %vm285_vm4, %v3639_v18  ;;  %82 = vperm.xlu2 %3479, %v56_v20   ;;  %v3742_v42 = vld [vmem:[%s6046_s1 + $0x38] sm:$0xff]  ;;  %v126_v43 = vld [vmem:[%s6048_s6 + $0x8] sm:$0xff]  ;;  %v125_v44 = vld [vmem:[%s6048_s6] sm:$0xff] }
   0xd   :  { %v3755_v45 = vld [vmem:[%s6046_s1 + $0x40] sm:$0xff]  ;;  %v223_v47 = vld [vmem:[%s6049_s8 + $0x10] sm:$0xff]  ;;  %v3768_v48 = vld [vmem:[%s6046_s1 + $0x48] sm:$0xff] }
   0xe   :  { %v221_v46 = vld [vmem:[%s6049_s8] sm:$0xff]  ;;  %v224_v49 = vld [vmem:[%s6049_s8 + $0x18] sm:$0xff]  ;;  %v3778_v50 = vld [vmem:[%s6046_s1 + $0x50] sm:$0xff] }
   0xf   :  { %v3785_v51 = vld [vmem:[%s6046_s1 + $0x58] sm:$0xff]  ;;  %v129_v7 = vld [vmem:[%s6048_s6 + $0x20] sm:$0xff] }
  0x12   :  { %97 = vperm.xlu0 %3477, %v59_v21  }
  0x13   :  { %77 = vperm.xlu1 %3478, %v55_v24   ;;  %v3833_v24 = vld [vmem:[%s6050_s9 + $0x38] sm:$0xff] }
  0x14   :  { %3048 = vmatmul.msk.f32.gmra.mxu0 %vm285_vm4, %v3658_v22  ;;  %92 = vperm.xlu2 %3479, %v58_v23  }
  0x15   :  { %501 = vmatpush.bf16.msra.mxu1 %v3833_v24 }
  0x1a   :  { %72 = vperm.xlu0 %3477, %v54_v25  }
  0x1b   :  { %87 = vperm.xlu1 %3478, %v57_v27   ;;  %v3842_v27 = vld [vmem:[%s6050_s9 + $0x30] sm:$0xff] }
  0x1c   :  { %3049 = vmatmul.msk.f32.gmra.mxu0 %vm285_vm4, %v3674_v26  ;;  %67 = vperm.xlu2 %3479, %v53_v28  }
  0x1d   :  { %502 = vmatpush.bf16.msra.mxu1 %v3842_v27 }
  0x22   :  { %218 = vperm.xlu0 %3477, %v200_v29  }
  0x23   :  { %213 = vperm.xlu1 %3478, %v199_v31  }
  0x24   :  { %3050 = vmatmul.msk.f32.gmra.mxu0 %vm285_vm4, %v3690_v30 }
  0x2a   :  { %203 = vperm.xlu0 %3477, %v197_v32   ;;  %v3854_v32 = vld [vmem:[%s6050_s9 + $0x28] sm:$0xff] }
  0x2b   :  { %179 = vperm.xlu1 %3478, %v133_v34   ;;  %503 = vmatpush.bf16.msra.mxu1 %v3854_v32 }
  0x2c   :  { %3051 = vmatmul.msk.f32.gmra.mxu0 %vm285_vm4, %v3703_v33 }
  0x32   :  { %189 = vperm.xlu0 %3477, %v135_v35   ;;  %v3862_v35 = vld [vmem:[%s6050_s9 + $0x20] sm:$0xff] }
  0x33   :  { %194 = vperm.xlu1 %3478, %v136_v37   ;;  %504 = vmatpush.bf16.msra.mxu1 %v3862_v35 }
  0x34   :  { %3052 = vmatmul.msk.f32.gmra.mxu0 %vm285_vm4, %v3716_v36 }
  0x3a   :  { %154 = vperm.xlu0 %3477, %v128_v38  }
  0x3b   :  { %169 = vperm.xlu1 %3478, %v131_v40  }
  0x3c   :  { %3053 = vmatmul.msk.f32.gmra.mxu0 %vm285_vm4, %v3729_v39 }
  0x42   :  { %164 = vperm.xlu0 %3477, %v130_v41  }
  0x43   :  { %144 = vperm.xlu1 %3478, %v126_v43   ;;  %v3877_v43 = vld [vmem:[%s6050_s9 + $0x18] sm:$0xff] }
  0x44   :  { %3054 = vmatmul.msk.f32.gmra.mxu0 %vm285_vm4, %v3742_v42  ;;  %505 = vmatpush.bf16.msra.mxu1 %v3877_v43 }
  0x4a   :  { %139 = vperm.xlu0 %3477, %v125_v44  }
  0x4b   :  { %227 = vperm.xlu1 %3478, %v221_v46   ;;  %v3886_v46 = vld [vmem:[%s6050_s9 + $0x10] sm:$0xff] }
  0x4c   :  { %3055 = vmatmul.msk.f32.gmra.mxu0 %vm285_vm4, %v3755_v45  ;;  %506 = vmatpush.bf16.msra.mxu1 %v3886_v46 }
  0x52   :  { %237 = vperm.xlu0 %3477, %v223_v47  }
  0x53   :  { %242 = vperm.xlu1 %3478, %v224_v49  }
  0x54   :  { %3056 = vmatmul.msk.f32.gmra.mxu0 %vm285_vm4, %v3768_v48 }
  0x5c   :  { %3057 = vmatmul.msk.f32.gmra.mxu0 %vm285_vm4, %v3778_v50 }
  0x5e   :  { %v3789_v52 = vpop.permute.xlu2 %102 }
  0x5f   :  { %6180 = vst [vmem:[#allocation12_spill] sm:$0xff] %v3789_v52 }
  0x64   :  { %3058 = vmatmul.msk.f32.gmra.mxu0 %vm285_vm4, %v3785_v51 }
  0x66   :  { %v3791_v53 = vpop.permute.xlu2 %82 }
  0x67   :  { %6181 = vst [vmem:[#allocation13_spill] sm:$0xff] %v3791_v53 }
  0x6e   :  { %v3797_v56 = vpop.permute.xlu2 %92 }
  0x6f   :  { %6184 = vst [vmem:[#allocation16_spill] sm:$0xff] %v3797_v56 }
  0x74   :  { %v3793_v54 = vpop.permute.xlu0 %107 }
  0x75   :  { %6182 = vst [vmem:[#allocation14_spill] sm:$0xff] %v3793_v54  ;;  %v3799_v57 = vpop.permute.xlu1 %117 }
  0x76   :  { %v3803_v59 = vpop.permute.xlu2 %67 }
  0x7c   :  { %v3795_v55 = vpop.permute.xlu0 %112 }
  0x7d   :  { %6183 = vst [vmem:[#allocation15_spill] sm:$0xff] %v3795_v55  ;;  %v3808_v63 = vpop.permute.xlu1 %122 }
  0x7e   :  { %6186 = vst [vmem:[#allocation18_spill] sm:$0xff] %v3808_v63 }
  0x84   :  { %v3801_v58 = vpop.permute.xlu0 %97 }
  0x85   :  { %6185 = vst [vmem:[#allocation17_spill] sm:$0xff] %v3801_v58  ;;  %v3822_v19 = vpop.permute.xlu1 %77 }
  0x89   :  { %v339_v60 = vpop.f32.mrf.mxu0 }
  0x8a   :  { %v340_v61 = vadd.f32 %v339_v60, %v3803_v59 }
  0x8c   :  { %v3806_v62 = vmul.f32 0.5, %v340_v61  ;;  %v3811_v1 = vpop.permute.xlu0 %72  ;;  %v3898_v61 = vld [vmem:[%s6050_s9 + $0x8] sm:$0xff] }
  0x8d   :  { %v3870_v38 = vpop.permute.xlu1 %87  ;;  %507 = vmatpush.bf16.msra.mxu1 %v3898_v61 }
  0x8e   :  { %vm379_vm5 = vcmp.ge.f32.partialorder %v3806_v62, 1.0  ;;  %6187 = vst [vmem:[#allocation19_spill] sm:$0xff] %v3870_v38 }
  0x8f   :  { %v3816_v2 = vsel %vm379_vm5, 0.0, %v3806_v62  ;;  %v4037_v62 = vld [vmem:[%s6051_s3 + $0x10] sm:$0xff] }
  0x90   :  { %6201 = vst [vmem:[#allocation33_spill] sm:$0xff] %v4037_v62 }
  0x91   :  { %v342_v12 = vpop.f32.mrf.mxu0 }
  0x92   :  { %v343_v13 = vadd.f32 %v342_v12, %v3811_v1 }
  0x94   :  { %v3819_v16 = vmul.f32 0.5, %v343_v13  ;;  %v3907_v13 = vld [vmem:[%s6050_s9] sm:$0xff] }
  0x95   :  { %508 = vmatpush.bf16.msra.mxu1 %v3907_v13 }
  0x96   :  { %vm380_vm6 = vcmp.ge.f32.partialorder %v3819_v16, 1.0 }
  0x97   :  { %v3827_v20 = vsel %vm380_vm6, 0.0, %v3819_v16  ;;  %v4028_v16 = vld [vmem:[%s6051_s3 + $0x8] sm:$0xff] }
  0x98   :  { %6200 = vst [vmem:[#allocation32_spill] sm:$0xff] %v4028_v16 }
  0x99   :  { %v345_v21 = vpop.f32.mrf.mxu0 }
  0x9a   :  { %v346_v23 = vadd.f32 %v345_v21, %v3822_v19 }
  0x9c   :  { %v3835_v25 = vmul.f32 0.5, %v346_v23 }
  0x9e   :  { %vm381_vm7 = vcmp.ge.f32.partialorder %v3835_v25, 1.0 }
  0x9f   :  { %v3847_v28 = vsel %vm381_vm7, 0.0, %v3835_v25 }
  0xa1   :  { %v348_v29 = vpop.f32.mrf.mxu0 }
  0xa2   :  { %v349_v31 = vadd.f32 %v348_v29, %v3791_v53 }
  0xa4   :  { %v3856_v34 = vmul.f32 0.5, %v349_v31 }
  0xa6   :  { %vm382_vm8 = vcmp.ge.f32.partialorder %v3856_v34, 1.0 }
  0xa7   :  { %v3868_v37 = vsel %vm382_vm8, 0.0, %v3856_v34 }
  0xa9   :  { %v351_v40 = vpop.f32.mrf.mxu0 }
  0xaa   :  { %v352_v41 = vadd.f32 %v351_v40, %v3870_v38  ;;  %v198_v40 = vld [vmem:[%s6047_s4 + $0x8] sm:$0xff] }
  0xab   :  { %208 = vperm.xlu2 %3479, %v198_v40  }
  0xac   :  { %v3879_v44 = vmul.f32 0.5, %v352_v41 }
  0xae   :  { %vm403_vm9 = vcmp.ge.f32.partialorder %v3879_v44, 1.0 }
  0xaf   :  { %v3891_v47 = vsel %vm403_vm9, 0.0, %v3879_v44  ;;  %v4020_v44 = vld [vmem:[%s6051_s3] sm:$0xff] }
  0xb0   :  { %6188 = vst [vmem:[#allocation20_spill] sm:$0xff] %v3891_v47 }
  0xb1   :  { %v354_v49 = vpop.f32.mrf.mxu0  ;;  %6199 = vst [vmem:[#allocation31_spill] sm:$0xff] %v4020_v44 }
  0xb2   :  { %v355_v60 = vadd.f32 %v354_v49, %v3797_v56  ;;  %v6072_v56 = vmov 0.0  }
  0xb4   :  { %v3900_v12 = vmul.f32 0.5, %v355_v60 }
  0xb6   :  { %vm404_vm10 = vcmp.ge.f32.partialorder %v3900_v12, 1.0 }
  0xb7   :  { %v3912_v21 = vsel %vm404_vm10, 0.0, %v3900_v12  ;;  %v3060_v12 = vsel %vm380_vm6, 1.0, %v6072_v56 }
  0xb8   :  { %6189 = vst [vmem:[#allocation21_spill] sm:$0xff] %v3912_v21  ;;  %v127_v21 = vld [vmem:[%s6048_s6 + $0x10] sm:$0xff] }
  0xb9   :  { %v357_v23 = vpop.f32.mrf.mxu0 }
  0xba   :  { %v358_v29 = vadd.f32 %v357_v23, %v3801_v58  ;;  %v134_v23 = vld [vmem:[%s6048_s6 + $0x48] sm:$0xff] }
  0xbb   :  { %184 = vperm.xlu2 %3479, %v134_v23  }
  0xbc   :  { %v3916_v31 = vmul.f32 0.5, %v358_v29 }
  0xbe   :  { %vm405_vm11 = vcmp.ge.f32.partialorder %v3916_v31, 1.0 }
  0xbf   :  { %v3925_v41 = vsel %vm405_vm11, 0.0, %v3916_v31  ;;  %v3064_v31 = vsel %vm404_vm10, 1.0, %v6072_v56 }
  0xc0   :  { %6190 = vst [vmem:[#allocation22_spill] sm:$0xff] %v3925_v41 }
  0xc1   :  { %v360_v49 = vpop.f32.mrf.mxu0 }
  0xc2   :  { %v361_v60 = vadd.f32 %v360_v49, %v3789_v52  ;;  %v132_v49 = vld [vmem:[%s6048_s6 + $0x38] sm:$0xff] }
  0xc3   :  { %174 = vperm.xlu2 %3479, %v132_v49  }
  0xc4   :  { %v3928_v11 = vmul.f32 0.5, %v361_v60 }
  0xc6   :  { %vm406_vm12 = vcmp.ge.f32.partialorder %v3928_v11, 1.0 }
  0xc7   :  { %v3937_v29 = vsel %vm406_vm12, 0.0, %v3928_v11 }
  0xc8   :  { %6191 = vst [vmem:[#allocation23_spill] sm:$0xff] %v3937_v29 }
  0xc9   :  { %v363_v40 = vpop.f32.mrf.mxu0 }
  0xca   :  { %v364_v41 = vadd.f32 %v363_v40, %v3793_v54  ;;  %v3039_v40 = vsel %vm253_vm3, 1.0, %v6072_v56 }
  0xcb   :  { %149 = vperm.xlu2 %3479, %v127_v21  }
  0xcc   :  { %v423_v58 = vmul.f32 0.5, %v364_v41  ;;  %v3040_v41 = vsel %vm254_vm2, 1.0, %v6072_v56 }
  0xce   :  { %vm427_vm13 = vcmp.ge.f32.partialorder %v423_v58, 1.0 }
  0xcf   :  { %v3943_v60 = vsel %vm427_vm13, 0.0, %v423_v58  ;;  %v3067_v58 = vsel %vm427_vm13, 1.0, %v6072_v56 }
  0xd0   :  { %6192 = vst [vmem:[#allocation24_spill] sm:$0xff] %v3943_v60 }
  0xd1   :  { %v366_v23 = vpop.f32.mrf.mxu0 }
  0xd2   :  { %v367_v52 = vadd.f32 %v366_v23, %v3795_v55  ;;  %v447_v55 = vmul.f32 %v3067_v58, %v3039_v40 }
  0xd3   :  { %159 = vperm.xlu2 %3479, %v129_v7  }
  0xd4   :  { %v424_v29 = vmul.f32 0.5, %v367_v52 }
  0xd6   :  { %vm428_vm14 = vcmp.ge.f32.partialorder %v424_v29, 1.0 }
  0xd7   :  { %v3068_v49 = vsel %vm428_vm14, 1.0, %v6072_v56  ;;  %v3957_v23 = vsel %vm428_vm14, 0.0, %v424_v29 }
  0xd8   :  { %v448_v60 = vmul.f32 %v3068_v49, %v3040_v41  ;;  %v222_v41 = vld [vmem:[%s6049_s8 + $0x8] sm:$0xff] }
  0xd9   :  { %v369_v52 = vpop.f32.mrf.mxu0 }
  0xda   :  { %v370_v54 = vadd.f32 %v369_v52, %v3799_v57  ;;  %v451_v47 = vpack.c.bf16 %v448_v60, %v447_v55  ;;  %v3042_v55 = vsel %vm256_vm0, 1.0, %v6072_v56 }
  0xdb   :  { %232 = vperm.xlu2 %3479, %v222_v41  }
  0xdc   :  { %v425_v9 = vmul.f32 0.5, %v370_v54  ;;  %509 = vmatmul.bf16.vlgmr.msra.gmra.mxu1 %v451_v47  ;;  %v3041_v54 = vsel %vm255_vm1, 1.0, %v6072_v56 }
  0xde   :  { %vm429_vm15 = vcmp.ge.f32.partialorder %v425_v9, 1.0 }
  0xdf   :  { %v3963_v21 = vsel %vm429_vm15, 0.0, %v425_v9  ;;  %v3069_v47 = vsel %vm429_vm15, 1.0, %v6072_v56 }
  0xe0   :  { %6193 = vst [vmem:[#allocation25_spill] sm:$0xff] %v3963_v21  ;;  %v449_v58 = vmul.f32 %v3069_v47, %v3041_v54 }
  0xe1   :  { %v372_v38 = vpop.f32.mrf.mxu0 }
  0xe2   :  { %v373_v29 = vadd.f32 %v372_v38, %v3808_v63 }
  0xe4   :  { %v426_v40 = vmul.f32 0.5, %v373_v29 }
  0xe6   :  { %vm430_vm2 = vcmp.ge.f32.partialorder %v426_v40, 1.0 }
  0xe7   :  { %v3070_v60 = vsel %vm430_vm2, 1.0, %v6072_v56  ;;  %v3977_v38 = vsel %vm430_vm2, 0.0, %v426_v40 }
  0xe8   :  { %6194 = vst [vmem:[#allocation26_spill] sm:$0xff] %v3977_v38  ;;  %v450_v49 = vmul.f32 %v3070_v60, %v3042_v55  ;;  %v3065_v60 = vsel %vm405_vm11, 1.0, %v6072_v56 }
  0xea   :  { %v452_v52 = vpack.c.bf16 %v450_v49, %v449_v58  ;;  %v3066_v58 = vsel %vm406_vm12, 1.0, %v6072_v56 }
  0xec   :  { %514 = vmatmul.bf16.gmra.mxu1 %v452_v52 }
 0x159   :  { %v510_v7 = vpop.f32.mrf.mxu1 }
 0x15a   :  { %v520_v9 = vmul.f32 0.5, %v510_v7 }
 0x15c   :  { %vm524_vm3 = vcmp.ge.f32.partialorder %v520_v9, 0.5 }
 0x15d   :  { %v3980_v3 = vsel %vm524_vm3, 0.0, %v520_v9  ;;  %v3103_v11 = vsel %vm524_vm3, 1.0, %v6072_v56 }
 0x15e   :  { %6195 = vst [vmem:[#allocation27_spill] sm:$0xff] %v3980_v3 }
 0x161   :  { %v512_v6 = vpop.f32.mrf.mxu1 }
 0x162   :  { %v521_v29 = vmul.f32 0.5, %v512_v6 }
 0x164   :  { %vm525_vm0 = vcmp.ge.f32.partialorder %v521_v29, 0.5 }
 0x165   :  { %v3982_v63 = vsel %vm525_vm0, 0.0, %v521_v29  ;;  %v3104_v52 = vsel %vm525_vm0, 1.0, %v6072_v56  ;;  %v3062_v29 = vsel %vm382_vm8, 1.0, %v6072_v56 }
 0x166   :  { %6196 = vst [vmem:[#allocation28_spill] sm:$0xff] %v3982_v63 }
 0x169   :  { %v515_v41 = vpop.f32.mrf.mxu1 }
 0x16a   :  { %v522_v21 = vmul.f32 0.5, %v515_v41 }
 0x16c   :  { %vm526_vm1 = vcmp.ge.f32.partialorder %v522_v21, 0.5 }
 0x16d   :  { %v3984_v40 = vsel %vm526_vm1, 0.0, %v522_v21  ;;  %v3105_v47 = vsel %vm526_vm1, 1.0, %v6072_v56 }
 0x16e   :  { %6197 = vst [vmem:[#allocation29_spill] sm:$0xff] %v3984_v40  ;;  %v546_v6 = vmul.f32 %v3105_v47, %v3065_v60  ;;  %v3063_v47 = vsel %vm403_vm9, 1.0, %v6072_v56 }
 0x16f   :  { %v544_v60 = vmul.f32 %v3103_v11, %v3063_v47 }
 0x171   :  { %v517_v54 = vpop.f32.mrf.mxu1 }
 0x172   :  { %v523_v55 = vmul.f32 0.5, %v517_v54  ;;  %v545_v54 = vmul.f32 %v3104_v52, %v3064_v31  ;;  %v4053_v52 = vpop.permute.xlu0 %218 }
 0x173   :  { %6203 = vst [vmem:[#allocation35_spill] sm:$0xff] %v4053_v52 }
 0x174   :  { %vm527_vm13 = vcmp.ge.f32.partialorder %v523_v55, 0.5  ;;  %v549_v9 = vmul.f32 %v3060_v12, %v545_v54  ;;  %v4072_v12 = vpop.permute.xlu1 %213 }
 0x175   :  { %v3106_v49 = vsel %vm527_vm13, 1.0, %v6072_v56  ;;  %v3995_v7 = vsel %vm527_vm13, 0.0, %v523_v55  ;;  %v3061_v55 = vsel %vm381_vm7, 1.0, %v6072_v56  ;;  %6209 = vst [vmem:[#allocation41_spill] sm:$0xff] %v4072_v12 }
 0x176   :  { %6198 = vst [vmem:[#allocation30_spill] sm:$0xff] %v3995_v7  ;;  %v547_v21 = vmul.f32 %v3106_v49, %v3066_v58  ;;  %v550_v34 = vmul.f32 %v3061_v55, %v546_v6  ;;  %v3059_v58 = vsel %vm379_vm5, 1.0, %v6072_v56  ;;  %v4046_v49 = vld [vmem:[%s6051_s3 + $0x18] sm:$0xff] }
 0x177   :  { %v548_v25 = vmul.f32 %v3059_v58, %v544_v60  ;;  %6202 = vst [vmem:[#allocation34_spill] sm:$0xff] %v4046_v49 }
 0x178   :  { %v551_v41 = vmul.f32 %v3062_v29, %v547_v21 }
 0x17a   :  { %580 = vmatpush.msra.mxu2 %v551_v41  ;;  %v4055_v21 = vpop.permute.xlu0 %203  ;;  %v4062_v41 = vpop.permute.xlu2 %208 }
 0x17b   :  { %6204 = vst [vmem:[#allocation36_spill] sm:$0xff] %v4055_v21 }
 0x17c   :  { %581 = vmatpush.msra.mxu2 %v550_v34  ;;  %6206 = vst [vmem:[#allocation38_spill] sm:$0xff] %v4062_v41 }
 0x17e   :  { %582 = vmatpush.msra.mxu2 %v549_v9 }
 0x180   :  { %583 = vmatpush.msra.mxu2 %v548_v25 }
 0x181   :  { %3107 = vmatmul.msk.f32.vlgmr.msra.gmra.mxu2 %vm285_vm4, %v4020_v44 }
 0x182   :  { %804 = vmatpush.bf16.msrb.mxu2 %v3833_v24 }
 0x186   :  { %805 = vmatpush.bf16.msrb.mxu2 %v3842_v27 }
 0x189   :  { %3108 = vmatmul.msk.f32.gmra.mxu2 %vm285_vm4, %v4028_v16 }
 0x18a   :  { %806 = vmatpush.bf16.msrb.mxu2 %v3854_v32 }
 0x18e   :  { %807 = vmatpush.bf16.msrb.mxu2 %v3862_v35 }
 0x191   :  { %3109 = vmatmul.msk.f32.gmra.mxu2 %vm285_vm4, %v4037_v62 }
 0x192   :  { %808 = vmatpush.bf16.msrb.mxu2 %v3877_v43 }
 0x196   :  { %809 = vmatpush.bf16.msrb.mxu2 %v3886_v46 }
 0x199   :  { %3110 = vmatmul.msk.f32.gmra.mxu2 %vm285_vm4, %v4046_v49 }
 0x19a   :  { %810 = vmatpush.bf16.msrb.mxu2 %v3898_v61 }
 0x19e   :  { %811 = vmatpush.bf16.msrb.mxu2 %v3907_v13 }
 0x204   :  { %v585_v6 = vpop.f32.mrf.mxu2 }
 0x205   :  { %v586_v29 = vadd.f32 %v585_v6, %v4055_v21 }
 0x207   :  { %v4059_v31 = vadd.f32 %v586_v29, %v3589_v8 }
 0x209   :  { %6205 = vst [vmem:[#allocation37_spill] sm:$0xff] %v4059_v31  ;;  %v601_v11 = vmul.f32 0.5, %v4059_v31 }
 0x20b   :  { %vm605_vm5 = vcmp.ge.f32.partialorder %v601_v11, 1.0 }
 0x20c   :  { %v588_v54 = vpop.f32.mrf.mxu2  ;;  %v4065_v55 = vsel %vm605_vm5, 0.0, %v601_v11  ;;  %v4076_v9 = vsel %vm605_vm5, 1.0, %v6072_v56  ;;  %v4176_v11 = vld [vmem:[%s6053_s5 + $0x28] sm:$0xff] }
 0x20d   :  { %6207 = vst [vmem:[#allocation39_spill] sm:$0xff] %v4065_v55  ;;  %v589_v47 = vadd.f32 %v588_v54, %v4062_v41 }
 0x20e   :  { %6222 = vst [vmem:[#allocation52_spill] sm:$0xff] %v4176_v11 }
 0x20f   :  { %v4069_v34 = vadd.f32 %v589_v47, %v3578_v5 }
 0x211   :  { %6208 = vst [vmem:[#allocation40_spill] sm:$0xff] %v4069_v34  ;;  %v602_v60 = vmul.f32 0.5, %v4069_v34 }
 0x213   :  { %vm606_vm6 = vcmp.ge.f32.partialorder %v602_v60, 1.0 }
 0x214   :  { %v591_v8 = vpop.f32.mrf.mxu2  ;;  %v4080_v58 = vsel %vm606_vm6, 1.0, %v6072_v56  ;;  %v4083_v25 = vsel %vm606_vm6, 0.0, %v602_v60  ;;  %v4162_v60 = vld [vmem:[%s6053_s5 + $0x10] sm:$0xff] }
 0x215   :  { %6210 = vst [vmem:[#allocation42_spill] sm:$0xff] %v4083_v25  ;;  %v592_v5 = vadd.f32 %v591_v8, %v4072_v12  ;;  %v3436_v6 = vpack.c.bf16 %v4080_v58, %v4076_v9 }
 0x216   :  { %6220 = vst [vmem:[#allocation50_spill] sm:$0xff] %v4162_v60 }
 0x217   :  { %v4089_v29 = vadd.f32 %v592_v5, %v3573_v4  ;;  %3437 = vst [vmem:[%s6052_s11] sm:$0xff] %v3436_v6   ;;  %v6214_v4 = vmov 1.0   ;;  %v6215_v5 = vmov 0.0  }
 0x219   :  { %6211 = vst [vmem:[#allocation43_spill] sm:$0xff] %v4089_v29  ;;  %v603_v54 = vmul.f32 0.5, %v4089_v29 }
 0x21b   :  { %vm607_vm7 = vcmp.ge.f32.partialorder %v603_v54, 1.0 }
 0x21c   :  { %v594_v47 = vpop.f32.mrf.mxu2  ;;  %v4096_v56 = vsel %vm607_vm7, 0.0, %v603_v54  ;;  %v4107_v6 = vsel %vm607_vm7, 1.0, %v6215_v5  ;;  %v4145_v54 = vld [vmem:[%s6053_s5 + $0x18] sm:$0xff] }
 0x21d   :  { %6212 = vst [vmem:[#allocation44_spill] sm:$0xff] %v4096_v56  ;;  %v595_v25 = vadd.f32 %v594_v47, %v4053_v52  ;;  %v4167_v47 = vld [vmem:[%s6053_s5 + $0x20] sm:$0xff] }
 0x21e   :  { %6219 = vst [vmem:[#allocation49_spill] sm:$0xff] %v4145_v54 }
 0x21f   :  { %v4100_v8 = vadd.f32 %v595_v25, %v3562_v0  ;;  %v4140_v25 = vld [vmem:[%s6053_s5 + $0x8] sm:$0xff]  ;;  %6221 = vst [vmem:[#allocation51_spill] sm:$0xff] %v4167_v47 }
 0x220   :  { %6218 = vst [vmem:[#allocation48_spill] sm:$0xff] %v4140_v25 }
 0x221   :  { %6213 = vst [vmem:[#allocation45_spill] sm:$0xff] %v4100_v8  ;;  %v604_v12 = vmul.f32 0.5, %v4100_v8 }
 0x223   :  { %vm608_vm8 = vcmp.ge.f32.partialorder %v604_v12, 1.0 }
 0x224   :  { %3115 = vmatpush.msk.msrb.mxu0 %vm608_vm8, %v6214_v4  ;;  %3466 = vmatpush.msk.msrb.mxu1 %vm608_vm8, %v6214_v4  ;;  %v4110_v41 = vsel %vm608_vm8, 1.0, %v6215_v5  ;;  %v4112_v56 = vsel %vm608_vm8, 0.0, %v604_v12  ;;  %v4133_v12 = vld [vmem:[%s6053_s5] sm:$0xff] }
 0x225   :  { %6216 = vst [vmem:[#allocation46_spill] sm:$0xff] %v4112_v56  ;;  %3467 = vmatpush.msk.msra.mxu3 %vm608_vm8, %v6214_v4  ;;  %v3439_v0 = vpack.c.bf16 %v4110_v41, %v4107_v6 }
 0x226   :  { %3116 = vmatpush.msk.msrb.mxu0 %vm607_vm7, %v6214_v4  ;;  %3468 = vmatpush.msk.msrb.mxu1 %vm607_vm7, %v6214_v4  ;;  %6217 = vst [vmem:[#allocation47_spill] sm:$0xff] %v4133_v12 }
 0x227   :  { %3469 = vmatpush.msk.msra.mxu3 %vm607_vm7, %v6214_v4  ;;  %3459 = vst [vmem:[%s6052_s11 + $0x8] sm:$0xff] %v3439_v0   ;;  %v4183_v0 = vld [vmem:[%s6053_s5 + $0x30] sm:$0xff] }
 0x228   :  { %3117 = vmatpush.msk.msrb.mxu0 %vm606_vm6, %v6214_v4  ;;  %3470 = vmatpush.msk.msrb.mxu1 %vm606_vm6, %v6214_v4  ;;  %6223 = vst [vmem:[#allocation53_spill] sm:$0xff] %v4183_v0 }
 0x229   :  { %3471 = vmatpush.msk.msra.mxu3 %vm606_vm6, %v6214_v4 }
 0x22a   :  { %3118 = vmatpush.msk.msrb.mxu0 %vm605_vm5, %v6214_v4  ;;  %3472 = vmatpush.msk.msrb.mxu1 %vm605_vm5, %v6214_v4 }
 0x22b   :  { %3473 = vmatpush.msk.msra.mxu3 %vm605_vm5, %v6214_v4  ;;  %3119 = vmatmul.msk.f32.vlgmr.msrb.gmra.mxu0 %vm285_vm4, %v4133_v12  ;;  %v4230_v12 = vpop.permute.xlu2 %184 }
 0x22c   :  { %3120 = vmatmul.msk.f32.vlgmr.msrb.gmra.mxu1 %vm285_vm4, %v4140_v25  ;;  %3122 = vmatmul.msk.f32.vlgmr.msra.gmra.mxu3 %vm285_vm4, %v4145_v54  ;;  %v4222_v54 = vpop.permute.xlu0 %189  ;;  %6231 = vst [vmem:[#allocation61_spill] sm:$0xff] %v4230_v12 }
 0x233   :  { %v4236_v52 = vpop.permute.xlu2 %174 }
 0x234   :  { %3121 = vmatmul.msk.f32.gmra.mxu1 %vm285_vm4, %v4162_v60  ;;  %3123 = vmatmul.msk.f32.gmra.mxu3 %vm285_vm4, %v4167_v47  ;;  %v4190_v47 = vld [vmem:[%s6053_s5 + $0x38] sm:$0xff]  ;;  %v4224_v60 = vpop.permute.xlu1 %179  ;;  %6234 = vst [vmem:[#allocation64_spill] sm:$0xff] %v4236_v52 }
 0x235   :  { %6224 = vst [vmem:[#allocation54_spill] sm:$0xff] %v4190_v47 }
 0x236   :  { %6229 = vst [vmem:[#allocation59_spill] sm:$0xff] %v4224_v60 }
 0x23b   :  { %v4248_v40 = vpop.permute.xlu2 %149 }
 0x23c   :  { %3124 = vmatmul.msk.f32.gmra.mxu3 %vm285_vm4, %v4176_v11  ;;  %v4197_v11 = vld [vmem:[%s6053_s5 + $0x40] sm:$0xff]  ;;  %v4228_v25 = vpop.permute.xlu1 %194  ;;  %6237 = vst [vmem:[#allocation67_spill] sm:$0xff] %v4248_v40 }
 0x23d   :  { %6225 = vst [vmem:[#allocation55_spill] sm:$0xff] %v4197_v11 }
 0x244   :  { %3125 = vmatmul.msk.f32.gmra.mxu3 %vm285_vm4, %v4183_v0  ;;  %v4204_v0 = vld [vmem:[%s6053_s5 + $0x48] sm:$0xff] }
 0x245   :  { %6226 = vst [vmem:[#allocation56_spill] sm:$0xff] %v4204_v0 }
 0x24c   :  { %3126 = vmatmul.msk.f32.gmra.mxu3 %vm285_vm4, %v4190_v47  ;;  %v4211_v47 = vld [vmem:[%s6053_s5 + $0x50] sm:$0xff] }
 0x24d   :  { %6227 = vst [vmem:[#allocation57_spill] sm:$0xff] %v4211_v47 }
 0x254   :  { %3127 = vmatmul.msk.f32.gmra.mxu3 %vm285_vm4, %v4197_v11  ;;  %v4218_v11 = vld [vmem:[%s6053_s5 + $0x58] sm:$0xff] }
 0x255   :  { %6228 = vst [vmem:[#allocation58_spill] sm:$0xff] %v4218_v11 }
 0x25c   :  { %3128 = vmatmul.msk.f32.gmra.mxu3 %vm285_vm4, %v4204_v0  ;;  %v4226_v0 = vpop.permute.xlu0 %154 }
 0x25d   :  { %6230 = vst [vmem:[#allocation60_spill] sm:$0xff] %v4226_v0 }
 0x264   :  { %3129 = vmatmul.msk.f32.gmra.mxu3 %vm285_vm4, %v4211_v47  ;;  %v4232_v56 = vpop.permute.xlu0 %164  ;;  %v4234_v47 = vpop.permute.xlu1 %169 }
 0x265   :  { %6232 = vst [vmem:[#allocation62_spill] sm:$0xff] %v4232_v56 }
 0x266   :  { %6233 = vst [vmem:[#allocation63_spill] sm:$0xff] %v4234_v47 }
 0x26c   :  { %3130 = vmatmul.msk.f32.gmra.mxu3 %vm285_vm4, %v4218_v11  ;;  %v4238_v55 = vpop.permute.xlu0 %139  ;;  %v4240_v11 = vpop.permute.xlu1 %144 }
 0x26d   :  { %6235 = vst [vmem:[#allocation65_spill] sm:$0xff] %v4238_v55 }
 0x26e   :  { %6236 = vst [vmem:[#allocation66_spill] sm:$0xff] %v4240_v11 }
 0x2a8   :  { %v690_v21 = vpop.f32.mrf.mxu0 }
 0x2a9   :  { %v691_v49 = vadd.f32 %v690_v21, %v4238_v55  ;;  %v693_v62 = vpop.f32.mrf.mxu1 }
 0x2aa   :  { %v694_v16 = vadd.f32 %v693_v62, %v4240_v11 }
 0x2ab   :  { %v4244_v44 = vmul.f32 0.5, %v691_v49 }
 0x2ac   :  { %v4246_v7 = vmul.f32 0.5, %v694_v16 }
 0x2ad   :  { %vm730_vm9 = vcmp.ge.f32.partialorder %v4244_v44, 1.0 }
 0x2ae   :  { %v4254_v63 = vsel %vm730_vm9, 0.0, %v4244_v44  ;;  %vm731_vm10 = vcmp.ge.f32.partialorder %v4246_v7, 1.0 }
 0x2af   :  { %6238 = vst [vmem:[#allocation68_spill] sm:$0xff] %v4254_v63  ;;  %v4260_v21 = vsel %vm731_vm10, 0.0, %v4246_v7  ;;  %v699_v62 = vpop.f32.mrf.mxu3 }
 0x2b0   :  { %6239 = vst [vmem:[#allocation69_spill] sm:$0xff] %v4260_v21  ;;  %v700_v16 = vadd.f32 %v699_v62, %v4226_v0  ;;  %v4275_v21 = vpop.permute.xlu2 %159 }
 0x2b1   :  { %v696_v49 = vpop.f32.mrf.mxu1  ;;  %6241 = vst [vmem:[#allocation71_spill] sm:$0xff] %v4275_v21 }
 0x2b2   :  { %v4263_v11 = vmul.f32 0.5, %v700_v16  ;;  %v697_v55 = vadd.f32 %v696_v49, %v4248_v40 }
 0x2b4   :  { %vm733_vm11 = vcmp.ge.f32.partialorder %v4263_v11, 1.0  ;;  %v4267_v3 = vmul.f32 0.5, %v697_v55 }
 0x2b5   :  { %v4272_v63 = vsel %vm733_vm11, 0.0, %v4263_v11 }
 0x2b6   :  { %6240 = vst [vmem:[#allocation70_spill] sm:$0xff] %v4272_v63  ;;  %vm732_vm12 = vcmp.ge.f32.partialorder %v4267_v3, 1.0 }
 0x2b7   :  { %v4280_v62 = vsel %vm732_vm12, 0.0, %v4267_v3  ;;  %v702_v16 = vpop.f32.mrf.mxu3 }
 0x2b8   :  { %6242 = vst [vmem:[#allocation72_spill] sm:$0xff] %v4280_v62  ;;  %v703_v49 = vadd.f32 %v702_v16, %v4275_v21 }
 0x2ba   :  { %v4283_v0 = vmul.f32 0.5, %v703_v49 }
 0x2bc   :  { %vm754_vm14 = vcmp.ge.f32.partialorder %v4283_v0, 1.0 }
 0x2bd   :  { %v4289_v55 = vsel %vm754_vm14, 0.0, %v4283_v0  ;;  %v3131_v0 = vsel %vm730_vm9, 1.0, %v6215_v5 }
 0x2be   :  { %6243 = vst [vmem:[#allocation73_spill] sm:$0xff] %v4289_v55  ;;  %v4332_v55 = vld [vmem:[%s6044_s0 + $0x20] sm:$0xff] }
 0x2bf   :  { %v705_v63 = vpop.f32.mrf.mxu3 }
 0x2c0   :  { %v706_v40 = vadd.f32 %v705_v63, %v4232_v56 }
 0x2c2   :  { %v4292_v8 = vmul.f32 0.5, %v706_v40  ;;  %v4312_v40 = vld [vmem:[%s6044_s0 + $0x38] sm:$0xff] }
 0x2c3   :  { %6246 = vst [vmem:[#allocation76_spill] sm:$0xff] %v4312_v40 }
 0x2c4   :  { %vm755_vm15 = vcmp.ge.f32.partialorder %v4292_v8, 1.0 }
 0x2c5   :  { %v4298_v16 = vsel %vm755_vm15, 0.0, %v4292_v8 }
 0x2c6   :  { %6244 = vst [vmem:[#allocation74_spill] sm:$0xff] %v4298_v16 }
 0x2c7   :  { %v708_v49 = vpop.f32.mrf.mxu3 }
 0x2c8   :  { %v709_v21 = vadd.f32 %v708_v49, %v4234_v47  ;;  %v928_v49 = vadd.f32 %v4312_v40, %v3598_v10  ;;  %v4322_v47 = vld [vmem:[%s6044_s0 + $0x30] sm:$0xff]  ;;  %v925_v40 = vadd.f32 %v4332_v55, %v3631_v17 }
 0x2c9   :  { %6247 = vst [vmem:[#allocation77_spill] sm:$0xff] %v4322_v47 }
 0x2ca   :  { %v4301_v62 = vmul.f32 0.5, %v709_v21 }
 0x2cc   :  { %vm756_vm2 = vcmp.ge.f32.partialorder %v4301_v62, 1.0 }
 0x2cd   :  { %v4307_v63 = vsel %vm756_vm2, 0.0, %v4301_v62  ;;  %v3136_v62 = vsel %vm755_vm15, 1.0, %v6215_v5 }
 0x2ce   :  { %6245 = vst [vmem:[#allocation75_spill] sm:$0xff] %v4307_v63  ;;  %v4327_v63 = vld [vmem:[%s6044_s0 + $0x28] sm:$0xff] }
 0x2cf   :  { %v711_v56 = vpop.f32.mrf.mxu3  ;;  %6248 = vst [vmem:[#allocation78_spill] sm:$0xff] %v4327_v63 }
 0x2d0   :  { %v712_v16 = vadd.f32 %v711_v56, %v4236_v52  ;;  %v4340_v56 = vmul.f32 0.5, %v928_v49  ;;  %v926_v52 = vadd.f32 %v4327_v63, %v3619_v15 }
 0x2d2   :  { %v4317_v21 = vmul.f32 0.5, %v712_v16  ;;  %v927_v16 = vadd.f32 %v4322_v47, %v3614_v14  ;;  %vm6126_vm0 = vcmp.ge.f32.partialorder %v4340_v56, 1.0  ;;  %v4357_v14 = vmul.f32 0.5, %v925_v40 }
 0x2d3   :  { %3159 = vmatpush.msk.msra.mxu2 %vm6126_vm0, %v6214_v4 }
 0x2d4   :  { %vm757_vm3 = vcmp.ge.f32.partialorder %v4317_v21, 1.0  ;;  %v4350_v38 = vmul.f32 0.5, %v927_v16  ;;  %vm933_vm6 = vcmp.ge.f32.partialorder %v4357_v14, 1.0 }
 0x2d5   :  { %v4338_v10 = vsel %vm757_vm3, 0.0, %v4317_v21 }
 0x2d6   :  { %6249 = vst [vmem:[#allocation79_spill] sm:$0xff] %v4338_v10  ;;  %v4352_v10 = vmul.f32 0.5, %v926_v52  ;;  %vm935_vm13 = vcmp.ge.f32.partialorder %v4350_v38, 1.0 }
 0x2d7   :  { %v714_v29 = vpop.f32.mrf.mxu3  ;;  %3160 = vmatpush.msk.msra.mxu2 %vm935_vm13, %v6214_v4 }
 0x2d8   :  { %v715_v34 = vadd.f32 %v714_v29, %v4224_v60  ;;  %vm934_vm5 = vcmp.ge.f32.partialorder %v4352_v10, 1.0 }
 0x2d9   :  { %v4367_v15 = vsel %vm934_vm5, 0.0, %v4352_v10  ;;  %3161 = vmatpush.msk.msra.mxu2 %vm934_vm5, %v6214_v4  ;;  %v6266_v10 = vld [vmem:[#allocation18_spill] sm:$0xff] }
 0x2da   :  { %v774_v31 = vmul.f32 0.5, %v715_v34  ;;  %6250 = vst [vmem:[#allocation80_spill] sm:$0xff] %v4367_v15  ;;  %v4378_v34 = vsel %vm933_vm6, 0.0, %v4357_v14 }
 0x2db   :  { %6252 = vst [vmem:[#allocation82_spill] sm:$0xff] %v4378_v34  ;;  %3162 = vmatpush.msk.msra.mxu2 %vm933_vm6, %v6214_v4 }
 0x2dc   :  { %vm778_vm1 = vcmp.ge.f32.partialorder %v774_v31, 1.0 }
 0x2dd   :  { %v4370_v17 = vsel %vm778_vm1, 0.0, %v774_v31  ;;  %v3139_v31 = vsel %vm778_vm1, 1.0, %v6215_v5 }
 0x2de   :  { %6251 = vst [vmem:[#allocation81_spill] sm:$0xff] %v4370_v17  ;;  %v798_v15 = vmul.f32 %v3139_v31, %v4076_v9 }
 0x2df   :  { %v717_v52 = vpop.f32.mrf.mxu3 }
 0x2e0   :  { %v718_v29 = vadd.f32 %v717_v52, %v4230_v12 }
 0x2e2   :  { %v775_v40 = vmul.f32 0.5, %v718_v29 }
 0x2e4   :  { %vm779_vm7 = vcmp.ge.f32.partialorder %v775_v40, 1.0 }
 0x2e5   :  { %v3140_v49 = vsel %vm779_vm7, 1.0, %v6215_v5  ;;  %v4386_v16 = vsel %vm779_vm7, 0.0, %v775_v40 }
 0x2e6   :  { %v799_v17 = vmul.f32 %v3140_v49, %v4080_v58  ;;  %v3134_v49 = vsel %vm733_vm11, 1.0, %v6215_v5 }
 0x2e7   :  { %v720_v60 = vpop.f32.mrf.mxu3 }
 0x2e8   :  { %v721_v34 = vadd.f32 %v720_v60, %v4222_v54  ;;  %v802_v52 = vpack.c.bf16 %v799_v17, %v798_v15 }
 0x2ea   :  { %v776_v12 = vmul.f32 0.5, %v721_v34  ;;  %812 = vmatmul.bf16.vlgmr.msrb.gmra.mxu2 %v802_v52 }
 0x2ec   :  { %vm780_vm8 = vcmp.ge.f32.partialorder %v776_v12, 1.0 }
 0x2ed   :  { %v4391_v4 = vsel %vm780_vm8, 0.0, %v776_v12  ;;  %v3141_v40 = vsel %vm780_vm8, 1.0, %v6215_v5 }
 0x2ee   :  { %v800_v58 = vmul.f32 %v3141_v40, %v4107_v6  ;;  %v3138_v6 = vsel %vm757_vm3, 1.0, %v6215_v5  ;;  %v3135_v40 = vsel %vm754_vm14, 1.0, %v6215_v5 }
 0x2ef   :  { %v723_v29 = vpop.f32.mrf.mxu3 }
 0x2f0   :  { %v724_v47 = vadd.f32 %v723_v29, %v4228_v25 }
 0x2f2   :  { %v777_v63 = vmul.f32 0.5, %v724_v47 }
 0x2f4   :  { %vm781_vm1 = vcmp.ge.f32.partialorder %v777_v63, 1.0 }
 0x2f5   :  { %v3142_v9 = vsel %vm781_vm1, 1.0, %v6215_v5  ;;  %v4396_v31 = vsel %vm781_vm1, 0.0, %v777_v63 }
 0x2f6   :  { %v801_v60 = vmul.f32 %v3142_v9, %v4110_v41  ;;  %v3137_v41 = vsel %vm756_vm2, 1.0, %v6215_v5 }
 0x2f8   :  { %v803_v15 = vpack.c.bf16 %v801_v60, %v800_v58  ;;  %v3133_v58 = vsel %vm732_vm12, 1.0, %v6215_v5 }
 0x2fa   :  { %817 = vmatmul.bf16.gmra.mxu2 %v803_v15  ;;  %v3132_v15 = vsel %vm731_vm10, 1.0, %v6215_v5 }
 0x30a   :  { %3163 = vmatmul.msk.f32.vlgmr.msra.gmra.mxu2 %vm285_vm4, %v3639_v18 }
 0x312   :  { %3164 = vmatmul.msk.f32.gmra.mxu2 %vm285_vm4, %v3658_v22 }
 0x31a   :  { %3165 = vmatmul.msk.f32.gmra.mxu2 %vm285_vm4, %v3674_v26 }
 0x322   :  { %3166 = vmatmul.msk.f32.gmra.mxu2 %vm285_vm4, %v3690_v30 }
 0x32a   :  { %3167 = vmatmul.msk.f32.gmra.mxu2 %vm285_vm4, %v3703_v33 }
 0x332   :  { %3168 = vmatmul.msk.f32.gmra.mxu2 %vm285_vm4, %v3716_v36 }
 0x33a   :  { %3169 = vmatmul.msk.f32.gmra.mxu2 %vm285_vm4, %v3729_v39 }
 0x342   :  { %3170 = vmatmul.msk.f32.gmra.mxu2 %vm285_vm4, %v3742_v42 }
 0x34a   :  { %3171 = vmatmul.msk.f32.gmra.mxu2 %vm285_vm4, %v3755_v45 }
 0x352   :  { %3172 = vmatmul.msk.f32.gmra.mxu2 %vm285_vm4, %v3768_v48 }
 0x35a   :  { %3173 = vmatmul.msk.f32.gmra.mxu2 %vm285_vm4, %v3778_v50 }
 0x362   :  { %3174 = vmatmul.msk.f32.gmra.mxu2 %vm285_vm4, %v3785_v51 }
 0x36d   :  { %v813_v18 = vpop.f32.mrf.mxu2 }
 0x36e   :  { %v823_v22 = vmul.f32 0.5, %v813_v18 }
 0x370   :  { %vm827_vm7 = vcmp.ge.f32.partialorder %v823_v22, 0.5 }
 0x371   :  { %v4425_v26 = vsel %vm827_vm7, 0.0, %v823_v22  ;;  %v3143_v21 = vsel %vm827_vm7, 1.0, %v6215_v5 }
 0x372   :  { %v847_v11 = vmul.f32 %v3143_v21, %v3135_v40  ;;  %v6254_v40 = vld [vmem:[#allocation20_spill] sm:$0xff] }
 0x374   :  { %v851_v3 = vmul.f32 %v3131_v0, %v847_v11 }
 0x375   :  { %v815_v30 = vpop.f32.mrf.mxu2 }
 0x376   :  { %v824_v33 = vmul.f32 0.5, %v815_v30 }
 0x378   :  { %vm828_vm8 = vcmp.ge.f32.partialorder %v824_v33, 0.5 }
 0x379   :  { %v4427_v36 = vsel %vm828_vm8, 0.0, %v824_v33  ;;  %v3144_v12 = vsel %vm828_vm8, 1.0, %v6215_v5  ;;  %v4469_v33 = vld [vmem:[%s6054_s7] sm:$0xff] }
 0x37a   :  { %v848_v52 = vmul.f32 %v3144_v12, %v3136_v62  ;;  %v4506_v12 = vld [vmem:[%s6054_s7 + $0x10] sm:$0xff]  ;;  %v4525_v62 = vld [vmem:[%s6054_s7 + $0x18] sm:$0xff] }
 0x37c   :  { %v852_v22 = vmul.f32 %v3132_v15, %v848_v52 }
 0x37d   :  { %v818_v39 = vpop.f32.mrf.mxu2 }
 0x37e   :  { %v825_v42 = vmul.f32 0.5, %v818_v39 }
 0x380   :  { %vm829_vm1 = vcmp.ge.f32.partialorder %v825_v42, 0.5 }
 0x381   :  { %v4429_v45 = vsel %vm829_vm1, 0.0, %v825_v42  ;;  %v3145_v51 = vsel %vm829_vm1, 1.0, %v6215_v5 }
 0x382   :  { %v849_v17 = vmul.f32 %v3145_v51, %v3137_v41 }
 0x384   :  { %v853_v8 = vmul.f32 %v3133_v58, %v849_v17 }
 0x385   :  { %v820_v48 = vpop.f32.mrf.mxu2 }
 0x386   :  { %v826_v50 = vmul.f32 0.5, %v820_v48  ;;  %v4487_v48 = vld [vmem:[%s6054_s7 + $0x8] sm:$0xff] }
 0x388   :  { %vm830_vm0 = vcmp.ge.f32.partialorder %v826_v50, 0.5 }
 0x389   :  { %v3146_v47 = vsel %vm830_vm0, 1.0, %v6215_v5  ;;  %v4440_v63 = vsel %vm830_vm0, 0.0, %v826_v50 }
 0x38a   :  { %v850_v34 = vmul.f32 %v3146_v47, %v3138_v6 }
 0x38c   :  { %v854_v29 = vmul.f32 %v3134_v49, %v850_v34 }
 0x38d   :  { %v1018_v9 = vpop.f32.mrf.mxu2 }
 0x38e   :  { %v1019_v60 = vadd.f32 %v1018_v9, %v3803_v59  ;;  %883 = vmatpush.msra.mxu1 %v854_v29 }
 0x390   :  { %v1058_v18 = vadd.f32 %v1019_v60, %v3816_v2  ;;  %884 = vmatpush.msra.mxu1 %v853_v8  ;;  %v6255_v8 = vld [vmem:[#allocation16_spill] sm:$0xff] }
 0x392   :  { %v4464_v30 = vmul.f32 0.5, %v1058_v18  ;;  %885 = vmatpush.msra.mxu1 %v852_v22  ;;  %v6256_v18 = vld [vmem:[#allocation21_spill] sm:$0xff] }
 0x394   :  { %886 = vmatpush.msra.mxu1 %v851_v3  ;;  %vm1066_vm10 = vcmp.ge.f32.partialorder %v4464_v30, 1.0 }
 0x395   :  { %3147 = vmatmul.msk.f32.vlgmr.msra.gmra.mxu1 %vm285_vm4, %v4469_v33  ;;  %v1021_v2 = vpop.f32.mrf.mxu2  ;;  %v4477_v7 = vsel %vm1066_vm10, 0.0, %v4464_v30 }
 0x396   :  { %v1022_v44 = vadd.f32 %v1021_v2, %v3811_v1  ;;  %1156 = vmatpush.bf16.msrb.mxu1 %v3833_v24  ;;  %v6257_v2 = vld [vmem:[#allocation17_spill] sm:$0xff] }
 0x398   :  { %v1059_v39 = vadd.f32 %v1022_v44, %v3827_v20 }
 0x39a   :  { %v4482_v42 = vmul.f32 0.5, %v1059_v39  ;;  %1157 = vmatpush.bf16.msrb.mxu1 %v3842_v27  ;;  %v6258_v39 = vld [vmem:[#allocation22_spill] sm:$0xff] }
 0x39c   :  { %vm1067_vm9 = vcmp.ge.f32.partialorder %v4482_v42, 1.0 }
 0x39d   :  { %3148 = vmatmul.msk.f32.gmra.mxu1 %vm285_vm4, %v4487_v48  ;;  %v1024_v50 = vpop.f32.mrf.mxu2  ;;  %v4496_v51 = vsel %vm1067_vm9, 0.0, %v4482_v42  ;;  %v3176_v30 = vsel %vm1067_vm9, 1.0, %v6215_v5 }
 0x39e   :  { %v1025_v20 = vadd.f32 %v1024_v50, %v3822_v19  ;;  %1158 = vmatpush.bf16.msrb.mxu1 %v3854_v32 }
 0x3a0   :  { %v1060_v41 = vadd.f32 %v1025_v20, %v3847_v28 }
 0x3a2   :  { %v4501_v6 = vmul.f32 0.5, %v1060_v41  ;;  %1159 = vmatpush.bf16.msrb.mxu1 %v3862_v35  ;;  %v6259_v41 = vld [vmem:[#allocation12_spill] sm:$0xff] }
 0x3a4   :  { %vm1068_vm11 = vcmp.ge.f32.partialorder %v4501_v6, 1.0 }
 0x3a5   :  { %3149 = vmatmul.msk.f32.gmra.mxu1 %vm285_vm4, %v4506_v12  ;;  %v1027_v47 = vpop.f32.mrf.mxu2  ;;  %v4515_v17 = vsel %vm1068_vm11, 0.0, %v4501_v6  ;;  %v3177_v42 = vsel %vm1068_vm11, 1.0, %v6215_v5 }
 0x3a6   :  { %v1028_v28 = vadd.f32 %v1027_v47, %v3791_v53  ;;  %1160 = vmatpush.bf16.msrb.mxu1 %v3877_v43 }
 0x3a8   :  { %v1061_v34 = vadd.f32 %v1028_v28, %v3868_v37  ;;  %v6253_v37 = vld [vmem:[#allocation19_spill] sm:$0xff] }
 0x3a9   :  { %v6260_v28 = vld [vmem:[#allocation23_spill] sm:$0xff] }
 0x3aa   :  { %v4520_v49 = vmul.f32 0.5, %v1061_v34  ;;  %1161 = vmatpush.bf16.msrb.mxu1 %v3886_v46 }
 0x3ac   :  { %vm1069_vm12 = vcmp.ge.f32.partialorder %v4520_v49, 1.0 }
 0x3ad   :  { %3150 = vmatmul.msk.f32.gmra.mxu1 %vm285_vm4, %v4525_v62  ;;  %v1030_v21 = vpop.f32.mrf.mxu2  ;;  %v4534_v52 = vsel %vm1069_vm12, 0.0, %v4520_v49  ;;  %v6290_v49 = vld [vmem:[#allocation36_spill] sm:$0xff] }
 0x3ae   :  { %v1031_v29 = vadd.f32 %v1030_v21, %v6253_v37  ;;  %1162 = vmatpush.bf16.msrb.mxu1 %v3898_v61 }
 0x3b0   :  { %v1090_v9 = vadd.f32 %v1031_v29, %v6254_v40  ;;  %v6261_v29 = vld [vmem:[#allocation14_spill] sm:$0xff] }
 0x3b2   :  { %v4539_v58 = vmul.f32 0.5, %v1090_v9  ;;  %1163 = vmatpush.bf16.msrb.mxu1 %v3907_v13  ;;  %v6262_v9 = vld [vmem:[#allocation24_spill] sm:$0xff] }
 0x3b4   :  { %vm1098_vm14 = vcmp.ge.f32.partialorder %v4539_v58, 1.0 }
 0x3b5   :  { %v1033_v11 = vpop.f32.mrf.mxu2  ;;  %v4547_v60 = vsel %vm1098_vm14, 0.0, %v4539_v58 }
 0x3b6   :  { %1499 = vmatpush.bf16.msra.mxu1 %v3833_v24  ;;  %v1034_v15 = vadd.f32 %v1033_v11, %v6255_v8 }
 0x3b8   :  { %v1091_v22 = vadd.f32 %v1034_v15, %v6256_v18  ;;  %v3155_v15 = vsel %vm933_vm6, 1.0, %v6215_v5 }
 0x3ba   :  { %1500 = vmatpush.bf16.msra.mxu1 %v3842_v27  ;;  %v4552_v0 = vmul.f32 0.5, %v1091_v22 }
 0x3bc   :  { %vm1099_vm15 = vcmp.ge.f32.partialorder %v4552_v0, 1.0 }
 0x3bd   :  { %v1036_v24 = vpop.f32.mrf.mxu2  ;;  %v4559_v3 = vsel %vm1099_vm15, 0.0, %v4552_v0  ;;  %v3180_v58 = vsel %vm1099_vm15, 1.0, %v6215_v5 }
 0x3be   :  { %1501 = vmatpush.bf16.msra.mxu1 %v3854_v32  ;;  %v1037_v44 = vadd.f32 %v1036_v24, %v6257_v2 }
 0x3c0   :  { %v1092_v27 = vadd.f32 %v1037_v44, %v6258_v39  ;;  %v6263_v44 = vld [vmem:[#allocation15_spill] sm:$0xff] }
 0x3c2   :  { %1502 = vmatpush.bf16.msra.mxu1 %v3862_v35  ;;  %v4564_v50 = vmul.f32 0.5, %v1092_v27 }
 0x3c4   :  { %vm1100_vm2 = vcmp.ge.f32.partialorder %v4564_v50, 1.0 }
 0x3c5   :  { %v1039_v32 = vpop.f32.mrf.mxu2  ;;  %v4571_v20 = vsel %vm1100_vm2, 0.0, %v4564_v50 }
 0x3c6   :  { %1503 = vmatpush.bf16.msra.mxu1 %v3877_v43  ;;  %v1040_v47 = vadd.f32 %v1039_v32, %v6259_v41 }
 0x3c8   :  { %v1093_v35 = vadd.f32 %v1040_v47, %v6260_v28 }
 0x3ca   :  { %1504 = vmatpush.bf16.msra.mxu1 %v3886_v46  ;;  %v4576_v34 = vmul.f32 0.5, %v1093_v35 }
 0x3cc   :  { %vm1101_vm3 = vcmp.ge.f32.partialorder %v4576_v34, 1.0 }
 0x3cd   :  { %v1042_v43 = vpop.f32.mrf.mxu2  ;;  %v4583_v21 = vsel %vm1101_vm3, 0.0, %v4576_v34  ;;  %v3182_v50 = vsel %vm1101_vm3, 1.0, %v6215_v5  ;;  %v6288_v34 = vld [vmem:[#allocation33_spill] sm:$0xff] }
 0x3ce   :  { %1505 = vmatpush.bf16.msra.mxu1 %v3898_v61  ;;  %v1043_v40 = vadd.f32 %v1042_v43, %v6261_v29 }
 0x3d0   :  { %v1122_v46 = vadd.f32 %v1043_v40, %v6262_v9  ;;  %v6264_v40 = vld [vmem:[#allocation25_spill] sm:$0xff] }
 0x3d2   :  { %1506 = vmatpush.bf16.msra.mxu1 %v3907_v13  ;;  %v1126_v11 = vmul.f32 0.5, %v1122_v46  ;;  %v3156_v13 = vsel %vm934_vm5, 1.0, %v6215_v5  ;;  %vm6268_vm5 = vcmp.ge.f32.partialorder %v4340_v56, 1.0 }
 0x3d4   :  { %vm1130_vm0 = vcmp.ge.f32.partialorder %v1126_v11, 1.0 }
 0x3d5   :  { %v3183_v61 = vsel %vm1130_vm0, 1.0, %v6215_v5  ;;  %v1045_v18 = vpop.f32.mrf.mxu2  ;;  %v4592_v22 = vsel %vm1130_vm0, 0.0, %v1126_v11 }
 0x3d6   :  { %v1150_v24 = vmul.f32 %v3183_v61, %v3155_v15  ;;  %v1046_v39 = vadd.f32 %v1045_v18, %v6263_v44  ;;  %v6267_v18 = vld [vmem:[#allocation26_spill] sm:$0xff] }
 0x3d8   :  { %v1123_v27 = vadd.f32 %v1046_v39, %v3957_v23 }
 0x3da   :  { %v1127_v32 = vmul.f32 0.5, %v1123_v27 }
 0x3dc   :  { %vm1131_vm7 = vcmp.ge.f32.partialorder %v1127_v32, 1.0 }
 0x3dd   :  { %v3184_v14 = vsel %vm1131_vm7, 1.0, %v6215_v5  ;;  %v1048_v47 = vpop.f32.mrf.mxu2  ;;  %v4600_v28 = vsel %vm1131_vm7, 0.0, %v1127_v32  ;;  %v3157_v32 = vsel %vm935_vm13, 1.0, %v6215_v5 }
 0x3de   :  { %v1151_v35 = vmul.f32 %v3184_v14, %v3156_v13  ;;  %v1049_v43 = vadd.f32 %v1048_v47, %v3799_v57  ;;  %v3158_v13 = vsel %vm6268_vm5, 1.0, %v6215_v5 }
 0x3e0   :  { %v1124_v9 = vadd.f32 %v1049_v43, %v6264_v40  ;;  %v1154_v46 = vpack.c.bf16 %v1151_v35, %v1150_v24 }
 0x3e2   :  { %v1128_v11 = vmul.f32 0.5, %v1124_v9  ;;  %1164 = vmatmul.bf16.vlgmr.msrb.gmra.mxu1 %v1154_v46  ;;  %v4618_v9 = vpop.permute.xlu1 %227 }
 0x3e3   :  { %6270 = vst [vmem:[#allocation22_spill] sm:$0xff] %v4618_v9 }
 0x3e4   :  { %vm1132_vm6 = vcmp.ge.f32.partialorder %v1128_v11, 1.0 }
 0x3e5   :  { %v1051_v23 = vpop.f32.mrf.mxu2  ;;  %v4604_v15 = vsel %vm1132_vm6, 0.0, %v1128_v11  ;;  %v3185_v24 = vsel %vm1132_vm6, 1.0, %v6215_v5 }
 0x3e6   :  { %6265 = vst [vmem:[#allocation20_spill] sm:$0xff] %v4604_v15  ;;  %v1052_v61 = vadd.f32 %v1051_v23, %v6266_v10  ;;  %v1152_v35 = vmul.f32 %v3185_v24, %v3157_v32  ;;  %v6271_v23 = vld [vmem:[#allocation37_spill] sm:$0xff]  ;;  %v6273_v32 = vld [vmem:[#allocation40_spill] sm:$0xff]  ;;  %v4632_v24 = vpop.permute.xlu0 %237 }
 0x3e7   :  { %6274 = vst [vmem:[#allocation24_spill] sm:$0xff] %v4632_v24 }
 0x3e8   :  { %v1125_v39 = vadd.f32 %v1052_v61, %v6267_v18  ;;  %v4625_v18 = vpop.permute.xlu2 %232 }
 0x3e9   :  { %6272 = vst [vmem:[#allocation23_spill] sm:$0xff] %v4625_v18 }
 0x3ea   :  { %v1129_v27 = vmul.f32 0.5, %v1125_v39 }
 0x3ec   :  { %vm1133_vm8 = vcmp.ge.f32.partialorder %v1129_v27, 1.0 }
 0x3ed   :  { %v3186_v14 = vsel %vm1133_vm8, 1.0, %v6215_v5  ;;  %v4616_v47 = vsel %vm1133_vm8, 0.0, %v1129_v27 }
 0x3ee   :  { %6269 = vst [vmem:[#allocation21_spill] sm:$0xff] %v4616_v47  ;;  %v1153_v43 = vmul.f32 %v3186_v14, %v3158_v13 }
 0x3f0   :  { %v1155_v40 = vpack.c.bf16 %v1153_v43, %v1152_v35  ;;  %v6275_v43 = vld [vmem:[#allocation43_spill] sm:$0xff] }
 0x3f2   :  { %1169 = vmatmul.bf16.gmra.mxu1 %v1155_v40 }
 0x412   :  { %v888_v46 = vpop.f32.mrf.mxu1 }
 0x413   :  { %v889_v11 = vadd.f32 %v888_v46, %v4618_v9  ;;  %v4639_v46 = vpop.permute.xlu1 %242 }
 0x414   :  { %6276 = vst [vmem:[#allocation25_spill] sm:$0xff] %v4639_v46 }
 0x415   :  { %v900_v61 = vadd.f32 %v889_v11, %v6271_v23 }
 0x417   :  { %904 = vst [vmem:[%s6055_s10] sm:$0xff] %v900_v61  ;;  %v6277_v61 = vld [vmem:[#allocation45_spill] sm:$0xff] }
 0x41a   :  { %v891_v39 = vpop.f32.mrf.mxu1 }
 0x41b   :  { %v892_v27 = vadd.f32 %v891_v39, %v4625_v18 }
 0x41d   :  { %v901_v13 = vadd.f32 %v892_v27, %v6273_v32  ;;  %v6278_v32 = vld [vmem:[#allocation27_spill] sm:$0xff] }
 0x41f   :  { %905 = vst [vmem:[%s6055_s10 + $0x8] sm:$0xff] %v901_v13 }
 0x422   :  { %v894_v14 = vpop.f32.mrf.mxu1 }
 0x423   :  { %v895_v35 = vadd.f32 %v894_v14, %v4632_v24 }
 0x425   :  { %v902_v40 = vadd.f32 %v895_v35, %v6275_v43  ;;  %v3179_v35 = vsel %vm1098_vm14, 1.0, %v6215_v5 }
 0x427   :  { %906 = vst [vmem:[%s6055_s10 + $0x10] sm:$0xff] %v902_v40 }
 0x42a   :  { %v897_v11 = vpop.f32.mrf.mxu1 }
 0x42b   :  { %v898_v23 = vadd.f32 %v897_v11, %v4639_v46 }
 0x42d   :  { %v903_v39 = vadd.f32 %v898_v23, %v6277_v61  ;;  %v3175_v23 = vsel %vm1066_vm10, 1.0, %v6215_v5  ;;  %v6280_v61 = vld [vmem:[#allocation28_spill] sm:$0xff] }
 0x42f   :  { %907 = vst [vmem:[%s6055_s10 + $0x18] sm:$0xff] %v903_v39 }
 0x45f   :  { %v1165_v27 = vpop.f32.mrf.mxu1 }
 0x460   :  { %v1179_v13 = vadd.f32 %v1165_v27, %v6278_v32 }
 0x462   :  { %v1183_v14 = vmul.f32 0.5, %v1179_v13 }
 0x464   :  { %vm1187_vm1 = vcmp.ge.f32.partialorder %v1183_v14, 0.5 }
 0x465   :  { %v3187_v43 = vsel %vm1187_vm1, 1.0, %v6215_v5  ;;  %v4651_v40 = vsel %vm1187_vm1, 0.0, %v1183_v14 }
 0x466   :  { %6279 = vst [vmem:[#allocation26_spill] sm:$0xff] %v4651_v40  ;;  %v1207_v11 = vmul.f32 %v3187_v43, %v3179_v35  ;;  %v6282_v43 = vld [vmem:[#allocation29_spill] sm:$0xff] }
 0x467   :  { %v1167_v46 = vpop.f32.mrf.mxu1 }
 0x468   :  { %v1180_v39 = vadd.f32 %v1167_v46, %v6280_v61  ;;  %v1211_v24 = vmul.f32 %v3175_v23, %v1207_v11  ;;  %v3181_v23 = vsel %vm1100_vm2, 1.0, %v6215_v5 }
 0x46a   :  { %v1184_v27 = vmul.f32 0.5, %v1180_v39 }
 0x46c   :  { %vm1188_vm0 = vcmp.ge.f32.partialorder %v1184_v27, 0.5 }
 0x46d   :  { %v3188_v32 = vsel %vm1188_vm0, 1.0, %v6215_v5  ;;  %v4661_v13 = vsel %vm1188_vm0, 0.0, %v1184_v27 }
 0x46e   :  { %6281 = vst [vmem:[#allocation37_spill] sm:$0xff] %v4661_v13  ;;  %v1208_v14 = vmul.f32 %v3188_v32, %v3180_v58  ;;  %v6284_v32 = vld [vmem:[#allocation30_spill] sm:$0xff] }
 0x46f   :  { %v1170_v35 = vpop.f32.mrf.mxu1 }
 0x470   :  { %v1181_v40 = vadd.f32 %v1170_v35, %v6282_v43  ;;  %v1212_v46 = vmul.f32 %v3176_v30, %v1208_v14 }
 0x472   :  { %v1185_v11 = vmul.f32 0.5, %v1181_v40 }
 0x474   :  { %vm1189_vm10 = vcmp.ge.f32.partialorder %v1185_v11, 0.5 }
 0x475   :  { %v3189_v0 = vsel %vm1189_vm10, 1.0, %v6215_v5  ;;  %v4671_v61 = vsel %vm1189_vm10, 0.0, %v1185_v11  ;;  %v3178_v11 = vsel %vm1069_vm12, 1.0, %v6215_v5  ;;  %vm6347_vm10 = vcmp.ge.f32.partialorder %v4340_v56, 1.0 }
 0x476   :  { %6283 = vst [vmem:[#allocation40_spill] sm:$0xff] %v4671_v61  ;;  %v1209_v39 = vmul.f32 %v3189_v0, %v3181_v23  ;;  %v6286_v23 = vld [vmem:[#allocation31_spill] sm:$0xff]  ;;  %v6287_v0 = vld [vmem:[#allocation32_spill] sm:$0xff] }
 0x477   :  { %v1172_v27 = vpop.f32.mrf.mxu1 }
 0x478   :  { %v1182_v58 = vadd.f32 %v1172_v27, %v6284_v32  ;;  %v1213_v35 = vmul.f32 %v3177_v42, %v1209_v39  ;;  %v6289_v39 = vld [vmem:[#allocation34_spill] sm:$0xff] }
 0x47a   :  { %v1186_v14 = vmul.f32 0.5, %v1182_v58 }
 0x47c   :  { %vm1190_vm9 = vcmp.ge.f32.partialorder %v1186_v14, 0.5 }
 0x47d   :  { %v3190_v40 = vsel %vm1190_vm9, 1.0, %v6215_v5  ;;  %v4681_v30 = vsel %vm1190_vm9, 0.0, %v1186_v14  ;;  %v6293_v14 = vld [vmem:[#allocation38_spill] sm:$0xff] }
 0x47e   :  { %6285 = vst [vmem:[#allocation43_spill] sm:$0xff] %v4681_v30  ;;  %v1210_v43 = vmul.f32 %v3190_v40, %v3182_v50 }
 0x480   :  { %v1214_v6 = vmul.f32 %v3178_v11, %v1210_v43  ;;  %v6295_v43 = vld [vmem:[#allocation78_spill] sm:$0xff] }
 0x482   :  { %1243 = vmatpush.msra.mxu0 %v1214_v6  ;;  %v6297_v6 = vld [vmem:[#allocation42_spill] sm:$0xff] }
 0x484   :  { %1244 = vmatpush.msra.mxu0 %v1213_v35 }
 0x486   :  { %1245 = vmatpush.msra.mxu0 %v1212_v46  ;;  %v6292_v46 = vld [vmem:[#allocation39_spill] sm:$0xff] }
 0x488   :  { %1246 = vmatpush.msra.mxu0 %v1211_v24 }
 0x489   :  { %3191 = vmatmul.msk.f32.vlgmr.msra.gmra.mxu0 %vm285_vm4, %v6286_v23 }
 0x491   :  { %3192 = vmatmul.msk.f32.gmra.mxu0 %vm285_vm4, %v6287_v0 }
 0x499   :  { %3193 = vmatmul.msk.f32.gmra.mxu0 %vm285_vm4, %v6288_v34  ;;  %v6298_v34 = vld [vmem:[#allocation41_spill] sm:$0xff] }
 0x4a1   :  { %3194 = vmatmul.msk.f32.gmra.mxu0 %vm285_vm4, %v6289_v39 }
 0x506   :  { %v1248_v27 = vpop.f32.mrf.mxu0 }
 0x507   :  { %v1249_v42 = vadd.f32 %v1248_v27, %v6290_v49 }
 0x509   :  { %v4696_v32 = vadd.f32 %v4332_v55, %v1249_v42 }
 0x50b   :  { %6291 = vst [vmem:[#allocation45_spill] sm:$0xff] %v4696_v32  ;;  %v1268_v24 = vadd.f32 %v4696_v32, %v6292_v46 }
 0x50d   :  { %v1272_v58 = vmul.f32 0.5, %v1268_v24  ;;  %v6300_v24 = vld [vmem:[#allocation77_spill] sm:$0xff] }
 0x50e   :  { %v1251_v35 = vpop.f32.mrf.mxu0 }
 0x50f   :  { %v1252_v50 = vadd.f32 %v1251_v35, %v6293_v14  ;;  %vm1276_vm11 = vcmp.ge.f32.partialorder %v1272_v58, 1.0 }
 0x510   :  { %v4702_v40 = vsel %vm1276_vm11, 0.0, %v1272_v58  ;;  %v4719_v46 = vsel %vm1276_vm11, 1.0, %v6215_v5  ;;  %v6316_v58 = vld [vmem:[#allocation53_spill] sm:$0xff] }
 0x511   :  { %6294 = vst [vmem:[#allocation27_spill] sm:$0xff] %v4702_v40  ;;  %v4705_v11 = vadd.f32 %v6295_v43, %v1252_v50  ;;  %v6302_v43 = vld [vmem:[#allocation44_spill] sm:$0xff] }
 0x512   :  { %v6305_v40 = vld [vmem:[#allocation76_spill] sm:$0xff] }
 0x513   :  { %6296 = vst [vmem:[#allocation28_spill] sm:$0xff] %v4705_v11  ;;  %v1269_v23 = vadd.f32 %v4705_v11, %v6297_v6 }
 0x515   :  { %v1273_v0 = vmul.f32 0.5, %v1269_v23 }
 0x516   :  { %v1254_v55 = vpop.f32.mrf.mxu0 }
 0x517   :  { %v1255_v39 = vadd.f32 %v1254_v55, %v6298_v34  ;;  %vm1277_vm12 = vcmp.ge.f32.partialorder %v1273_v0, 1.0  ;;  %v6303_v34 = vld [vmem:[#allocation35_spill] sm:$0xff] }
 0x518   :  { %v4711_v27 = vsel %vm1277_vm12, 0.0, %v1273_v0  ;;  %v4715_v42 = vsel %vm1277_vm12, 1.0, %v6215_v5  ;;  %v6315_v0 = vld [vmem:[#allocation52_spill] sm:$0xff] }
 0x519   :  { %6299 = vst [vmem:[#allocation29_spill] sm:$0xff] %v4711_v27  ;;  %v4722_v35 = vadd.f32 %v6300_v24, %v1255_v39  ;;  %v3442_v50 = vpack.c.bf16 %v4715_v42, %v4719_v46  ;;  %v6307_v24 = vld [vmem:[#allocation46_spill] sm:$0xff] }
 0x51b   :  { %6301 = vst [vmem:[#allocation30_spill] sm:$0xff] %v4722_v35  ;;  %v1270_v6 = vadd.f32 %v4722_v35, %v6302_v43 }
 0x51c   :  { %3460 = vst [vmem:[%s6052_s11 + $0x10] sm:$0xff] %v3442_v50   ;;  %v6309_v50 = vmov 1.0  }
 0x51d   :  { %v1274_v23 = vmul.f32 0.5, %v1270_v6 }
 0x51e   :  { %v1257_v55 = vpop.f32.mrf.mxu0 }
 0x51f   :  { %v1258_v27 = vadd.f32 %v1257_v55, %v6303_v34  ;;  %vm1278_vm14 = vcmp.ge.f32.partialorder %v1274_v23, 1.0  ;;  %v6314_v55 = vld [vmem:[#allocation51_spill] sm:$0xff] }
 0x520   :  { %v4732_v14 = vsel %vm1278_vm14, 0.0, %v1274_v23  ;;  %v4746_v6 = vsel %vm1278_vm14, 1.0, %v6215_v5 }
 0x521   :  { %6304 = vst [vmem:[#allocation31_spill] sm:$0xff] %v4732_v14  ;;  %v4735_v39 = vadd.f32 %v6305_v40, %v1258_v27  ;;  %v6312_v40 = vld [vmem:[#allocation50_spill] sm:$0xff]  ;;  %v6313_v27 = vld [vmem:[#allocation49_spill] sm:$0xff] }
 0x522   :  { %v6326_v14 = vld [vmem:[#allocation69_spill] sm:$0xff] }
 0x523   :  { %6306 = vst [vmem:[#allocation32_spill] sm:$0xff] %v4735_v39  ;;  %v1271_v49 = vadd.f32 %v4735_v39, %v6307_v24  ;;  %v6317_v24 = vld [vmem:[#allocation54_spill] sm:$0xff] }
 0x525   :  { %v1275_v30 = vmul.f32 0.5, %v1271_v49  ;;  %v6311_v49 = vld [vmem:[#allocation48_spill] sm:$0xff] }
 0x527   :  { %vm1279_vm15 = vcmp.ge.f32.partialorder %v1275_v30, 1.0 }
 0x528   :  { %v4739_v43 = vsel %vm1279_vm15, 0.0, %v1275_v30  ;;  %v4742_v61 = vsel %vm1279_vm15, 1.0, %v6215_v5  ;;  %3199 = vmatpush.msk.msrb.mxu3 %vm1279_vm15, %v6309_v50  ;;  %v6310_v30 = vld [vmem:[#allocation47_spill] sm:$0xff] }
 0x529   :  { %6308 = vst [vmem:[#allocation33_spill] sm:$0xff] %v4739_v43  ;;  %v3445_v23 = vpack.c.bf16 %v4742_v61, %v4746_v6  ;;  %v6323_v43 = vld [vmem:[#allocation68_spill] sm:$0xff] }
 0x52a   :  { %3200 = vmatpush.msk.msrb.mxu3 %vm1278_vm14, %v6309_v50 }
 0x52b   :  { %3461 = vst [vmem:[%s6052_s11 + $0x18] sm:$0xff] %v3445_v23   ;;  %v6318_v23 = vld [vmem:[#allocation55_spill] sm:$0xff] }
 0x52c   :  { %3201 = vmatpush.msk.msrb.mxu3 %vm1277_vm12, %v6309_v50 }
 0x52e   :  { %3202 = vmatpush.msk.msrb.mxu3 %vm1276_vm11, %v6309_v50 }
 0x52f   :  { %3203 = vmatmul.msk.f32.vlgmr.msrb.gmra.mxu3 %vm285_vm4, %v6310_v30  ;;  %v6319_v30 = vld [vmem:[#allocation56_spill] sm:$0xff] }
 0x537   :  { %3204 = vmatmul.msk.f32.gmra.mxu3 %vm285_vm4, %v6311_v49  ;;  %v6320_v49 = vld [vmem:[#allocation57_spill] sm:$0xff] }
 0x53f   :  { %3205 = vmatmul.msk.f32.gmra.mxu3 %vm285_vm4, %v6312_v40  ;;  %v6321_v40 = vld [vmem:[#allocation58_spill] sm:$0xff] }
 0x547   :  { %3206 = vmatmul.msk.f32.gmra.mxu3 %vm285_vm4, %v6313_v27 }
 0x54f   :  { %3207 = vmatmul.msk.f32.gmra.mxu3 %vm285_vm4, %v6314_v55  ;;  %v6322_v55 = vld [vmem:[#allocation65_spill] sm:$0xff] }
 0x557   :  { %3208 = vmatmul.msk.f32.gmra.mxu3 %vm285_vm4, %v6315_v0 }
 0x55f   :  { %3209 = vmatmul.msk.f32.gmra.mxu3 %vm285_vm4, %v6316_v58 }
 0x567   :  { %3210 = vmatmul.msk.f32.gmra.mxu3 %vm285_vm4, %v6317_v24 }
 0x56f   :  { %3211 = vmatmul.msk.f32.gmra.mxu3 %vm285_vm4, %v6318_v23 }
 0x577   :  { %3212 = vmatmul.msk.f32.gmra.mxu3 %vm285_vm4, %v6319_v30  ;;  %v6325_v30 = vld [vmem:[#allocation66_spill] sm:$0xff] }
 0x57f   :  { %3213 = vmatmul.msk.f32.gmra.mxu3 %vm285_vm4, %v6320_v49 }
 0x587   :  { %3214 = vmatmul.msk.f32.gmra.mxu3 %vm285_vm4, %v6321_v40 }
 0x5b2   :  { %v1361_v27 = vpop.f32.mrf.mxu3 }
 0x5b3   :  { %v1362_v0 = vadd.f32 %v1361_v27, %v6322_v55  ;;  %v6329_v55 = vld [vmem:[#allocation72_spill] sm:$0xff] }
 0x5b5   :  { %v1401_v58 = vadd.f32 %v1362_v0, %v6323_v43  ;;  %v6328_v0 = vld [vmem:[#allocation67_spill] sm:$0xff] }
 0x5b7   :  { %v4784_v34 = vmul.f32 0.5, %v1401_v58 }
 0x5b9   :  { %vm1409_vm2 = vcmp.ge.f32.partialorder %v4784_v34, 1.0 }
 0x5ba   :  { %v1364_v24 = vpop.f32.mrf.mxu3  ;;  %v4790_v23 = vsel %vm1409_vm2, 0.0, %v4784_v34 }
 0x5bb   :  { %6324 = vst [vmem:[#allocation34_spill] sm:$0xff] %v4790_v23  ;;  %v1365_v49 = vadd.f32 %v1364_v24, %v6325_v30  ;;  %v6332_v30 = vld [vmem:[#allocation70_spill] sm:$0xff] }
 0x5bd   :  { %v1402_v13 = vadd.f32 %v1365_v49, %v6326_v14  ;;  %v6331_v14 = vld [vmem:[#allocation60_spill] sm:$0xff] }
 0x5bf   :  { %v4794_v40 = vmul.f32 0.5, %v1402_v13 }
 0x5c1   :  { %vm1410_vm3 = vcmp.ge.f32.partialorder %v4794_v40, 1.0 }
 0x5c2   :  { %v1367_v27 = vpop.f32.mrf.mxu3  ;;  %v4800_v43 = vsel %vm1410_vm3, 0.0, %v4794_v40  ;;  %v3216_v34 = vsel %vm1410_vm3, 1.0, %v6215_v5 }
 0x5c3   :  { %6327 = vst [vmem:[#allocation39_spill] sm:$0xff] %v4800_v43  ;;  %v1368_v58 = vadd.f32 %v1367_v27, %v6328_v0  ;;  %v6335_v0 = vld [vmem:[#allocation73_spill] sm:$0xff] }
 0x5c5   :  { %v1403_v39 = vadd.f32 %v1368_v58, %v6329_v55  ;;  %v6334_v55 = vld [vmem:[#allocation71_spill] sm:$0xff] }
 0x5c7   :  { %v4804_v35 = vmul.f32 0.5, %v1403_v39 }
 0x5c9   :  { %vm1411_vm7 = vcmp.ge.f32.partialorder %v4804_v35, 1.0 }
 0x5ca   :  { %v1370_v24 = vpop.f32.mrf.mxu3  ;;  %v4810_v13 = vsel %vm1411_vm7, 0.0, %v4804_v35  ;;  %v3217_v40 = vsel %vm1411_vm7, 1.0, %v6215_v5 }
 0x5cb   :  { %6330 = vst [vmem:[#allocation78_spill] sm:$0xff] %v4810_v13  ;;  %v1371_v49 = vadd.f32 %v1370_v24, %v6331_v14  ;;  %v6338_v14 = vld [vmem:[#allocation74_spill] sm:$0xff] }
 0x5cd   :  { %v1404_v23 = vadd.f32 %v1371_v49, %v6332_v30  ;;  %v6337_v30 = vld [vmem:[#allocation62_spill] sm:$0xff] }
 0x5cf   :  { %v4814_v11 = vmul.f32 0.5, %v1404_v23 }
 0x5d1   :  { %vm1412_vm6 = vcmp.ge.f32.partialorder %v4814_v11, 1.0 }
 0x5d2   :  { %v1373_v27 = vpop.f32.mrf.mxu3  ;;  %v4820_v39 = vsel %vm1412_vm6, 0.0, %v4814_v11 }
 0x5d3   :  { %6333 = vst [vmem:[#allocation42_spill] sm:$0xff] %v4820_v39  ;;  %v1374_v58 = vadd.f32 %v1373_v27, %v6334_v55  ;;  %v6341_v55 = vld [vmem:[#allocation75_spill] sm:$0xff] }
 0x5d5   :  { %v1433_v43 = vadd.f32 %v1374_v58, %v6335_v0  ;;  %v6340_v0 = vld [vmem:[#allocation63_spill] sm:$0xff] }
 0x5d7   :  { %v4824_v18 = vmul.f32 0.5, %v1433_v43 }
 0x5d9   :  { %vm1441_vm5 = vcmp.ge.f32.partialorder %v4824_v18, 1.0 }
 0x5da   :  { %v1376_v24 = vpop.f32.mrf.mxu3  ;;  %v4830_v23 = vsel %vm1441_vm5, 0.0, %v4824_v18 }
 0x5db   :  { %6336 = vst [vmem:[#allocation77_spill] sm:$0xff] %v4830_v23  ;;  %v1377_v49 = vadd.f32 %v1376_v24, %v6337_v30  ;;  %v6344_v30 = vld [vmem:[#allocation79_spill] sm:$0xff] }
 0x5dd   :  { %v1434_v13 = vadd.f32 %v1377_v49, %v6338_v14  ;;  %v6343_v14 = vld [vmem:[#allocation64_spill] sm:$0xff] }
 0x5df   :  { %v4834_v32 = vmul.f32 0.5, %v1434_v13 }
 0x5e1   :  { %vm1442_vm8 = vcmp.ge.f32.partialorder %v4834_v32, 1.0 }
 0x5e2   :  { %v1379_v27 = vpop.f32.mrf.mxu3  ;;  %v4840_v43 = vsel %vm1442_vm8, 0.0, %v4834_v32  ;;  %v3220_v18 = vsel %vm1442_vm8, 1.0, %v6215_v5 }
 0x5e3   :  { %6339 = vst [vmem:[#allocation44_spill] sm:$0xff] %v4840_v43  ;;  %v1380_v58 = vadd.f32 %v1379_v27, %v6340_v0 }
 0x5e5   :  { %v1435_v39 = vadd.f32 %v1380_v58, %v6341_v55  ;;  %v6346_v55 = vld [vmem:[#allocation59_spill] sm:$0xff] }
 0x5e7   :  { %v4844_v9 = vmul.f32 0.5, %v1435_v39 }
 0x5e9   :  { %vm1443_vm1 = vcmp.ge.f32.partialorder %v4844_v9, 1.0 }
 0x5ea   :  { %v1382_v24 = vpop.f32.mrf.mxu3  ;;  %v4850_v13 = vsel %vm1443_vm1, 0.0, %v4844_v9  ;;  %v3221_v32 = vsel %vm1443_vm1, 1.0, %v6215_v5 }
 0x5eb   :  { %6342 = vst [vmem:[#allocation76_spill] sm:$0xff] %v4850_v13  ;;  %v1383_v49 = vadd.f32 %v1382_v24, %v6343_v14  ;;  %v940_v13 = vsel %vm6347_vm10, 0.0, %v4340_v56  ;;  %v4873_v14 = vld [vmem:[%s6044_s0 + $0x58] sm:$0xff]  ;;  %v4883_v56 = vld [vmem:[%s6044_s0 + $0x48] sm:$0xff] }
 0x5ec   :  { %6349 = vst [vmem:[#allocation47_spill] sm:$0xff] %v4873_v14 }
 0x5ed   :  { %v1436_v23 = vadd.f32 %v1383_v49, %v6344_v30  ;;  %v939_v30 = vsel %vm935_vm13, 0.0, %v4350_v38  ;;  %6351 = vst [vmem:[#allocation50_spill] sm:$0xff] %v4883_v56  ;;  %v1633_v38 = vadd.f32 %v4873_v14, %v940_v13 }
 0x5ef   :  { %v4854_v47 = vmul.f32 0.5, %v1436_v23  ;;  %v6348_v23 = vld [vmem:[#allocation81_spill] sm:$0xff]  ;;  %v4896_v10 = vmul.f32 0.5, %v1633_v38 }
 0x5f1   :  { %vm1444_vm0 = vcmp.ge.f32.partialorder %v4854_v47, 1.0  ;;  %vm1641_vm9 = vcmp.ge.f32.partialorder %v4896_v10, 1.0 }
 0x5f2   :  { %v1385_v27 = vpop.f32.mrf.mxu3  ;;  %v4860_v39 = vsel %vm1444_vm0, 0.0, %v4854_v47  ;;  %3251 = vmatpush.msk.msrb.mxu1 %vm1641_vm9, %v6309_v50  ;;  %v3222_v9 = vsel %vm1444_vm0, 1.0, %v6215_v5 }
 0x5f3   :  { %6345 = vst [vmem:[#allocation46_spill] sm:$0xff] %v4860_v39  ;;  %v1386_v58 = vadd.f32 %v1385_v27, %v6346_v55  ;;  %v4878_v27 = vld [vmem:[%s6044_s0 + $0x50] sm:$0xff]  ;;  %v4892_v55 = vld [vmem:[%s6044_s0 + $0x40] sm:$0xff] }
 0x5f4   :  { %6350 = vst [vmem:[#allocation48_spill] sm:$0xff] %v4878_v27  ;;  %v6354_v39 = vld [vmem:[#allocation82_spill] sm:$0xff] }
 0x5f5   :  { %v1465_v24 = vadd.f32 %v1386_v58, %v6348_v23  ;;  %v1632_v58 = vadd.f32 %v4878_v27, %v939_v30  ;;  %v6352_v23 = vld [vmem:[#allocation80_spill] sm:$0xff]  ;;  %6353 = vst [vmem:[#allocation49_spill] sm:$0xff] %v4892_v55  ;;  %v1630_v0 = vadd.f32 %v4892_v55, %v6354_v39  ;;  %v6355_v30 = vld [vmem:[#allocation61_spill] sm:$0xff] }
 0x5f7   :  { %v1469_v49 = vmul.f32 0.5, %v1465_v24  ;;  %v1631_v24 = vadd.f32 %v4883_v56, %v6352_v23  ;;  %v4898_v15 = vmul.f32 0.5, %v1632_v58  ;;  %v4908_v27 = vmul.f32 0.5, %v1630_v0 }
 0x5f9   :  { %vm1473_vm13 = vcmp.ge.f32.partialorder %v1469_v49, 1.0  ;;  %v4900_v13 = vmul.f32 0.5, %v1631_v24  ;;  %vm1640_vm11 = vcmp.ge.f32.partialorder %v4898_v15, 1.0  ;;  %vm1638_vm14 = vcmp.ge.f32.partialorder %v4908_v27, 1.0 }
 0x5fa   :  { %v1388_v43 = vpop.f32.mrf.mxu3  ;;  %v4904_v23 = vsel %vm1473_vm13, 0.0, %v1469_v49  ;;  %3252 = vmatpush.msk.msrb.mxu1 %vm1640_vm11, %v6309_v50 }
 0x5fb   :  { %v1389_v14 = vadd.f32 %v1388_v43, %v6355_v30  ;;  %6356 = vst [vmem:[#allocation51_spill] sm:$0xff] %v4904_v23  ;;  %vm1639_vm12 = vcmp.ge.f32.partialorder %v4900_v13, 1.0  ;;  %v3223_v43 = vsel %vm1473_vm13, 1.0, %v6215_v5 }
 0x5fc   :  { %3253 = vmatpush.msk.msrb.mxu1 %vm1639_vm12, %v6309_v50  ;;  %v1493_v58 = vmul.f32 %v3223_v43, %v4719_v46 }
 0x5fd   :  { %v1466_v39 = vadd.f32 %v1389_v14, %v4386_v16 }
 0x5fe   :  { %3254 = vmatpush.msk.msrb.mxu1 %vm1638_vm14, %v6309_v50 }
 0x5ff   :  { %v1470_v38 = vmul.f32 0.5, %v1466_v39 }
 0x601   :  { %vm1474_vm15 = vcmp.ge.f32.partialorder %v1470_v38, 1.0 }
 0x602   :  { %v3224_v16 = vsel %vm1474_vm15, 1.0, %v6215_v5  ;;  %v1391_v0 = vpop.f32.mrf.mxu3  ;;  %v4925_v14 = vsel %vm1474_vm15, 0.0, %v1470_v38 }
 0x603   :  { %v1494_v24 = vmul.f32 %v3224_v16, %v4715_v42  ;;  %v1392_v39 = vadd.f32 %v1391_v0, %v4222_v54 }
 0x605   :  { %v1467_v49 = vadd.f32 %v1392_v39, %v4391_v4  ;;  %v1497_v30 = vpack.c.bf16 %v1494_v24, %v1493_v58  ;;  %v4982_v24 = vld [vmem:[%s6046_s1 + $0x28] sm:$0xff]  ;;  %v4989_v39 = vld [vmem:[%s6046_s1 + $0x30] sm:$0xff] }
 0x606   :  { %6357 = vst [vmem:[#allocation52_spill] sm:$0xff] %v4982_v24 }
 0x607   :  { %v1471_v23 = vmul.f32 0.5, %v1467_v49  ;;  %1507 = vmatmul.bf16.vlgmr.msra.gmra.mxu1 %v1497_v30  ;;  %6358 = vst [vmem:[#allocation53_spill] sm:$0xff] %v4989_v39  ;;  %v4996_v49 = vld [vmem:[%s6046_s1 + $0x38] sm:$0xff] }
 0x608   :  { %6359 = vst [vmem:[#allocation54_spill] sm:$0xff] %v4996_v49 }
 0x609   :  { %vm1475_vm10 = vcmp.ge.f32.partialorder %v1471_v23, 1.0 }
 0x60a   :  { %v1394_v56 = vpop.f32.mrf.mxu3  ;;  %v4934_v55 = vsel %vm1475_vm10, 0.0, %v1471_v23  ;;  %v3225_v43 = vsel %vm1475_vm10, 1.0, %v6215_v5  ;;  %v4975_v23 = vld [vmem:[%s6046_s1 + $0x20] sm:$0xff] }
 0x60b   :  { %v1395_v38 = vadd.f32 %v1394_v56, %v4228_v25  ;;  %v1495_v4 = vmul.f32 %v3225_v43, %v4746_v6  ;;  %v4947_v56 = vld [vmem:[%s6046_s1] sm:$0xff]  ;;  %v4968_v6 = vld [vmem:[%s6046_s1 + $0x18] sm:$0xff] }
 0x60c   :  { %v5024_v43 = vld [vmem:[%s6046_s1 + $0x58] sm:$0xff] }
 0x60d   :  { %v1468_v46 = vadd.f32 %v1395_v38, %v4396_v31  ;;  %v4954_v31 = vld [vmem:[%s6046_s1 + $0x8] sm:$0xff]  ;;  %v5003_v38 = vld [vmem:[%s6046_s1 + $0x40] sm:$0xff]  ;;  %6363 = vst [vmem:[#allocation58_spill] sm:$0xff] %v5024_v43 }
 0x60e   :  { %6360 = vst [vmem:[#allocation55_spill] sm:$0xff] %v5003_v38 }
 0x60f   :  { %v1472_v42 = vmul.f32 0.5, %v1468_v46  ;;  %v5010_v46 = vld [vmem:[%s6046_s1 + $0x48] sm:$0xff] }
 0x610   :  { %6361 = vst [vmem:[#allocation56_spill] sm:$0xff] %v5010_v46 }
 0x611   :  { %vm1476_vm13 = vcmp.ge.f32.partialorder %v1472_v42, 1.0 }
 0x612   :  { %v3226_v16 = vsel %vm1476_vm13, 1.0, %v6215_v5  ;;  %v4940_v0 = vsel %vm1476_vm13, 0.0, %v1472_v42  ;;  %v5017_v42 = vld [vmem:[%s6046_s1 + $0x50] sm:$0xff] }
 0x613   :  { %v1496_v30 = vmul.f32 %v3226_v16, %v4742_v61  ;;  %v4961_v61 = vld [vmem:[%s6046_s1 + $0x10] sm:$0xff]  ;;  %6362 = vst [vmem:[#allocation57_spill] sm:$0xff] %v5017_v42 }
 0x615   :  { %v1498_v58 = vpack.c.bf16 %v1496_v30, %v1495_v4 }
 0x617   :  { %1512 = vmatmul.bf16.gmra.mxu1 %v1498_v58  ;;  %v3219_v58 = vsel %vm1441_vm5, 1.0, %v6215_v5 }
 0x627   :  { %3255 = vmatmul.msk.f32.vlgmr.msrb.gmra.mxu1 %vm285_vm4, %v4947_v56 }
 0x62f   :  { %3256 = vmatmul.msk.f32.gmra.mxu1 %vm285_vm4, %v4954_v31 }
 0x637   :  { %3257 = vmatmul.msk.f32.gmra.mxu1 %vm285_vm4, %v4961_v61 }
 0x63f   :  { %3258 = vmatmul.msk.f32.gmra.mxu1 %vm285_vm4, %v4968_v6 }
 0x647   :  { %3259 = vmatmul.msk.f32.gmra.mxu1 %vm285_vm4, %v4975_v23 }
 0x64f   :  { %3260 = vmatmul.msk.f32.gmra.mxu1 %vm285_vm4, %v4982_v24 }
 0x657   :  { %3261 = vmatmul.msk.f32.gmra.mxu1 %vm285_vm4, %v4989_v39  ;;  %v3215_v39 = vsel %vm1409_vm2, 1.0, %v6215_v5 }
 0x65f   :  { %3262 = vmatmul.msk.f32.gmra.mxu1 %vm285_vm4, %v4996_v49 }
 0x667   :  { %3263 = vmatmul.msk.f32.gmra.mxu1 %vm285_vm4, %v5003_v38 }
 0x66f   :  { %3264 = vmatmul.msk.f32.gmra.mxu1 %vm285_vm4, %v5010_v46 }
 0x677   :  { %3265 = vmatmul.msk.f32.gmra.mxu1 %vm285_vm4, %v5017_v42 }
 0x67f   :  { %3266 = vmatmul.msk.f32.gmra.mxu1 %vm285_vm4, %v5024_v43 }
 0x684   :  { %v1508_v16 = vpop.f32.mrf.mxu1 }
 0x685   :  { %v1522_v4 = vadd.f32 %v1508_v16, %v4425_v26 }
 0x687   :  { %v1526_v30 = vmul.f32 0.5, %v1522_v4 }
 0x689   :  { %vm1530_vm15 = vcmp.ge.f32.partialorder %v1526_v30, 0.5 }
 0x68a   :  { %v3227_v46 = vsel %vm1530_vm15, 1.0, %v6215_v5  ;;  %v5033_v42 = vsel %vm1530_vm15, 0.0, %v1526_v30 }
 0x68b   :  { %v1550_v38 = vmul.f32 %v3227_v46, %v3219_v58 }
 0x68c   :  { %v1510_v49 = vpop.f32.mrf.mxu1 }
 0x68d   :  { %v1523_v43 = vadd.f32 %v1510_v49, %v4427_v36  ;;  %v1554_v24 = vmul.f32 %v3215_v39, %v1550_v38 }
 0x68f   :  { %v1527_v26 = vmul.f32 0.5, %v1523_v43 }
 0x691   :  { %vm1531_vm10 = vcmp.ge.f32.partialorder %v1527_v26, 0.5 }
 0x692   :  { %v3228_v16 = vsel %vm1531_vm10, 1.0, %v6215_v5  ;;  %v5043_v4 = vsel %vm1531_vm10, 0.0, %v1527_v26 }
 0x693   :  { %v1551_v30 = vmul.f32 %v3228_v16, %v3220_v18 }
 0x694   :  { %v1513_v46 = vpop.f32.mrf.mxu1 }
 0x695   :  { %v1524_v58 = vadd.f32 %v1513_v46, %v4429_v45  ;;  %v1555_v36 = vmul.f32 %v3216_v34, %v1551_v30 }
 0x697   :  { %v1528_v39 = vmul.f32 0.5, %v1524_v58  ;;  %v3218_v58 = vsel %vm1412_vm6, 1.0, %v6215_v5 }
 0x699   :  { %vm1532_vm2 = vcmp.ge.f32.partialorder %v1528_v39, 0.5 }
 0x69a   :  { %v3229_v49 = vsel %vm1532_vm2, 1.0, %v6215_v5  ;;  %v5053_v38 = vsel %vm1532_vm2, 0.0, %v1528_v39 }
 0x69b   :  { %v1552_v43 = vmul.f32 %v3229_v49, %v3221_v32 }
 0x69c   :  { %v1515_v26 = vpop.f32.mrf.mxu1 }
 0x69d   :  { %v1525_v18 = vadd.f32 %v1515_v26, %v4440_v63  ;;  %v1556_v45 = vmul.f32 %v3217_v40, %v1552_v43  ;;  %v5085_v26 = vld [vmem:[%s6050_s9 + $0x38] sm:$0xff] }
 0x69f   :  { %v1529_v16 = vmul.f32 0.5, %v1525_v18 }
 0x6a1   :  { %vm1533_vm3 = vcmp.ge.f32.partialorder %v1529_v16, 0.5 }
 0x6a2   :  { %v3230_v30 = vsel %vm1533_vm3, 1.0, %v6215_v5  ;;  %v5063_v46 = vsel %vm1533_vm3, 0.0, %v1529_v16 }
 0x6a3   :  { %v1553_v34 = vmul.f32 %v3230_v30, %v3222_v9  ;;  %v5118_v9 = vld [vmem:[%s6050_s9 + $0x20] sm:$0xff] }
 0x6a4   :  { %v1723_v35 = vpop.f32.mrf.mxu1 }
 0x6a5   :  { %v1557_v39 = vmul.f32 %v3218_v58, %v1553_v34  ;;  %v1724_v63 = vadd.f32 %v1723_v35, %v3803_v59  ;;  %v5133_v58 = vld [vmem:[%s6050_s9 + $0x18] sm:$0xff] }
 0x6a7   :  { %v1763_v32 = vadd.f32 %v1724_v63, %v4477_v7  ;;  %1586 = vmatpush.msrb.mxu0 %v1557_v39  ;;  %v5142_v39 = vld [vmem:[%s6050_s9 + $0x10] sm:$0xff] }
 0x6a9   :  { %v5070_v49 = vmul.f32 0.5, %v1763_v32  ;;  %1587 = vmatpush.msrb.mxu0 %v1556_v45  ;;  %v5109_v45 = vld [vmem:[%s6050_s9 + $0x28] sm:$0xff] }
 0x6ab   :  { %vm1771_vm7 = vcmp.ge.f32.partialorder %v5070_v49, 1.0  ;;  %1588 = vmatpush.msrb.mxu0 %v1555_v36 }
 0x6ac   :  { %v1726_v47 = vpop.f32.mrf.mxu1  ;;  %v5076_v43 = vsel %vm1771_vm7, 0.0, %v5070_v49 }
 0x6ad   :  { %v1727_v11 = vadd.f32 %v1726_v47, %v3811_v1  ;;  %1589 = vmatpush.msrb.mxu0 %v1554_v24  ;;  %v5094_v24 = vld [vmem:[%s6050_s9 + $0x30] sm:$0xff]  ;;  %v5157_v47 = vld [vmem:[%s6050_s9 + $0x8] sm:$0xff] }
 0x6ae   :  { %3231 = vmatmul.msk.f32.vlgmr.msrb.gmra.mxu0 %vm285_vm4, %v4469_v33 }
 0x6af   :  { %v1764_v7 = vadd.f32 %v1727_v11, %v4496_v51  ;;  %1861 = vmatpush.bf16.msra.mxu0 %v5085_v26 }
 0x6b1   :  { %v5088_v36 = vmul.f32 0.5, %v1764_v7  ;;  %v5166_v7 = vld [vmem:[%s6050_s9] sm:$0xff] }
 0x6b3   :  { %vm1772_vm6 = vcmp.ge.f32.partialorder %v5088_v36, 1.0  ;;  %1862 = vmatpush.bf16.msra.mxu0 %v5094_v24 }
 0x6b4   :  { %v1729_v33 = vpop.f32.mrf.mxu1  ;;  %v5100_v51 = vsel %vm1772_vm6, 0.0, %v5088_v36  ;;  %v3268_v49 = vsel %vm1772_vm6, 1.0, %v6215_v5 }
 0x6b5   :  { %v1730_v40 = vadd.f32 %v1729_v33, %v3822_v19 }
 0x6b6   :  { %3232 = vmatmul.msk.f32.gmra.mxu0 %vm285_vm4, %v4487_v48 }
 0x6b7   :  { %v1765_v18 = vadd.f32 %v1730_v40, %v4515_v17  ;;  %1863 = vmatpush.bf16.msra.mxu0 %v5109_v45 }
 0x6b9   :  { %v5112_v16 = vmul.f32 0.5, %v1765_v18 }
 0x6bb   :  { %vm1773_vm5 = vcmp.ge.f32.partialorder %v5112_v16, 1.0  ;;  %1864 = vmatpush.bf16.msra.mxu0 %v5118_v9 }
 0x6bc   :  { %v1732_v48 = vpop.f32.mrf.mxu1  ;;  %v5124_v17 = vsel %vm1773_vm5, 0.0, %v5112_v16  ;;  %v3269_v36 = vsel %vm1773_vm5, 1.0, %v6215_v5 }
 0x6bd   :  { %v1733_v30 = vadd.f32 %v1732_v48, %v3791_v53 }
 0x6be   :  { %3233 = vmatmul.msk.f32.gmra.mxu0 %vm285_vm4, %v4506_v12 }
 0x6bf   :  { %v1766_v34 = vadd.f32 %v1733_v30, %v4534_v52  ;;  %1865 = vmatpush.bf16.msra.mxu0 %v5133_v58 }
 0x6c1   :  { %v5136_v35 = vmul.f32 0.5, %v1766_v34 }
 0x6c3   :  { %vm1774_vm8 = vcmp.ge.f32.partialorder %v5136_v35, 1.0  ;;  %1866 = vmatpush.bf16.msra.mxu0 %v5142_v39 }
 0x6c4   :  { %v1735_v12 = vpop.f32.mrf.mxu1  ;;  %v5148_v52 = vsel %vm1774_vm8, 0.0, %v5136_v35  ;;  %v5307_v35 = vld [vmem:[%s6051_s3 + $0x8] sm:$0xff] }
 0x6c5   :  { %6364 = vst [vmem:[#allocation68_spill] sm:$0xff] %v5148_v52  ;;  %v1736_v63 = vadd.f32 %v1735_v12, %v6253_v37  ;;  %v6372_v37 = vld [vmem:[#allocation21_spill] sm:$0xff] }
 0x6c6   :  { %3234 = vmatmul.msk.f32.gmra.mxu0 %vm285_vm4, %v4525_v62 }
 0x6c7   :  { %v1795_v32 = vadd.f32 %v1736_v63, %v4547_v60  ;;  %1867 = vmatpush.bf16.msra.mxu0 %v5157_v47 }
 0x6c9   :  { %v5160_v11 = vmul.f32 0.5, %v1795_v32 }
 0x6cb   :  { %vm1803_vm1 = vcmp.ge.f32.partialorder %v5160_v11, 1.0  ;;  %1868 = vmatpush.bf16.msra.mxu0 %v5166_v7 }
 0x6cc   :  { %v1738_v62 = vpop.f32.mrf.mxu1  ;;  %v5172_v60 = vsel %vm1803_vm1, 0.0, %v5160_v11 }
 0x6cd   :  { %6365 = vst [vmem:[#allocation69_spill] sm:$0xff] %v5172_v60  ;;  %v1739_v33 = vadd.f32 %v1738_v62, %v6255_v8  ;;  %v6371_v8 = vld [vmem:[#allocation18_spill] sm:$0xff] }
 0x6cf   :  { %v1796_v40 = vadd.f32 %v1739_v33, %v4559_v3 }
 0x6d1   :  { %v5176_v18 = vmul.f32 0.5, %v1796_v40 }
 0x6d3   :  { %vm1804_vm0 = vcmp.ge.f32.partialorder %v5176_v18, 1.0 }
 0x6d4   :  { %v1741_v48 = vpop.f32.mrf.mxu1  ;;  %v5182_v30 = vsel %vm1804_vm0, 0.0, %v5176_v18  ;;  %v3272_v11 = vsel %vm1804_vm0, 1.0, %v6215_v5 }
 0x6d5   :  { %6366 = vst [vmem:[#allocation72_spill] sm:$0xff] %v5182_v30  ;;  %v1742_v34 = vadd.f32 %v1741_v48, %v6257_v2 }
 0x6d7   :  { %v1797_v12 = vadd.f32 %v1742_v34, %v4571_v20 }
 0x6d9   :  { %v5186_v63 = vmul.f32 0.5, %v1797_v12 }
 0x6db   :  { %vm1805_vm13 = vcmp.ge.f32.partialorder %v5186_v63, 1.0 }
 0x6dc   :  { %v1744_v32 = vpop.f32.mrf.mxu1  ;;  %v5192_v3 = vsel %vm1805_vm13, 0.0, %v5186_v63  ;;  %v3273_v18 = vsel %vm1805_vm13, 1.0, %v6215_v5 }
 0x6dd   :  { %6367 = vst [vmem:[#allocation70_spill] sm:$0xff] %v5192_v3  ;;  %v1745_v62 = vadd.f32 %v1744_v32, %v6259_v41  ;;  %v3248_v41 = vsel %vm1639_vm12, 1.0, %v6215_v5 }
 0x6df   :  { %v1798_v33 = vadd.f32 %v1745_v62, %v4583_v21 }
 0x6e1   :  { %v5196_v40 = vmul.f32 0.5, %v1798_v33 }
 0x6e3   :  { %vm1806_vm15 = vcmp.ge.f32.partialorder %v5196_v40, 1.0 }
 0x6e4   :  { %v1747_v48 = vpop.f32.mrf.mxu1  ;;  %v5202_v20 = vsel %vm1806_vm15, 0.0, %v5196_v40  ;;  %v3274_v63 = vsel %vm1806_vm15, 1.0, %v6215_v5  ;;  %v5316_v40 = vld [vmem:[%s6051_s3 + $0x10] sm:$0xff] }
 0x6e5   :  { %6368 = vst [vmem:[#allocation73_spill] sm:$0xff] %v5202_v20  ;;  %v1748_v34 = vadd.f32 %v1747_v48, %v6261_v29  ;;  %v3247_v48 = vsel %vm1638_vm14, 1.0, %v6215_v5 }
 0x6e6   :  { %6391 = vst [vmem:[#allocation21_spill] sm:$0xff] %v5316_v40 }
 0x6e7   :  { %v1827_v12 = vadd.f32 %v1748_v34, %v4592_v22 }
 0x6e9   :  { %v1831_v2 = vmul.f32 0.5, %v1827_v12 }
 0x6eb   :  { %vm1835_vm10 = vcmp.ge.f32.partialorder %v1831_v2, 1.0 }
 0x6ec   :  { %v1750_v3 = vpop.f32.mrf.mxu1  ;;  %v5206_v32 = vsel %vm1835_vm10, 0.0, %v1831_v2  ;;  %v3275_v22 = vsel %vm1835_vm10, 1.0, %v6215_v5 }
 0x6ed   :  { %6369 = vst [vmem:[#allocation74_spill] sm:$0xff] %v5206_v32  ;;  %v1751_v21 = vadd.f32 %v1750_v3, %v6263_v44  ;;  %v1855_v3 = vmul.f32 %v3275_v22, %v3247_v48 }
 0x6ef   :  { %v1828_v62 = vadd.f32 %v1751_v21, %v4600_v28  ;;  %v6370_v21 = vld [vmem:[#allocation20_spill] sm:$0xff] }
 0x6f0   :  { %6390 = vst [vmem:[#allocation20_spill] sm:$0xff] %v5307_v35 }
 0x6f1   :  { %v1832_v33 = vmul.f32 0.5, %v1828_v62 }
 0x6f3   :  { %vm1836_vm2 = vcmp.ge.f32.partialorder %v1832_v33, 1.0 }
 0x6f4   :  { %v3276_v34 = vsel %vm1836_vm2, 1.0, %v6215_v5  ;;  %v1753_v2 = vpop.f32.mrf.mxu1  ;;  %v5218_v12 = vsel %vm1836_vm2, 0.0, %v1832_v33 }
 0x6f5   :  { %v1856_v44 = vmul.f32 %v3276_v34, %v3248_v41  ;;  %v1754_v28 = vadd.f32 %v1753_v2, %v3799_v57  ;;  %v3249_v41 = vsel %vm1640_vm11, 1.0, %v6215_v5  ;;  %v6374_v34 = vld [vmem:[#allocation45_spill] sm:$0xff] }
 0x6f7   :  { %v1829_v62 = vadd.f32 %v1754_v28, %v6370_v21  ;;  %v1859_v32 = vpack.c.bf16 %v1856_v44, %v1855_v3  ;;  %v3250_v44 = vsel %vm1641_vm9, 1.0, %v6215_v5  ;;  %v6375_v28 = vld [vmem:[#allocation23_spill] sm:$0xff] }
 0x6f9   :  { %v1833_v29 = vmul.f32 0.5, %v1829_v62  ;;  %1869 = vmatmul.bf16.vlgmr.msra.gmra.mxu0 %v1859_v32  ;;  %v6376_v62 = vld [vmem:[#allocation28_spill] sm:$0xff] }
 0x6fb   :  { %vm1837_vm3 = vcmp.ge.f32.partialorder %v1833_v29, 1.0 }
 0x6fc   :  { %v1756_v20 = vpop.f32.mrf.mxu1  ;;  %v5222_v30 = vsel %vm1837_vm3, 0.0, %v1833_v29  ;;  %v3277_v33 = vsel %vm1837_vm3, 1.0, %v6215_v5 }
 0x6fd   :  { %v1757_v60 = vadd.f32 %v1756_v20, %v6371_v8  ;;  %v1857_v48 = vmul.f32 %v3277_v33, %v3249_v41  ;;  %v6377_v41 = vld [vmem:[#allocation24_spill] sm:$0xff] }
 0x6ff   :  { %v1830_v52 = vadd.f32 %v1757_v60, %v6372_v37 }
 0x701   :  { %v1834_v53 = vmul.f32 0.5, %v1830_v52  ;;  %v6373_v52 = vld [vmem:[#allocation22_spill] sm:$0xff] }
 0x703   :  { %vm1838_vm10 = vcmp.ge.f32.partialorder %v1834_v53, 1.0 }
 0x704   :  { %v3278_v32 = vsel %vm1838_vm10, 1.0, %v6215_v5  ;;  %v5234_v29 = vsel %vm1838_vm10, 0.0, %v1834_v53 }
 0x705   :  { %v1858_v20 = vmul.f32 %v3278_v32, %v3250_v44  ;;  %v6378_v44 = vld [vmem:[#allocation30_spill] sm:$0xff] }
 0x707   :  { %v1860_v22 = vpack.c.bf16 %v1858_v20, %v1857_v48  ;;  %v6379_v20 = vld [vmem:[#allocation25_spill] sm:$0xff] }
 0x709   :  { %1874 = vmatmul.bf16.gmra.mxu0 %v1860_v22 }
 0x72b   :  { %v1591_v37 = vpop.f32.mrf.mxu0 }
 0x72c   :  { %v1592_v60 = vadd.f32 %v1591_v37, %v6373_v52  ;;  %v6380_v37 = vld [vmem:[#allocation32_spill] sm:$0xff] }
 0x72e   :  { %v1603_v2 = vadd.f32 %v1592_v60, %v6374_v34 }
 0x730   :  { %3235 = vst [vmem:[%s6055_s10 + $0x20] sm:$0xff] %v1603_v2 }
 0x733   :  { %v1594_v3 = vpop.f32.mrf.mxu0 }
 0x734   :  { %v1595_v21 = vadd.f32 %v1594_v3, %v6375_v28 }
 0x736   :  { %v1604_v8 = vadd.f32 %v1595_v21, %v6376_v62  ;;  %v3271_v21 = vsel %vm1803_vm1, 1.0, %v6215_v5 }
 0x738   :  { %3236 = vst [vmem:[%s6055_s10 + $0x28] sm:$0xff] %v1604_v8  ;;  %v6381_v8 = vld [vmem:[#allocation26_spill] sm:$0xff] }
 0x73b   :  { %v1597_v53 = vpop.f32.mrf.mxu0 }
 0x73c   :  { %v1598_v33 = vadd.f32 %v1597_v53, %v6377_v41 }
 0x73e   :  { %v1605_v32 = vadd.f32 %v1598_v33, %v6378_v44 }
 0x740   :  { %3237 = vst [vmem:[%s6055_s10 + $0x30] sm:$0xff] %v1605_v32  ;;  %v3267_v32 = vsel %vm1771_vm7, 1.0, %v6215_v5 }
 0x743   :  { %v1600_v48 = vpop.f32.mrf.mxu0 }
 0x744   :  { %v1601_v22 = vadd.f32 %v1600_v48, %v6379_v20  ;;  %v6383_v48 = vld [vmem:[#allocation37_spill] sm:$0xff] }
 0x746   :  { %v1606_v60 = vadd.f32 %v1601_v22, %v6380_v37 }
 0x748   :  { %3238 = vst [vmem:[%s6055_s10 + $0x38] sm:$0xff] %v1606_v60 }
 0x776   :  { %v1870_v34 = vpop.f32.mrf.mxu0 }
 0x777   :  { %v1884_v2 = vadd.f32 %v1870_v34, %v6381_v8 }
 0x779   :  { %v1888_v3 = vmul.f32 0.5, %v1884_v2 }
 0x77b   :  { %vm1892_vm2 = vcmp.ge.f32.partialorder %v1888_v3, 0.5 }
 0x77c   :  { %v3279_v62 = vsel %vm1892_vm2, 1.0, %v6215_v5  ;;  %v5261_v53 = vsel %vm1892_vm2, 0.0, %v1888_v3 }
 0x77d   :  { %6382 = vst [vmem:[#allocation75_spill] sm:$0xff] %v5261_v53  ;;  %v1912_v33 = vmul.f32 %v3279_v62, %v3271_v21  ;;  %v6385_v21 = vld [vmem:[#allocation40_spill] sm:$0xff] }
 0x77e   :  { %v1872_v44 = vpop.f32.mrf.mxu0 }
 0x77f   :  { %v1885_v22 = vadd.f32 %v1872_v44, %v6383_v48  ;;  %v1916_v37 = vmul.f32 %v3267_v32, %v1912_v33 }
 0x781   :  { %v1889_v60 = vmul.f32 0.5, %v1885_v22 }
 0x783   :  { %vm1893_vm3 = vcmp.ge.f32.partialorder %v1889_v60, 0.5 }
 0x784   :  { %v3280_v34 = vsel %vm1893_vm3, 1.0, %v6215_v5  ;;  %v5271_v8 = vsel %vm1893_vm3, 0.0, %v1889_v60 }
 0x785   :  { %6384 = vst [vmem:[#allocation79_spill] sm:$0xff] %v5271_v8  ;;  %v1913_v2 = vmul.f32 %v3280_v34, %v3272_v11  ;;  %v6387_v11 = vld [vmem:[#allocation43_spill] sm:$0xff] }
 0x786   :  { %v1875_v3 = vpop.f32.mrf.mxu0 }
 0x787   :  { %v1886_v62 = vadd.f32 %v1875_v3, %v6385_v21  ;;  %v1917_v44 = vmul.f32 %v3268_v49, %v1913_v2 }
 0x789   :  { %v1890_v33 = vmul.f32 0.5, %v1886_v62 }
 0x78b   :  { %vm1894_vm7 = vcmp.ge.f32.partialorder %v1890_v33, 0.5 }
 0x78c   :  { %v3281_v32 = vsel %vm1894_vm7, 1.0, %v6215_v5  ;;  %v5281_v48 = vsel %vm1894_vm7, 0.0, %v1890_v33  ;;  %v3270_v33 = vsel %vm1774_vm8, 1.0, %v6215_v5 }
 0x78d   :  { %6386 = vst [vmem:[#allocation81_spill] sm:$0xff] %v5281_v48  ;;  %v1914_v22 = vmul.f32 %v3281_v32, %v3273_v18  ;;  %v5299_v18 = vld [vmem:[%s6051_s3] sm:$0xff] }
 0x78e   :  { %v1877_v60 = vpop.f32.mrf.mxu0  ;;  %6389 = vst [vmem:[#allocation82_spill] sm:$0xff] %v5299_v18  ;;  %v6393_v32 = vld [vmem:[#allocation36_spill] sm:$0xff] }
 0x78f   :  { %v1887_v34 = vadd.f32 %v1877_v60, %v6387_v11  ;;  %v1918_v3 = vmul.f32 %v3269_v36, %v1914_v22  ;;  %v6394_v60 = vld [vmem:[#allocation49_spill] sm:$0xff]  ;;  %v6396_v11 = vld [vmem:[#allocation27_spill] sm:$0xff] }
 0x791   :  { %v1891_v2 = vmul.f32 0.5, %v1887_v34 }
 0x793   :  { %vm1895_vm6 = vcmp.ge.f32.partialorder %v1891_v2, 0.5 }
 0x794   :  { %v3282_v49 = vsel %vm1895_vm6, 1.0, %v6215_v5  ;;  %v5291_v21 = vsel %vm1895_vm6, 0.0, %v1891_v2 }
 0x795   :  { %6388 = vst [vmem:[#allocation80_spill] sm:$0xff] %v5291_v21  ;;  %v1915_v62 = vmul.f32 %v3282_v49, %v3274_v63  ;;  %v6397_v63 = vld [vmem:[#allocation38_spill] sm:$0xff] }
 0x797   :  { %v1919_v16 = vmul.f32 %v3270_v33, %v1915_v62  ;;  %v6399_v33 = vld [vmem:[#allocation50_spill] sm:$0xff] }
 0x799   :  { %1948 = vmatpush.msrb.mxu2 %v1919_v16 }
 0x79b   :  { %1949 = vmatpush.msrb.mxu2 %v1918_v3 }
 0x79d   :  { %1950 = vmatpush.msrb.mxu2 %v1917_v44 }
 0x79f   :  { %1951 = vmatpush.msrb.mxu2 %v1916_v37  ;;  %v5325_v37 = vld [vmem:[%s6051_s3 + $0x18] sm:$0xff] }
 0x7a0   :  { %3283 = vmatmul.msk.f32.vlgmr.msrb.gmra.mxu2 %vm285_vm4, %v5299_v18  ;;  %6392 = vst [vmem:[#allocation22_spill] sm:$0xff] %v5325_v37 }
 0x7a1   :  { %2204 = vmatpush.bf16.msra.mxu2 %v5085_v26 }
 0x7a5   :  { %2205 = vmatpush.bf16.msra.mxu2 %v5094_v24 }
 0x7a8   :  { %3284 = vmatmul.msk.f32.gmra.mxu2 %vm285_vm4, %v5307_v35 }
 0x7a9   :  { %2206 = vmatpush.bf16.msra.mxu2 %v5109_v45 }
 0x7ad   :  { %2207 = vmatpush.bf16.msra.mxu2 %v5118_v9 }
 0x7b0   :  { %3285 = vmatmul.msk.f32.gmra.mxu2 %vm285_vm4, %v5316_v40 }
 0x7b1   :  { %2208 = vmatpush.bf16.msra.mxu2 %v5133_v58 }
 0x7b5   :  { %2209 = vmatpush.bf16.msra.mxu2 %v5142_v39 }
 0x7b8   :  { %3286 = vmatmul.msk.f32.gmra.mxu2 %vm285_vm4, %v5325_v37  ;;  %v6401_v37 = vld [vmem:[#allocation29_spill] sm:$0xff] }
 0x7b9   :  { %2210 = vmatpush.bf16.msra.mxu2 %v5157_v47 }
 0x7bd   :  { %2211 = vmatpush.bf16.msra.mxu2 %v5166_v7 }
 0x823   :  { %v1953_v44 = vpop.f32.mrf.mxu2 }
 0x824   :  { %v1954_v22 = vadd.f32 %v1953_v44, %v6393_v32 }
 0x826   :  { %v5334_v36 = vadd.f32 %v6394_v60, %v1954_v22  ;;  %v6402_v60 = vld [vmem:[#allocation41_spill] sm:$0xff] }
 0x828   :  { %6395 = vst [vmem:[#allocation45_spill] sm:$0xff] %v5334_v36  ;;  %v1973_v34 = vadd.f32 %v5334_v36, %v6396_v11 }
 0x82a   :  { %v1977_v3 = vmul.f32 0.5, %v1973_v34 }
 0x82b   :  { %v1956_v2 = vpop.f32.mrf.mxu2 }
 0x82c   :  { %v1957_v49 = vadd.f32 %v1956_v2, %v6397_v63  ;;  %vm1981_vm5 = vcmp.ge.f32.partialorder %v1977_v3, 1.0 }
 0x82d   :  { %v5340_v62 = vsel %vm1981_vm5, 0.0, %v1977_v3  ;;  %v5354_v34 = vsel %vm1981_vm5, 1.0, %v6215_v5  ;;  %v5427_v3 = vld [vmem:[%s6053_s5 + $0x20] sm:$0xff] }
 0x82e   :  { %6398 = vst [vmem:[#allocation28_spill] sm:$0xff] %v5340_v62  ;;  %v5343_v16 = vadd.f32 %v6399_v33, %v1957_v49  ;;  %v6404_v49 = vld [vmem:[#allocation48_spill] sm:$0xff]  ;;  %v6407_v62 = vld [vmem:[#allocation35_spill] sm:$0xff] }
 0x82f   :  { %6417 = vst [vmem:[#allocation48_spill] sm:$0xff] %v5427_v3 }
 0x830   :  { %6400 = vst [vmem:[#allocation30_spill] sm:$0xff] %v5343_v16  ;;  %v1974_v44 = vadd.f32 %v5343_v16, %v6401_v37 }
 0x832   :  { %v1978_v32 = vmul.f32 0.5, %v1974_v44  ;;  %v6406_v44 = vld [vmem:[#allocation31_spill] sm:$0xff] }
 0x833   :  { %v1959_v22 = vpop.f32.mrf.mxu2 }
 0x834   :  { %v1960_v40 = vadd.f32 %v1959_v22, %v6402_v60  ;;  %vm1982_vm8 = vcmp.ge.f32.partialorder %v1978_v32, 1.0 }
 0x835   :  { %v5350_v11 = vsel %vm1982_vm8, 1.0, %v6215_v5  ;;  %v5357_v2 = vsel %vm1982_vm8, 0.0, %v1978_v32  ;;  %v5420_v32 = vld [vmem:[%s6053_s5 + $0x18] sm:$0xff] }
 0x836   :  { %6403 = vst [vmem:[#allocation32_spill] sm:$0xff] %v5357_v2  ;;  %v5360_v33 = vadd.f32 %v6404_v49, %v1960_v40  ;;  %v3448_v37 = vpack.c.bf16 %v5350_v11, %v5354_v34  ;;  %v6409_v2 = vld [vmem:[#allocation47_spill] sm:$0xff]  ;;  %v6411_v49 = vld [vmem:[#allocation33_spill] sm:$0xff] }
 0x837   :  { %6416 = vst [vmem:[#allocation29_spill] sm:$0xff] %v5420_v32 }
 0x838   :  { %6405 = vst [vmem:[#allocation26_spill] sm:$0xff] %v5360_v33  ;;  %v1975_v22 = vadd.f32 %v5360_v33, %v6406_v44 }
 0x839   :  { %3462 = vst [vmem:[%s6052_s11 + $0x20] sm:$0xff] %v3448_v37  }
 0x83a   :  { %v1979_v60 = vmul.f32 0.5, %v1975_v22  ;;  %v5441_v22 = vld [vmem:[%s6053_s5 + $0x30] sm:$0xff] }
 0x83b   :  { %v1962_v63 = vpop.f32.mrf.mxu2  ;;  %6419 = vst [vmem:[#allocation47_spill] sm:$0xff] %v5441_v22 }
 0x83c   :  { %v1963_v35 = vadd.f32 %v1962_v63, %v6407_v62  ;;  %vm1983_vm1 = vcmp.ge.f32.partialorder %v1979_v60, 1.0 }
 0x83d   :  { %v5370_v18 = vsel %vm1983_vm1, 0.0, %v1979_v60  ;;  %v5379_v44 = vsel %vm1983_vm1, 1.0, %v6215_v5 }
 0x83e   :  { %6408 = vst [vmem:[#allocation37_spill] sm:$0xff] %v5370_v18  ;;  %v5373_v40 = vadd.f32 %v6409_v2, %v1963_v35  ;;  %v5413_v35 = vld [vmem:[%s6053_s5 + $0x10] sm:$0xff]  ;;  %v5434_v2 = vld [vmem:[%s6053_s5 + $0x28] sm:$0xff]  ;;  %v6429_v18 = vld [vmem:[#allocation39_spill] sm:$0xff] }
 0x83f   :  { %6415 = vst [vmem:[#allocation50_spill] sm:$0xff] %v5413_v35 }
 0x840   :  { %6410 = vst [vmem:[#allocation40_spill] sm:$0xff] %v5373_v40  ;;  %v1976_v21 = vadd.f32 %v5373_v40, %v6411_v49  ;;  %v5448_v49 = vld [vmem:[%s6053_s5 + $0x38] sm:$0xff] }
 0x841   :  { %6418 = vst [vmem:[#allocation31_spill] sm:$0xff] %v5434_v2 }
 0x842   :  { %v1980_v48 = vmul.f32 0.5, %v1976_v21  ;;  %v5397_v21 = vld [vmem:[%s6053_s5] sm:$0xff]  ;;  %6420 = vst [vmem:[#allocation33_spill] sm:$0xff] %v5448_v49 }
 0x843   :  { %6413 = vst [vmem:[#allocation49_spill] sm:$0xff] %v5397_v21 }
 0x844   :  { %vm1984_vm0 = vcmp.ge.f32.partialorder %v1980_v48, 1.0 }
 0x845   :  { %3291 = vmatpush.msk.msrb.mxu0 %vm1984_vm0, %v6309_v50  ;;  %v5382_v37 = vsel %vm1984_vm0, 1.0, %v6215_v5  ;;  %v5384_v63 = vsel %vm1984_vm0, 0.0, %v1980_v48  ;;  %v5406_v48 = vld [vmem:[%s6053_s5 + $0x8] sm:$0xff] }
 0x846   :  { %6412 = vst [vmem:[#allocation43_spill] sm:$0xff] %v5384_v63  ;;  %v3451_v60 = vpack.c.bf16 %v5382_v37, %v5379_v44  ;;  %v6428_v63 = vld [vmem:[#allocation66_spill] sm:$0xff] }
 0x847   :  { %3292 = vmatpush.msk.msrb.mxu0 %vm1983_vm1, %v6309_v50  ;;  %6414 = vst [vmem:[#allocation27_spill] sm:$0xff] %v5406_v48 }
 0x848   :  { %3463 = vst [vmem:[%s6052_s11 + $0x28] sm:$0xff] %v3451_v60   ;;  %v5455_v60 = vld [vmem:[%s6053_s5 + $0x40] sm:$0xff] }
 0x849   :  { %3293 = vmatpush.msk.msrb.mxu0 %vm1982_vm8, %v6309_v50  ;;  %6421 = vst [vmem:[#allocation83_spill] sm:$0xff] %v5455_v60 }
 0x84b   :  { %3294 = vmatpush.msk.msrb.mxu0 %vm1981_vm5, %v6309_v50 }
 0x84c   :  { %3295 = vmatmul.msk.f32.vlgmr.msrb.gmra.mxu0 %vm285_vm4, %v5397_v21 }
 0x854   :  { %3296 = vmatmul.msk.f32.gmra.mxu0 %vm285_vm4, %v5406_v48 }
 0x85c   :  { %3297 = vmatmul.msk.f32.gmra.mxu0 %vm285_vm4, %v5413_v35 }
 0x864   :  { %3298 = vmatmul.msk.f32.gmra.mxu0 %vm285_vm4, %v5420_v32 }
 0x86c   :  { %3299 = vmatmul.msk.f32.gmra.mxu0 %vm285_vm4, %v5427_v3  ;;  %v6425_v3 = vld [vmem:[#allocation65_spill] sm:$0xff] }
 0x874   :  { %3300 = vmatmul.msk.f32.gmra.mxu0 %vm285_vm4, %v5434_v2 }
 0x87c   :  { %3301 = vmatmul.msk.f32.gmra.mxu0 %vm285_vm4, %v5441_v22  ;;  %v5462_v22 = vld [vmem:[%s6053_s5 + $0x48] sm:$0xff] }
 0x87d   :  { %6422 = vst [vmem:[#allocation84_spill] sm:$0xff] %v5462_v22 }
 0x884   :  { %3302 = vmatmul.msk.f32.gmra.mxu0 %vm285_vm4, %v5448_v49  ;;  %v5469_v49 = vld [vmem:[%s6053_s5 + $0x50] sm:$0xff] }
 0x885   :  { %6423 = vst [vmem:[#allocation85_spill] sm:$0xff] %v5469_v49 }
 0x88c   :  { %3303 = vmatmul.msk.f32.gmra.mxu0 %vm285_vm4, %v5455_v60  ;;  %v5476_v60 = vld [vmem:[%s6053_s5 + $0x58] sm:$0xff] }
 0x88d   :  { %6424 = vst [vmem:[#allocation86_spill] sm:$0xff] %v5476_v60 }
 0x894   :  { %3304 = vmatmul.msk.f32.gmra.mxu0 %vm285_vm4, %v5462_v22  ;;  %v6426_v22 = vld [vmem:[#allocation34_spill] sm:$0xff] }
 0x89c   :  { %3305 = vmatmul.msk.f32.gmra.mxu0 %vm285_vm4, %v5469_v49 }
 0x8a4   :  { %3306 = vmatmul.msk.f32.gmra.mxu0 %vm285_vm4, %v5476_v60 }
 0x8c9   :  { %v2066_v2 = vpop.f32.mrf.mxu0 }
 0x8ca   :  { %v2067_v32 = vadd.f32 %v2066_v2, %v6425_v3  ;;  %v6432_v3 = vld [vmem:[#allocation78_spill] sm:$0xff] }
 0x8cc   :  { %v2106_v35 = vadd.f32 %v2067_v32, %v6426_v22  ;;  %v6431_v32 = vld [vmem:[#allocation67_spill] sm:$0xff] }
 0x8ce   :  { %v5482_v48 = vmul.f32 0.5, %v2106_v35 }
 0x8d0   :  { %vm2114_vm13 = vcmp.ge.f32.partialorder %v5482_v48, 1.0 }
 0x8d1   :  { %v2069_v21 = vpop.f32.mrf.mxu0  ;;  %v5488_v49 = vsel %vm2114_vm13, 0.0, %v5482_v48 }
 0x8d2   :  { %6427 = vst [vmem:[#allocation34_spill] sm:$0xff] %v5488_v49  ;;  %v2070_v62 = vadd.f32 %v2069_v21, %v6428_v63  ;;  %v6435_v63 = vld [vmem:[#allocation42_spill] sm:$0xff] }
 0x8d4   :  { %v2107_v8 = vadd.f32 %v2070_v62, %v6429_v18  ;;  %v6434_v18 = vld [vmem:[#allocation60_spill] sm:$0xff] }
 0x8d6   :  { %v5492_v60 = vmul.f32 0.5, %v2107_v8 }
 0x8d8   :  { %vm2115_vm15 = vcmp.ge.f32.partialorder %v5492_v60, 1.0 }
 0x8d9   :  { %v2072_v2 = vpop.f32.mrf.mxu0  ;;  %v5498_v35 = vsel %vm2115_vm15, 0.0, %v5492_v60  ;;  %v3308_v48 = vsel %vm2115_vm15, 1.0, %v6215_v5 }
 0x8da   :  { %6430 = vst [vmem:[#allocation39_spill] sm:$0xff] %v5498_v35  ;;  %v2073_v22 = vadd.f32 %v2072_v2, %v6431_v32  ;;  %v6438_v32 = vld [vmem:[#allocation77_spill] sm:$0xff] }
 0x8dc   :  { %v2108_v53 = vadd.f32 %v2073_v22, %v6432_v3  ;;  %v6437_v3 = vld [vmem:[#allocation71_spill] sm:$0xff] }
 0x8de   :  { %v5502_v40 = vmul.f32 0.5, %v2108_v53 }
 0x8e0   :  { %vm2116_vm10 = vcmp.ge.f32.partialorder %v5502_v40, 1.0 }
 0x8e1   :  { %v2075_v21 = vpop.f32.mrf.mxu0  ;;  %v5508_v8 = vsel %vm2116_vm10, 0.0, %v5502_v40  ;;  %v3309_v60 = vsel %vm2116_vm10, 1.0, %v6215_v5 }
 0x8e2   :  { %6433 = vst [vmem:[#allocation78_spill] sm:$0xff] %v5508_v8  ;;  %v2076_v62 = vadd.f32 %v2075_v21, %v6434_v18  ;;  %v6441_v18 = vld [vmem:[#allocation44_spill] sm:$0xff] }
 0x8e4   :  { %v2109_v49 = vadd.f32 %v2076_v62, %v6435_v63 }
 0x8e6   :  { %v5512_v20 = vmul.f32 0.5, %v2109_v49  ;;  %v6440_v49 = vld [vmem:[#allocation62_spill] sm:$0xff] }
 0x8e8   :  { %vm2117_vm2 = vcmp.ge.f32.partialorder %v5512_v20, 1.0 }
 0x8e9   :  { %v2078_v2 = vpop.f32.mrf.mxu0  ;;  %v5518_v53 = vsel %vm2117_vm2, 0.0, %v5512_v20 }
 0x8ea   :  { %6436 = vst [vmem:[#allocation42_spill] sm:$0xff] %v5518_v53  ;;  %v2079_v22 = vadd.f32 %v2078_v2, %v6437_v3  ;;  %v6444_v3 = vld [vmem:[#allocation76_spill] sm:$0xff] }
 0x8ec   :  { %v2138_v35 = vadd.f32 %v2079_v22, %v6438_v32  ;;  %v6443_v32 = vld [vmem:[#allocation63_spill] sm:$0xff] }
 0x8ee   :  { %v5522_v33 = vmul.f32 0.5, %v2138_v35 }
 0x8f0   :  { %vm2146_vm3 = vcmp.ge.f32.partialorder %v5522_v33, 1.0 }
 0x8f1   :  { %v2081_v21 = vpop.f32.mrf.mxu0  ;;  %v5528_v63 = vsel %vm2146_vm3, 0.0, %v5522_v33 }
 0x8f2   :  { %6439 = vst [vmem:[#allocation77_spill] sm:$0xff] %v5528_v63  ;;  %v2082_v62 = vadd.f32 %v2081_v21, %v6440_v49  ;;  %v6447_v49 = vld [vmem:[#allocation46_spill] sm:$0xff] }
 0x8f4   :  { %v2139_v8 = vadd.f32 %v2082_v62, %v6441_v18  ;;  %v6446_v18 = vld [vmem:[#allocation64_spill] sm:$0xff] }
 0x8f6   :  { %v5532_v41 = vmul.f32 0.5, %v2139_v8 }
 0x8f8   :  { %vm2147_vm7 = vcmp.ge.f32.partialorder %v5532_v41, 1.0 }
 0x8f9   :  { %v2084_v2 = vpop.f32.mrf.mxu0  ;;  %v5538_v35 = vsel %vm2147_vm7, 0.0, %v5532_v41  ;;  %v3312_v33 = vsel %vm2147_vm7, 1.0, %v6215_v5 }
 0x8fa   :  { %6442 = vst [vmem:[#allocation44_spill] sm:$0xff] %v5538_v35  ;;  %v2085_v22 = vadd.f32 %v2084_v2, %v6443_v32  ;;  %v6450_v32 = vld [vmem:[#allocation51_spill] sm:$0xff] }
 0x8fc   :  { %v2140_v53 = vadd.f32 %v2085_v22, %v6444_v3  ;;  %v6449_v3 = vld [vmem:[#allocation59_spill] sm:$0xff] }
 0x8fe   :  { %v5542_v16 = vmul.f32 0.5, %v2140_v53 }
 0x900   :  { %vm2148_vm6 = vcmp.ge.f32.partialorder %v5542_v16, 1.0 }
 0x901   :  { %v2087_v21 = vpop.f32.mrf.mxu0  ;;  %v5548_v8 = vsel %vm2148_vm6, 0.0, %v5542_v16  ;;  %v3313_v41 = vsel %vm2148_vm6, 1.0, %v6215_v5 }
 0x902   :  { %6445 = vst [vmem:[#allocation76_spill] sm:$0xff] %v5548_v8  ;;  %v2088_v62 = vadd.f32 %v2087_v21, %v6446_v18  ;;  %v1645_v21 = vsel %vm1641_vm9, 0.0, %v4896_v10  ;;  %v6455_v8 = vld [vmem:[#allocation61_spill] sm:$0xff] }
 0x904   :  { %v2141_v63 = vadd.f32 %v2088_v62, %v6447_v49  ;;  %v1644_v49 = vsel %vm1640_vm11, 0.0, %v4898_v15  ;;  %v5576_v62 = vld [vmem:[%s6044_s0 + $0x70] sm:$0xff]  ;;  %v1642_v15 = vsel %vm1638_vm14, 0.0, %v4908_v27 }
 0x905   :  { %6452 = vst [vmem:[#allocation87_spill] sm:$0xff] %v5576_v62 }
 0x906   :  { %v5552_v28 = vmul.f32 0.5, %v2141_v63  ;;  %v5568_v63 = vld [vmem:[%s6044_s0 + $0x78] sm:$0xff] }
 0x907   :  { %6451 = vst [vmem:[#allocation51_spill] sm:$0xff] %v5568_v63  ;;  %v2338_v10 = vadd.f32 %v5568_v63, %v1645_v21 }
 0x908   :  { %vm2149_vm5 = vcmp.ge.f32.partialorder %v5552_v28, 1.0 }
 0x909   :  { %v2090_v2 = vpop.f32.mrf.mxu0  ;;  %v5558_v53 = vsel %vm2149_vm5, 0.0, %v5552_v28  ;;  %v3314_v16 = vsel %vm2149_vm5, 1.0, %v6215_v5  ;;  %v5717_v28 = vld [vmem:[%s6054_s7] sm:$0xff] }
 0x90a   :  { %6448 = vst [vmem:[#allocation46_spill] sm:$0xff] %v5558_v53  ;;  %v2091_v22 = vadd.f32 %v2090_v2, %v6449_v3  ;;  %v5586_v2 = vld [vmem:[%s6044_s0 + $0x68] sm:$0xff]  ;;  %v5598_v3 = vmul.f32 0.5, %v2338_v10 }
 0x90b   :  { %6453 = vst [vmem:[#allocation88_spill] sm:$0xff] %v5586_v2 }
 0x90c   :  { %v2170_v35 = vadd.f32 %v2091_v22, %v6450_v32  ;;  %v2337_v32 = vadd.f32 %v5576_v62, %v1644_v49  ;;  %v5594_v22 = vld [vmem:[%s6044_s0 + $0x60] sm:$0xff]  ;;  %vm2346_vm11 = vcmp.ge.f32.partialorder %v5598_v3, 1.0  ;;  %v6479_v3 = vld [vmem:[#allocation30_spill] sm:$0xff] }
 0x90d   :  { %v2335_v21 = vadd.f32 %v5594_v22, %v1642_v15  ;;  %3343 = vmatpush.msk.msrb.mxu2 %vm2346_vm11, %v6309_v50 }
 0x90e   :  { %v2174_v36 = vmul.f32 0.5, %v2170_v35  ;;  %v1643_v35 = vsel %vm1639_vm12, 0.0, %v4900_v13  ;;  %v5600_v53 = vmul.f32 0.5, %v2337_v32 }
 0x90f   :  { %v2336_v13 = vadd.f32 %v5586_v2, %v1643_v35  ;;  %v5610_v62 = vmul.f32 0.5, %v2335_v21 }
 0x910   :  { %vm2178_vm9 = vcmp.ge.f32.partialorder %v2174_v36, 1.0  ;;  %vm2345_vm12 = vcmp.ge.f32.partialorder %v5600_v53, 1.0 }
 0x911   :  { %v2093_v49 = vpop.f32.mrf.mxu0  ;;  %v5603_v18 = vsel %vm2178_vm9, 0.0, %v2174_v36  ;;  %v5606_v63 = vmul.f32 0.5, %v2336_v13  ;;  %3344 = vmatpush.msk.msrb.mxu2 %vm2345_vm12, %v6309_v50  ;;  %v3315_v32 = vsel %vm2178_vm9, 1.0, %v6215_v5  ;;  %vm2343_vm8 = vcmp.ge.f32.partialorder %v5610_v62, 1.0 }
 0x912   :  { %6454 = vst [vmem:[#allocation89_spill] sm:$0xff] %v5603_v18  ;;  %v2094_v27 = vadd.f32 %v2093_v49, %v6455_v8  ;;  %v2198_v21 = vmul.f32 %v3315_v32, %v5354_v34 }
 0x913   :  { %vm2344_vm14 = vcmp.ge.f32.partialorder %v5606_v63, 1.0 }
 0x914   :  { %v2171_v35 = vadd.f32 %v2094_v27, %v4925_v14  ;;  %3345 = vmatpush.msk.msrb.mxu2 %vm2344_vm14, %v6309_v50 }
 0x916   :  { %v2175_v10 = vmul.f32 0.5, %v2171_v35  ;;  %3346 = vmatpush.msk.msrb.mxu2 %vm2343_vm8, %v6309_v50 }
 0x918   :  { %vm2179_vm1 = vcmp.ge.f32.partialorder %v2175_v10, 1.0 }
 0x919   :  { %v3316_v14 = vsel %vm2179_vm1, 1.0, %v6215_v5  ;;  %v2096_v15 = vpop.f32.mrf.mxu0  ;;  %v5627_v13 = vsel %vm2179_vm1, 0.0, %v2175_v10 }
 0x91a   :  { %v2199_v49 = vmul.f32 %v3316_v14, %v5350_v11  ;;  %v2097_v27 = vadd.f32 %v2096_v15, %v4222_v54 }
 0x91c   :  { %v2202_v36 = vpack.c.bf16 %v2199_v49, %v2198_v21  ;;  %v2172_v35 = vadd.f32 %v2097_v27, %v4934_v55  ;;  %v3311_v27 = vsel %vm2146_vm3, 1.0, %v6215_v5 }
 0x91e   :  { %v2176_v8 = vmul.f32 0.5, %v2172_v35  ;;  %2212 = vmatmul.bf16.vlgmr.msra.gmra.mxu2 %v2202_v36 }
 0x920   :  { %vm2180_vm0 = vcmp.ge.f32.partialorder %v2176_v8, 1.0 }
 0x921   :  { %v2099_v18 = vpop.f32.mrf.mxu0  ;;  %v5636_v2 = vsel %vm2180_vm0, 0.0, %v2176_v8  ;;  %v3317_v32 = vsel %vm2180_vm0, 1.0, %v6215_v5 }
 0x922   :  { %v2100_v10 = vadd.f32 %v2099_v18, %v4228_v25  ;;  %v2200_v55 = vmul.f32 %v3317_v32, %v5379_v44  ;;  %v6457_v44 = vld [vmem:[#allocation53_spill] sm:$0xff] }
 0x924   :  { %v2173_v34 = vadd.f32 %v2100_v10, %v4940_v0  ;;  %v6456_v0 = vld [vmem:[#allocation52_spill] sm:$0xff] }
 0x926   :  { %v2177_v11 = vmul.f32 0.5, %v2173_v34 }
 0x928   :  { %vm2181_vm9 = vcmp.ge.f32.partialorder %v2177_v11, 1.0 }
 0x929   :  { %v3318_v14 = vsel %vm2181_vm9, 1.0, %v6215_v5  ;;  %v5642_v15 = vsel %vm2181_vm9, 0.0, %v2177_v11  ;;  %v3307_v11 = vsel %vm2114_vm13, 1.0, %v6215_v5 }
 0x92a   :  { %v2201_v21 = vmul.f32 %v3318_v14, %v5382_v37  ;;  %v6458_v37 = vld [vmem:[#allocation54_spill] sm:$0xff] }
 0x92c   :  { %v2203_v49 = vpack.c.bf16 %v2201_v21, %v2200_v55 }
 0x92e   :  { %2217 = vmatmul.bf16.gmra.mxu2 %v2203_v49 }
 0x93e   :  { %3347 = vmatmul.msk.f32.vlgmr.msrb.gmra.mxu2 %vm285_vm4, %v4947_v56  ;;  %v6459_v56 = vld [vmem:[#allocation55_spill] sm:$0xff] }
 0x946   :  { %3348 = vmatmul.msk.f32.gmra.mxu2 %vm285_vm4, %v4954_v31  ;;  %v6460_v31 = vld [vmem:[#allocation56_spill] sm:$0xff] }
 0x94e   :  { %3349 = vmatmul.msk.f32.gmra.mxu2 %vm285_vm4, %v4961_v61  ;;  %v6461_v61 = vld [vmem:[#allocation57_spill] sm:$0xff] }
 0x956   :  { %3350 = vmatmul.msk.f32.gmra.mxu2 %vm285_vm4, %v4968_v6  ;;  %v6462_v6 = vld [vmem:[#allocation58_spill] sm:$0xff] }
 0x95e   :  { %3351 = vmatmul.msk.f32.gmra.mxu2 %vm285_vm4, %v4975_v23 }
 0x966   :  { %3352 = vmatmul.msk.f32.gmra.mxu2 %vm285_vm4, %v6456_v0 }
 0x96e   :  { %3353 = vmatmul.msk.f32.gmra.mxu2 %vm285_vm4, %v6457_v44 }
 0x976   :  { %3354 = vmatmul.msk.f32.gmra.mxu2 %vm285_vm4, %v6458_v37 }
 0x97e   :  { %3355 = vmatmul.msk.f32.gmra.mxu2 %vm285_vm4, %v6459_v56 }
 0x986   :  { %3356 = vmatmul.msk.f32.gmra.mxu2 %vm285_vm4, %v6460_v31 }
 0x98e   :  { %3357 = vmatmul.msk.f32.gmra.mxu2 %vm285_vm4, %v6461_v61 }
 0x996   :  { %3358 = vmatmul.msk.f32.gmra.mxu2 %vm285_vm4, %v6462_v6 }
 0x9a1   :  { %v2213_v23 = vpop.f32.mrf.mxu2 }
 0x9a2   :  { %v2227_v8 = vadd.f32 %v2213_v23, %v5033_v42 }
 0x9a4   :  { %v2231_v18 = vmul.f32 0.5, %v2227_v8 }
 0x9a6   :  { %vm2235_vm1 = vcmp.ge.f32.partialorder %v2231_v18, 0.5 }
 0x9a7   :  { %v3319_v36 = vsel %vm2235_vm1, 1.0, %v6215_v5  ;;  %v5675_v35 = vsel %vm2235_vm1, 0.0, %v2231_v18 }
 0x9a8   :  { %v2255_v10 = vmul.f32 %v3319_v36, %v3311_v27 }
 0x9a9   :  { %v2215_v34 = vpop.f32.mrf.mxu2 }
 0x9aa   :  { %v2228_v32 = vadd.f32 %v2215_v34, %v5043_v4  ;;  %v2259_v14 = vmul.f32 %v3307_v11, %v2255_v10  ;;  %v3310_v10 = vsel %vm2117_vm2, 1.0, %v6215_v5 }
 0x9ac   :  { %v2232_v42 = vmul.f32 0.5, %v2228_v32 }
 0x9ae   :  { %vm2236_vm0 = vcmp.ge.f32.partialorder %v2232_v42, 0.5 }
 0x9af   :  { %v3320_v55 = vsel %vm2236_vm0, 1.0, %v6215_v5  ;;  %v5685_v21 = vsel %vm2236_vm0, 0.0, %v2232_v42 }
 0x9b0   :  { %v2256_v49 = vmul.f32 %v3320_v55, %v3312_v33 }
 0x9b1   :  { %v2218_v0 = vpop.f32.mrf.mxu2 }
 0x9b2   :  { %v2229_v44 = vadd.f32 %v2218_v0, %v5053_v38  ;;  %v2260_v4 = vmul.f32 %v3308_v48, %v2256_v49  ;;  %v6466_v0 = vld [vmem:[#allocation69_spill] sm:$0xff] }
 0x9b4   :  { %v2233_v37 = vmul.f32 0.5, %v2229_v44  ;;  %v6467_v44 = vld [vmem:[#allocation16_spill] sm:$0xff] }
 0x9b6   :  { %vm2237_vm13 = vcmp.ge.f32.partialorder %v2233_v37, 0.5 }
 0x9b7   :  { %v3321_v56 = vsel %vm2237_vm13, 1.0, %v6215_v5  ;;  %v5695_v31 = vsel %vm2237_vm13, 0.0, %v2233_v37  ;;  %v6468_v37 = vld [vmem:[#allocation72_spill] sm:$0xff] }
 0x9b8   :  { %v2257_v61 = vmul.f32 %v3321_v56, %v3313_v41  ;;  %v6469_v56 = vld [vmem:[#allocation17_spill] sm:$0xff] }
 0x9b9   :  { %v2220_v6 = vpop.f32.mrf.mxu2 }
 0x9ba   :  { %v2230_v23 = vadd.f32 %v2220_v6, %v5063_v46  ;;  %v2261_v38 = vmul.f32 %v3309_v60, %v2257_v61  ;;  %v6470_v6 = vld [vmem:[#allocation70_spill] sm:$0xff] }
 0x9bc   :  { %v2234_v8 = vmul.f32 0.5, %v2230_v23 }
 0x9be   :  { %vm2238_vm15 = vcmp.ge.f32.partialorder %v2234_v8, 0.5 }
 0x9bf   :  { %v3322_v18 = vsel %vm2238_vm15, 1.0, %v6215_v5  ;;  %v5705_v27 = vsel %vm2238_vm15, 0.0, %v2234_v8 }
 0x9c0   :  { %v2258_v36 = vmul.f32 %v3322_v18, %v3314_v16  ;;  %v6472_v16 = vld [vmem:[#allocation73_spill] sm:$0xff] }
 0x9c1   :  { %v2428_v40 = vpop.f32.mrf.mxu2 }
 0x9c2   :  { %v2262_v34 = vmul.f32 %v3310_v10, %v2258_v36  ;;  %v2429_v46 = vadd.f32 %v2428_v40, %v3803_v59  ;;  %v6474_v10 = vld [vmem:[#allocation74_spill] sm:$0xff] }
 0x9c4   :  { %v5712_v11 = vadd.f32 %v2429_v46, %v5076_v43  ;;  %2291 = vmatpush.msra.mxu3 %v2262_v34  ;;  %v5729_v43 = vld [vmem:[%s6054_s7 + $0x8] sm:$0xff]  ;;  %v3339_v46 = vsel %vm2343_vm8, 1.0, %v6215_v5 }
 0x9c6   :  { %2292 = vmatpush.msra.mxu3 %v2261_v38  ;;  %v6471_v38 = vld [vmem:[#allocation12_spill] sm:$0xff] }
 0x9c8   :  { %2293 = vmatpush.msra.mxu3 %v2260_v4 }
 0x9c9   :  { %v2431_v32 = vpop.f32.mrf.mxu2 }
 0x9ca   :  { %v2432_v42 = vadd.f32 %v2431_v32, %v3811_v1  ;;  %2294 = vmatpush.msra.mxu3 %v2259_v14 }
 0x9cb   :  { %3323 = vmatmul.msk.f32.vlgmr.msra.gmra.mxu3 %vm285_vm4, %v5717_v28 }
 0x9cc   :  { %v5723_v59 = vadd.f32 %v2432_v42, %v5100_v51  ;;  %2566 = vmatpush.bf16.msrb.mxu3 %v5085_v26  ;;  %v5742_v26 = vld [vmem:[%s6054_s7 + $0x10] sm:$0xff] }
 0x9d0   :  { %2567 = vmatpush.bf16.msrb.mxu3 %v5094_v24  ;;  %v6463_v24 = vld [vmem:[#allocation13_spill] sm:$0xff] }
 0x9d1   :  { %v2434_v20 = vpop.f32.mrf.mxu2 }
 0x9d2   :  { %v2435_v33 = vadd.f32 %v2434_v20, %v3822_v19  ;;  %v6464_v19 = vld [vmem:[#allocation68_spill] sm:$0xff] }
 0x9d3   :  { %3324 = vmatmul.msk.f32.gmra.mxu3 %vm285_vm4, %v5729_v43 }
 0x9d4   :  { %v5736_v1 = vadd.f32 %v2435_v33, %v5124_v17  ;;  %2568 = vmatpush.bf16.msrb.mxu3 %v5109_v45  ;;  %v5755_v45 = vld [vmem:[%s6054_s7 + $0x18] sm:$0xff] }
 0x9d5   :  { %v6475_v33 = vld [vmem:[#allocation15_spill] sm:$0xff] }
 0x9d8   :  { %2569 = vmatpush.bf16.msrb.mxu3 %v5118_v9  ;;  %v6465_v9 = vld [vmem:[#allocation19_spill] sm:$0xff] }
 0x9d9   :  { %v2437_v51 = vpop.f32.mrf.mxu2 }
 0x9da   :  { %v2438_v14 = vadd.f32 %v2437_v51, %v6463_v24 }
 0x9db   :  { %3325 = vmatmul.msk.f32.gmra.mxu3 %vm285_vm4, %v5742_v26 }
 0x9dc   :  { %v5749_v55 = vadd.f32 %v2438_v14, %v6464_v19  ;;  %2570 = vmatpush.bf16.msrb.mxu3 %v5133_v58  ;;  %v3340_v19 = vsel %vm2344_vm14, 1.0, %v6215_v5 }
 0x9e0   :  { %2571 = vmatpush.bf16.msrb.mxu3 %v5142_v39 }
 0x9e1   :  { %v2440_v17 = vpop.f32.mrf.mxu2 }
 0x9e2   :  { %v2441_v49 = vadd.f32 %v2440_v17, %v6465_v9 }
 0x9e3   :  { %3326 = vmatmul.msk.f32.gmra.mxu3 %vm285_vm4, %v5755_v45 }
 0x9e4   :  { %v5762_v48 = vadd.f32 %v2441_v49, %v6466_v0  ;;  %2572 = vmatpush.bf16.msrb.mxu3 %v5157_v47 }
 0x9e8   :  { %2573 = vmatpush.bf16.msrb.mxu3 %v5166_v7  ;;  %v6473_v7 = vld [vmem:[#allocation14_spill] sm:$0xff] }
 0x9e9   :  { %v2443_v58 = vpop.f32.mrf.mxu2 }
 0x9ea   :  { %v2444_v4 = vadd.f32 %v2443_v58, %v6467_v44 }
 0x9ec   :  { %v5768_v41 = vadd.f32 %v2444_v4, %v6468_v37 }
 0x9f1   :  { %v2446_v39 = vpop.f32.mrf.mxu2 }
 0x9f2   :  { %v2447_v61 = vadd.f32 %v2446_v39, %v6469_v56  ;;  %v6476_v39 = vld [vmem:[#allocation18_spill] sm:$0xff] }
 0x9f4   :  { %v5772_v60 = vadd.f32 %v2447_v61, %v6470_v6 }
 0x9f9   :  { %v2449_v23 = vpop.f32.mrf.mxu2 }
 0x9fa   :  { %v2450_v8 = vadd.f32 %v2449_v23, %v6471_v38 }
 0x9fc   :  { %v5776_v18 = vadd.f32 %v2450_v8, %v6472_v16  ;;  %v6477_v16 = vld [vmem:[#allocation45_spill] sm:$0xff] }
 0xa01   :  { %v2452_v47 = vpop.f32.mrf.mxu2 }
 0xa02   :  { %v2453_v36 = vadd.f32 %v2452_v47, %v6473_v7  ;;  %v6478_v7 = vld [vmem:[#allocation23_spill] sm:$0xff] }
 0xa04   :  { %v2532_v40 = vadd.f32 %v2453_v36, %v6474_v10 }
 0xa06   :  { %v2536_v34 = vmul.f32 0.5, %v2532_v40 }
 0xa08   :  { %vm2540_vm10 = vcmp.ge.f32.partialorder %v2536_v34, 1.0  ;;  %v6480_v34 = vld [vmem:[#allocation24_spill] sm:$0xff] }
 0xa09   :  { %v3367_v32 = vsel %vm2540_vm10, 1.0, %v6215_v5  ;;  %v2455_v42 = vpop.f32.mrf.mxu2 }
 0xa0a   :  { %v2560_v20 = vmul.f32 %v3367_v32, %v3339_v46  ;;  %v2456_v51 = vadd.f32 %v2455_v42, %v6475_v33  ;;  %v6481_v32 = vld [vmem:[#allocation26_spill] sm:$0xff]  ;;  %v6482_v33 = vld [vmem:[#allocation25_spill] sm:$0xff] }
 0xa0c   :  { %v2533_v24 = vadd.f32 %v2456_v51, %v5218_v12  ;;  %v3341_v12 = vsel %vm2345_vm12, 1.0, %v6215_v5 }
 0xa0e   :  { %v2537_v14 = vmul.f32 0.5, %v2533_v24  ;;  %v6483_v24 = vld [vmem:[#allocation40_spill] sm:$0xff] }
 0xa10   :  { %vm2541_vm2 = vcmp.ge.f32.partialorder %v2537_v14, 1.0 }
 0xa11   :  { %v3368_v17 = vsel %vm2541_vm2, 1.0, %v6215_v5  ;;  %v2458_v9 = vpop.f32.mrf.mxu2 }
 0xa12   :  { %v2561_v62 = vmul.f32 %v3368_v17, %v3340_v19  ;;  %v2459_v49 = vadd.f32 %v2458_v9, %v3799_v57  ;;  %v3342_v57 = vsel %vm2346_vm11, 1.0, %v6215_v5  ;;  %v2504_v19 = vmul.f32 0.5, %v5762_v48 }
 0xa13   :  { %v2472_v9 = vmul.f32 0.5, %v5712_v11  ;;  %v2473_v48 = vmul.f32 0.5, %v5723_v59  ;;  %v6486_v59 = vld [vmem:[#allocation81_spill] sm:$0xff] }
 0xa14   :  { %v2564_v0 = vpack.c.bf16 %v2561_v62, %v2560_v20  ;;  %v2534_v58 = vadd.f32 %v2459_v49, %v5222_v30  ;;  %v6484_v62 = vld [vmem:[#allocation75_spill] sm:$0xff]  ;;  %vm2508_vm6 = vcmp.ge.f32.partialorder %v2504_v19, 1.0 }
 0xa15   :  { %vm2476_vm5 = vcmp.ge.f32.partialorder %v2472_v9, 1.0  ;;  %vm2477_vm14 = vcmp.ge.f32.partialorder %v2473_v48, 1.0  ;;  %v3489_v9 = vld [vmem:[%s6050_s9 + $0x30] sm:$0xff] }
 0xa16   :  { %v2538_v44 = vmul.f32 0.5, %v2534_v58  ;;  %2574 = vmatmul.bf16.vlgmr.msrb.gmra.mxu3 %v2564_v0  ;;  %v3363_v58 = vsel %vm2508_vm6, 1.0, %v6215_v5 }
 0xa18   :  { %vm2542_vm3 = vcmp.ge.f32.partialorder %v2538_v44, 1.0 }
 0xa19   :  { %v3369_v63 = vsel %vm2542_vm3, 1.0, %v6215_v5  ;;  %v2461_v4 = vpop.f32.mrf.mxu2 }
 0xa1a   :  { %v2562_v37 = vmul.f32 %v3369_v63, %v3341_v12  ;;  %v2462_v56 = vadd.f32 %v2461_v4, %v6476_v39  ;;  %v2505_v12 = vmul.f32 0.5, %v5768_v41  ;;  %v3359_v4 = vsel %vm2476_vm5, 1.0, %v6215_v5  ;;  %v6485_v39 = vld [vmem:[#allocation79_spill] sm:$0xff] }
 0xa1c   :  { %v2535_v61 = vadd.f32 %v2462_v56, %v5234_v29  ;;  %vm2509_vm12 = vcmp.ge.f32.partialorder %v2505_v12, 1.0  ;;  %v3493_v12 = vld [vmem:[%s6050_s9 + $0x10] sm:$0xff] }
 0xa1e   :  { %v2539_v6 = vmul.f32 0.5, %v2535_v61 }
 0xa20   :  { %vm2543_vm7 = vcmp.ge.f32.partialorder %v2539_v6, 1.0  ;;  %v3364_v6 = vsel %vm2509_vm12, 1.0, %v6215_v5 }
 0xa21   :  { %v3370_v30 = vsel %vm2543_vm7, 1.0, %v6215_v5 }
 0xa22   :  { %v2563_v23 = vmul.f32 %v3370_v30, %v3342_v57  ;;  %v2506_v30 = vmul.f32 0.5, %v5772_v60 }
 0xa24   :  { %v2565_v53 = vpack.c.bf16 %v2563_v23, %v2562_v37  ;;  %v3360_v23 = vsel %vm2477_vm14, 1.0, %v6215_v5  ;;  %vm2510_vm9 = vcmp.ge.f32.partialorder %v2506_v30, 1.0  ;;  %v6494_v30 = vld [vmem:[#allocation38_spill] sm:$0xff] }
 0xa26   :  { %2579 = vmatmul.bf16.gmra.mxu3 %v2565_v53 }
 0xa4e   :  { %v2296_v38 = vpop.f32.mrf.mxu3 }
 0xa4f   :  { %v2297_v8 = vadd.f32 %v2296_v38, %v6373_v52  ;;  %v2474_v38 = vmul.f32 0.5, %v5736_v1  ;;  %v6487_v1 = vld [vmem:[#allocation80_spill] sm:$0xff] }
 0xa51   :  { %v2308_v47 = vadd.f32 %v2297_v8, %v6477_v16  ;;  %vm2478_vm1 = vcmp.ge.f32.partialorder %v2474_v38, 1.0 }
 0xa53   :  { %3327 = vst [vmem:[%s6055_s10 + $0x40] sm:$0xff] %v2308_v47 }
 0xa56   :  { %v2299_v29 = vpop.f32.mrf.mxu3 }
 0xa57   :  { %v2300_v36 = vadd.f32 %v2299_v29, %v6478_v7  ;;  %v3365_v29 = vsel %vm2510_vm9, 1.0, %v6215_v5 }
 0xa59   :  { %v2309_v10 = vadd.f32 %v2300_v36, %v6479_v3  ;;  %v2507_v3 = vmul.f32 0.5, %v5776_v18 }
 0xa5b   :  { %3328 = vst [vmem:[%s6055_s10 + $0x48] sm:$0xff] %v2309_v10  ;;  %v3361_v10 = vsel %vm2478_vm1, 1.0, %v6215_v5  ;;  %vm2511_vm13 = vcmp.ge.f32.partialorder %v2507_v3, 1.0 }
 0xa5e   :  { %v2302_v40 = vpop.f32.mrf.mxu3 }
 0xa5f   :  { %v2303_v46 = vadd.f32 %v2302_v40, %v6480_v34 }
 0xa61   :  { %v2310_v42 = vadd.f32 %v2303_v46, %v6481_v32  ;;  %v2475_v46 = vmul.f32 0.5, %v5749_v55  ;;  %v6488_v55 = vld [vmem:[#allocation82_spill] sm:$0xff] }
 0xa63   :  { %3329 = vst [vmem:[%s6055_s10 + $0x50] sm:$0xff] %v2310_v42  ;;  %vm2479_vm15 = vcmp.ge.f32.partialorder %v2475_v46, 1.0  ;;  %v6499_v46 = vld [vmem:[#allocation37_spill] sm:$0xff] }
 0xa64   :  { %v3362_v18 = vsel %vm2479_vm15, 1.0, %v6215_v5 }
 0xa66   :  { %v2305_v20 = vpop.f32.mrf.mxu3 }
 0xa67   :  { %v2306_v51 = vadd.f32 %v2305_v20, %v6482_v33 }
 0xa69   :  { %v2311_v14 = vadd.f32 %v2306_v51, %v6483_v24  ;;  %v3366_v51 = vsel %vm2511_vm13, 1.0, %v6215_v5 }
 0xa6b   :  { %3330 = vst [vmem:[%s6055_s10 + $0x58] sm:$0xff] %v2311_v14 }
 0xa99   :  { %v2575_v17 = vpop.f32.mrf.mxu3 }
 0xa9a   :  { %v2589_v49 = vadd.f32 %v2575_v17, %v6484_v62  ;;  %v3488_v17 = vld [vmem:[%s6050_s9 + $0x38] sm:$0xff]  ;;  %v6489_v62 = vld [vmem:[#allocation20_spill] sm:$0xff] }
 0xa9c   :  { %v2593_v0 = vmul.f32 0.5, %v2589_v49  ;;  %v3490_v49 = vld [vmem:[%s6050_s9 + $0x28] sm:$0xff] }
 0xa9e   :  { %vm2597_vm11 = vcmp.ge.f32.partialorder %v2593_v0, 0.5  ;;  %v3491_v0 = vld [vmem:[%s6050_s9 + $0x20] sm:$0xff] }
 0xa9f   :  { %v3371_v44 = vsel %vm2597_vm11, 1.0, %v6215_v5 }
 0xaa0   :  { %v2617_v63 = vmul.f32 %v3371_v44, %v3363_v58  ;;  %v6490_v58 = vld [vmem:[#allocation21_spill] sm:$0xff]  ;;  %v3492_v44 = vld [vmem:[%s6050_s9 + $0x18] sm:$0xff] }
 0xaa1   :  { %v2577_v37 = vpop.f32.mrf.mxu3 }
 0xaa2   :  { %v2590_v11 = vadd.f32 %v2577_v37, %v6485_v39  ;;  %v2621_v56 = vmul.f32 %v3359_v4, %v2617_v63  ;;  %v6491_v63 = vld [vmem:[#allocation22_spill] sm:$0xff]  ;;  %v3494_v4 = vld [vmem:[%s6050_s9 + $0x8] sm:$0xff]  ;;  %v3495_v37 = vld [vmem:[%s6050_s9] sm:$0xff] }
 0xaa3   :  { %v6492_v39 = vld [vmem:[#allocation36_spill] sm:$0xff] }
 0xaa4   :  { %v2594_v61 = vmul.f32 0.5, %v2590_v11 }
 0xaa6   :  { %vm2598_vm8 = vcmp.ge.f32.partialorder %v2594_v61, 0.5  ;;  %v6493_v61 = vld [vmem:[#allocation28_spill] sm:$0xff] }
 0xaa7   :  { %v3372_v57 = vsel %vm2598_vm8, 1.0, %v6215_v5 }
 0xaa8   :  { %v2618_v41 = vmul.f32 %v3372_v57, %v3364_v6 }
 0xaa9   :  { %v2580_v53 = vpop.f32.mrf.mxu3 }
 0xaaa   :  { %v2591_v8 = vadd.f32 %v2580_v53, %v6486_v59  ;;  %v2622_v16 = vmul.f32 %v3360_v23, %v2618_v41  ;;  %v6495_v23 = vld [vmem:[#allocation88_spill] sm:$0xff] }
 0xaab   :  { %v6496_v59 = vld [vmem:[#allocation32_spill] sm:$0xff] }
 0xaac   :  { %v2595_v47 = vmul.f32 0.5, %v2591_v8 }
 0xaae   :  { %vm2599_vm0 = vcmp.ge.f32.partialorder %v2595_v47, 0.5 }
 0xaaf   :  { %v3373_v36 = vsel %vm2599_vm0, 1.0, %v6215_v5 }
 0xab0   :  { %v2619_v60 = vmul.f32 %v3373_v36, %v3365_v29  ;;  %v6497_v29 = vld [vmem:[#allocation41_spill] sm:$0xff] }
 0xab1   :  { %v2582_v40 = vpop.f32.mrf.mxu3 }
 0xab2   :  { %v2592_v32 = vadd.f32 %v2582_v40, %v6487_v1  ;;  %v2623_v42 = vmul.f32 %v3361_v10, %v2619_v60  ;;  %v6498_v60 = vld [vmem:[#allocation87_spill] sm:$0xff] }
 0xab4   :  { %v2596_v20 = vmul.f32 0.5, %v2592_v32 }
 0xab6   :  { %vm2600_vm10 = vcmp.ge.f32.partialorder %v2596_v20, 0.5 }
 0xab7   :  { %v3374_v24 = vsel %vm2600_vm10, 1.0, %v6215_v5 }
 0xab8   :  { %v2620_v14 = vmul.f32 %v3374_v24, %v3366_v51  ;;  %v6501_v51 = vld [vmem:[#allocation51_spill] sm:$0xff] }
 0xaba   :  { %v2624_v19 = vmul.f32 %v3362_v18, %v2620_v14  ;;  %v6502_v18 = vld [vmem:[#allocation43_spill] sm:$0xff] }
 0xabc   :  { %2653 = vmatpush.msra.mxu1 %v2624_v19 }
 0xabe   :  { %2654 = vmatpush.msra.mxu1 %v2623_v42  ;;  %v6500_v42 = vld [vmem:[#allocation35_spill] sm:$0xff] }
 0xac0   :  { %2655 = vmatpush.msra.mxu1 %v2622_v16 }
 0xac2   :  { %2656 = vmatpush.msra.mxu1 %v2621_v56 }
 0xac3   :  { %3375 = vmatmul.msk.f32.vlgmr.msra.gmra.mxu1 %vm285_vm4, %v6488_v55 }
 0xac4   :  { %2909 = vmatpush.bf16.msrb.mxu1 %v3488_v17 }
 0xac8   :  { %2910 = vmatpush.bf16.msrb.mxu1 %v3489_v9 }
 0xacb   :  { %3376 = vmatmul.msk.f32.gmra.mxu1 %vm285_vm4, %v6489_v62 }
 0xacc   :  { %2911 = vmatpush.bf16.msrb.mxu1 %v3490_v49  ;;  %v6503_v49 = vld [vmem:[#allocation49_spill] sm:$0xff] }
 0xad0   :  { %2912 = vmatpush.bf16.msrb.mxu1 %v3491_v0  ;;  %v6504_v0 = vld [vmem:[#allocation27_spill] sm:$0xff] }
 0xad3   :  { %3377 = vmatmul.msk.f32.gmra.mxu1 %vm285_vm4, %v6490_v58  ;;  %v6505_v58 = vld [vmem:[#allocation50_spill] sm:$0xff] }
 0xad4   :  { %2913 = vmatpush.bf16.msrb.mxu1 %v3492_v44  ;;  %v6506_v44 = vld [vmem:[#allocation29_spill] sm:$0xff] }
 0xad8   :  { %2914 = vmatpush.bf16.msrb.mxu1 %v3493_v12  ;;  %v6507_v12 = vld [vmem:[#allocation48_spill] sm:$0xff] }
 0xadb   :  { %3378 = vmatmul.msk.f32.gmra.mxu1 %vm285_vm4, %v6491_v63  ;;  %v6508_v63 = vld [vmem:[#allocation31_spill] sm:$0xff] }
 0xadc   :  { %2915 = vmatpush.bf16.msrb.mxu1 %v3494_v4  ;;  %v6509_v4 = vld [vmem:[#allocation47_spill] sm:$0xff] }
 0xae0   :  { %2916 = vmatpush.bf16.msrb.mxu1 %v3495_v37  ;;  %v6511_v37 = vld [vmem:[#allocation83_spill] sm:$0xff] }
 0xb40   :  { %v2658_v48 = vpop.f32.mrf.mxu1 }
 0xb41   :  { %v2659_v11 = vadd.f32 %v2658_v48, %v6492_v39  ;;  %v6512_v48 = vld [vmem:[#allocation84_spill] sm:$0xff]  ;;  %v6513_v39 = vld [vmem:[#allocation85_spill] sm:$0xff] }
 0xb43   :  { %v5880_v56 = vadd.f32 %v5594_v22, %v2659_v11  ;;  %v6514_v11 = vld [vmem:[#allocation86_spill] sm:$0xff] }
 0xb45   :  { %v2678_v6 = vadd.f32 %v5880_v56, %v6493_v61 }
 0xb47   :  { %v2682_v38 = vmul.f32 0.5, %v2678_v6  ;;  %v6515_v6 = vld [vmem:[#allocation65_spill] sm:$0xff] }
 0xb48   :  { %v2661_v57 = vpop.f32.mrf.mxu1 }
 0xb49   :  { %v2662_v41 = vadd.f32 %v2661_v57, %v6494_v30  ;;  %vm2686_vm2 = vcmp.ge.f32.partialorder %v2682_v38, 1.0  ;;  %v6516_v30 = vld [vmem:[#allocation34_spill] sm:$0xff] }
 0xb4a   :  { %v5897_v3 = vsel %vm2686_vm2, 1.0, %v6215_v5  ;;  %v6517_v38 = vld [vmem:[#allocation66_spill] sm:$0xff] }
 0xb4b   :  { %v5886_v53 = vadd.f32 %v6495_v23, %v2662_v41 }
 0xb4d   :  { %v2679_v8 = vadd.f32 %v5886_v53, %v6496_v59 }
 0xb4f   :  { %v2683_v16 = vmul.f32 0.5, %v2679_v8  ;;  %v6518_v8 = vld [vmem:[#allocation39_spill] sm:$0xff] }
 0xb50   :  { %v2664_v47 = vpop.f32.mrf.mxu1 }
 0xb51   :  { %v2665_v36 = vadd.f32 %v2664_v47, %v6497_v29  ;;  %vm2687_vm3 = vcmp.ge.f32.partialorder %v2683_v16, 1.0  ;;  %v6519_v29 = vld [vmem:[#allocation67_spill] sm:$0xff] }
 0xb52   :  { %v5893_v22 = vsel %vm2687_vm3, 1.0, %v6215_v5 }
 0xb53   :  { %v5900_v10 = vadd.f32 %v6498_v60, %v2665_v36  ;;  %v3454_v40 = vpack.c.bf16 %v5893_v22, %v5897_v3  ;;  %v6520_v60 = vld [vmem:[#allocation78_spill] sm:$0xff] }
 0xb55   :  { %3464 = vst [vmem:[%s6052_s11 + $0x30] sm:$0xff] %v3454_v40   ;;  %v2680_v1 = vadd.f32 %v5900_v10, %v6499_v46 }
 0xb57   :  { %v2684_v14 = vmul.f32 0.5, %v2680_v1  ;;  %v6521_v1 = vld [vmem:[#allocation60_spill] sm:$0xff] }
 0xb58   :  { %v2667_v32 = vpop.f32.mrf.mxu1 }
 0xb59   :  { %v2668_v20 = vadd.f32 %v2667_v32, %v6500_v42  ;;  %vm2688_vm7 = vcmp.ge.f32.partialorder %v2684_v14, 1.0  ;;  %v6522_v42 = vld [vmem:[#allocation42_spill] sm:$0xff]  ;;  %v6523_v14 = vld [vmem:[#allocation71_spill] sm:$0xff] }
 0xb5a   :  { %v5917_v17 = vsel %vm2688_vm7, 1.0, %v6215_v5 }
 0xb5b   :  { %v5911_v24 = vadd.f32 %v6501_v51, %v2668_v20 }
 0xb5d   :  { %v2681_v19 = vadd.f32 %v5911_v24, %v6502_v18 }
 0xb5f   :  { %v2685_v55 = vmul.f32 0.5, %v2681_v19  ;;  %v6524_v19 = vld [vmem:[#allocation77_spill] sm:$0xff] }
 0xb61   :  { %vm2689_vm6 = vcmp.ge.f32.partialorder %v2685_v55, 1.0 }
 0xb62   :  { %3383 = vmatpush.msk.msra.mxu3 %vm2689_vm6, %v6309_v50  ;;  %v5920_v9 = vsel %vm2689_vm6, 1.0, %v6215_v5 }
 0xb63   :  { %v3457_v62 = vpack.c.bf16 %v5920_v9, %v5917_v17 }
 0xb64   :  { %3384 = vmatpush.msk.msra.mxu3 %vm2688_vm7, %v6309_v50 }
 0xb65   :  { %3465 = vst [vmem:[%s6052_s11 + $0x38] sm:$0xff] %v3457_v62  }
 0xb66   :  { %3385 = vmatpush.msk.msra.mxu3 %vm2687_vm3, %v6309_v50 }
 0xb68   :  { %3386 = vmatpush.msk.msra.mxu3 %vm2686_vm2, %v6309_v50  ;;  %v6510_v50 = vld [vmem:[#allocation33_spill] sm:$0xff] }
 0xb69   :  { %3387 = vmatmul.msk.f32.vlgmr.msra.gmra.mxu3 %vm285_vm4, %v6503_v49  ;;  %v6525_v49 = vld [vmem:[#allocation62_spill] sm:$0xff] }
 0xb71   :  { %3388 = vmatmul.msk.f32.gmra.mxu3 %vm285_vm4, %v6504_v0 }
 0xb79   :  { %3389 = vmatmul.msk.f32.gmra.mxu3 %vm285_vm4, %v6505_v58  ;;  %v6526_v58 = vld [vmem:[#allocation44_spill] sm:$0xff] }
 0xb81   :  { %3390 = vmatmul.msk.f32.gmra.mxu3 %vm285_vm4, %v6506_v44 }
 0xb89   :  { %3391 = vmatmul.msk.f32.gmra.mxu3 %vm285_vm4, %v6507_v12 }
 0xb91   :  { %3392 = vmatmul.msk.f32.gmra.mxu3 %vm285_vm4, %v6508_v63  ;;  %v6527_v63 = vld [vmem:[#allocation63_spill] sm:$0xff] }
 0xb99   :  { %3393 = vmatmul.msk.f32.gmra.mxu3 %vm285_vm4, %v6509_v4 }
 0xba1   :  { %3394 = vmatmul.msk.f32.gmra.mxu3 %vm285_vm4, %v6510_v50  ;;  %v6528_v50 = vld [vmem:[#allocation76_spill] sm:$0xff] }
 0xba9   :  { %3395 = vmatmul.msk.f32.gmra.mxu3 %vm285_vm4, %v6511_v37 }
 0xbb1   :  { %3396 = vmatmul.msk.f32.gmra.mxu3 %vm285_vm4, %v6512_v48 }
 0xbb9   :  { %3397 = vmatmul.msk.f32.gmra.mxu3 %vm285_vm4, %v6513_v39  ;;  %v6529_v39 = vld [vmem:[#allocation64_spill] sm:$0xff] }
 0xbc1   :  { %3398 = vmatmul.msk.f32.gmra.mxu3 %vm285_vm4, %v6514_v11 }
 0xbec   :  { %v2771_v61 = vpop.f32.mrf.mxu3 }
 0xbed   :  { %v2772_v57 = vadd.f32 %v2771_v61, %v6515_v6  ;;  %v6530_v61 = vld [vmem:[#allocation46_spill] sm:$0xff] }
 0xbef   :  { %v2811_v41 = vadd.f32 %v2772_v57, %v6516_v30  ;;  %v6531_v30 = vld [vmem:[#allocation59_spill] sm:$0xff] }
 0xbf4   :  { %v2774_v23 = vpop.f32.mrf.mxu3 }
 0xbf5   :  { %v2775_v59 = vadd.f32 %v2774_v23, %v6517_v38  ;;  %v6532_v38 = vld [vmem:[#allocation89_spill] sm:$0xff] }
 0xbf7   :  { %v5960_v16 = vadd.f32 %v2775_v59, %v6518_v8 }
 0xbfc   :  { %v2777_v47 = vpop.f32.mrf.mxu3 }
 0xbfd   :  { %v2778_v36 = vadd.f32 %v2777_v47, %v6519_v29  ;;  %v6533_v29 = vld [vmem:[#allocation61_spill] sm:$0xff] }
 0xbff   :  { %v5964_v40 = vadd.f32 %v2778_v36, %v6520_v60 }
 0xc04   :  { %v2780_v46 = vpop.f32.mrf.mxu3 }
 0xc05   :  { %v2781_v32 = vadd.f32 %v2780_v46, %v6521_v1 }
 0xc07   :  { %v5968_v20 = vadd.f32 %v2781_v32, %v6522_v42 }
 0xc0c   :  { %v2783_v51 = vpop.f32.mrf.mxu3 }
 0xc0d   :  { %v2784_v18 = vadd.f32 %v2783_v51, %v6523_v14 }
 0xc0f   :  { %v2843_v55 = vadd.f32 %v2784_v18, %v6524_v19 }
 0xc14   :  { %v2786_v62 = vpop.f32.mrf.mxu3 }
 0xc15   :  { %v2787_v0 = vadd.f32 %v2786_v62, %v6525_v49 }
 0xc17   :  { %v2844_v44 = vadd.f32 %v2787_v0, %v6526_v58 }
 0xc1c   :  { %v2789_v12 = vpop.f32.mrf.mxu3 }
 0xc1d   :  { %v2790_v4 = vadd.f32 %v2789_v12, %v6527_v63 }
 0xc1f   :  { %v2845_v37 = vadd.f32 %v2790_v4, %v6528_v50 }
 0xc24   :  { %v2792_v48 = vpop.f32.mrf.mxu3 }
 0xc25   :  { %v2793_v11 = vadd.f32 %v2792_v48, %v6529_v39  ;;  %v2815_v48 = vmul.f32 0.5, %v2811_v41 }
 0xc27   :  { %v5978_v6 = vadd.f32 %v2793_v11, %v6530_v61  ;;  %vm2819_vm9 = vcmp.ge.f32.partialorder %v2815_v48, 1.0  ;;  %v2848_v61 = vmul.f32 0.5, %v2844_v44 }
 0xc29   :  { %vm2852_vm0 = vcmp.ge.f32.partialorder %v2848_v61, 1.0 }
 0xc2c   :  { %v2795_v57 = vpop.f32.mrf.mxu3 }
 0xc2d   :  { %v2796_v23 = vadd.f32 %v2795_v57, %v6531_v30  ;;  %v2816_v30 = vmul.f32 0.5, %v5960_v16 }
 0xc2f   :  { %v2875_v59 = vadd.f32 %v2796_v23, %v6532_v38  ;;  %vm2820_vm13 = vcmp.ge.f32.partialorder %v2816_v30, 1.0  ;;  %v3404_v23 = vsel %vm2852_vm0, 1.0, %v6215_v5 }
 0xc30   :  { %v3400_v44 = vsel %vm2820_vm13, 1.0, %v6215_v5 }
 0xc31   :  { %v2879_v8 = vmul.f32 0.5, %v2875_v59  ;;  %v2849_v59 = vmul.f32 0.5, %v2845_v37 }
 0xc33   :  { %vm2883_vm5 = vcmp.ge.f32.partialorder %v2879_v8, 1.0  ;;  %vm2853_vm10 = vcmp.ge.f32.partialorder %v2849_v59, 1.0 }
 0xc34   :  { %v2798_v47 = vpop.f32.mrf.mxu3  ;;  %v3407_v1 = vsel %vm2883_vm5, 1.0, %v6215_v5 }
 0xc35   :  { %v2799_v36 = vadd.f32 %v2798_v47, %v6533_v29  ;;  %v2903_v51 = vmul.f32 %v3407_v1, %v5897_v3  ;;  %v2817_v29 = vmul.f32 0.5, %v5964_v40  ;;  %v2850_v1 = vmul.f32 0.5, %v5978_v6 }
 0xc37   :  { %v2876_v60 = vadd.f32 %v2799_v36, %v5627_v13  ;;  %vm2821_vm2 = vcmp.ge.f32.partialorder %v2817_v29, 1.0  ;;  %vm2854_vm7 = vcmp.ge.f32.partialorder %v2850_v1, 1.0 }
 0xc39   :  { %v2880_v46 = vmul.f32 0.5, %v2876_v60  ;;  %v3405_v60 = vsel %vm2853_vm10, 1.0, %v6215_v5 }
 0xc3b   :  { %vm2884_vm11 = vcmp.ge.f32.partialorder %v2880_v46, 1.0 }
 0xc3c   :  { %v3408_v32 = vsel %vm2884_vm11, 1.0, %v6215_v5  ;;  %v2801_v42 = vpop.f32.mrf.mxu3 }
 0xc3d   :  { %v2904_v14 = vmul.f32 %v3408_v32, %v5893_v22  ;;  %v2802_v18 = vadd.f32 %v2801_v42, %v4222_v54  ;;  %v3401_v32 = vsel %vm2821_vm2, 1.0, %v6215_v5 }
 0xc3f   :  { %v2907_v19 = vpack.c.bf16 %v2904_v14, %v2903_v51  ;;  %v2877_v62 = vadd.f32 %v2802_v18, %v5636_v2  ;;  %v2847_v2 = vmul.f32 0.5, %v2843_v55  ;;  %v2818_v51 = vmul.f32 0.5, %v5968_v20 }
 0xc40   :  { %v3406_v18 = vsel %vm2854_vm7, 1.0, %v6215_v5 }
 0xc41   :  { %2917 = vmatmul.bf16.vlgmr.msrb.gmra.mxu1 %v2907_v19  ;;  %v2881_v49 = vmul.f32 0.5, %v2877_v62  ;;  %vm2851_vm8 = vcmp.ge.f32.partialorder %v2847_v2, 1.0  ;;  %vm2822_vm6 = vcmp.ge.f32.partialorder %v2818_v51, 1.0 }
 0xc42   :  { %v3402_v6 = vsel %vm2822_vm6, 1.0, %v6215_v5 }
 0xc43   :  { %vm2885_vm12 = vcmp.ge.f32.partialorder %v2881_v49, 1.0 }
 0xc44   :  { %v2804_v0 = vpop.f32.mrf.mxu3  ;;  %v3409_v63 = vsel %vm2885_vm12, 1.0, %v6215_v5 }
 0xc45   :  { %v2805_v13 = vadd.f32 %v2804_v0, %v4228_v25  ;;  %v2905_v22 = vmul.f32 %v3409_v63, %v5917_v17  ;;  %v3399_v17 = vsel %vm2819_vm9, 1.0, %v6215_v5 }
 0xc47   :  { %v2878_v58 = vadd.f32 %v2805_v13, %v5642_v15  ;;  %v3403_v15 = vsel %vm2851_vm8, 1.0, %v6215_v5 }
 0xc49   :  { %v2882_v12 = vmul.f32 0.5, %v2878_v58 }
 0xc4b   :  { %vm2886_vm14 = vcmp.ge.f32.partialorder %v2882_v12, 1.0 }
 0xc4c   :  { %v3410_v3 = vsel %vm2886_vm14, 1.0, %v6215_v5 }
 0xc4d   :  { %v2906_v54 = vmul.f32 %v3410_v3, %v5920_v9 }
 0xc4f   :  { %v2908_v4 = vpack.c.bf16 %v2906_v54, %v2905_v22 }
 0xc51   :  { %2922 = vmatmul.bf16.gmra.mxu1 %v2908_v4 }
 0xcbe   :  { %v2918_v50 = vpop.f32.mrf.mxu1 }
 0xcbf   :  { %v2932_v25 = vadd.f32 %v2918_v50, %v5675_v35 }
 0xcc1   :  { %v2936_v39 = vmul.f32 0.5, %v2932_v25 }
 0xcc3   :  { %vm2940_vm1 = vcmp.ge.f32.partialorder %v2936_v39, 0.5 }
 0xcc4   :  { %v3411_v11 = vsel %vm2940_vm1, 1.0, %v6215_v5 }
 0xcc5   :  { %v2960_v57 = vmul.f32 %v3411_v11, %v3403_v15 }
 0xcc6   :  { %v2920_v9 = vpop.f32.mrf.mxu1 }
 0xcc7   :  { %v2933_v55 = vadd.f32 %v2920_v9, %v5685_v21  ;;  %v2964_v41 = vmul.f32 %v3399_v17, %v2960_v57 }
 0xcc9   :  { %v2937_v35 = vmul.f32 0.5, %v2933_v55 }
 0xccb   :  { %vm2941_vm15 = vcmp.ge.f32.partialorder %v2937_v35, 0.5 }
 0xccc   :  { %v3412_v38 = vsel %vm2941_vm15, 1.0, %v6215_v5 }
 0xccd   :  { %v2961_v8 = vmul.f32 %v3412_v38, %v3404_v23 }
 0xcce   :  { %v2923_v47 = vpop.f32.mrf.mxu1 }
 0xccf   :  { %v2934_v16 = vadd.f32 %v2923_v47, %v5695_v31  ;;  %v2965_v36 = vmul.f32 %v3400_v44, %v2961_v8 }
 0xcd1   :  { %v2938_v21 = vmul.f32 0.5, %v2934_v16 }
 0xcd3   :  { %vm2942_vm3 = vcmp.ge.f32.partialorder %v2938_v21, 0.5 }
 0xcd4   :  { %v3413_v46 = vsel %vm2942_vm3, 1.0, %v6215_v5 }
 0xcd5   :  { %v2962_v37 = vmul.f32 %v3413_v46, %v3405_v60 }
 0xcd6   :  { %v2925_v42 = vpop.f32.mrf.mxu1 }
 0xcd7   :  { %v2935_v40 = vadd.f32 %v2925_v42, %v5705_v27  ;;  %v2966_v31 = vmul.f32 %v3401_v32, %v2962_v37 }
 0xcd9   :  { %v2939_v14 = vmul.f32 0.5, %v2935_v40 }
 0xcdb   :  { %vm2943_vm5 = vcmp.ge.f32.partialorder %v2939_v14, 0.5 }
 0xcdc   :  { %v3414_v19 = vsel %vm2943_vm5, 1.0, %v6215_v5 }
 0xcdd   :  { %v2963_v62 = vmul.f32 %v3414_v19, %v3406_v18 }
 0xcdf   :  { %v2967_v49 = vmul.f32 %v3402_v6, %v2963_v62 }
 0xce1   :  { %2996 = vmatpush.msra.mxu0 %v2967_v49 }
 0xce3   :  { %2997 = vmatpush.msra.mxu0 %v2966_v31 }
 0xce5   :  { %2998 = vmatpush.msra.mxu0 %v2965_v36 }
 0xce7   :  { %2999 = vmatpush.msra.mxu0 %v2964_v41 }
 0xce8   :  { %3415 = vmatmul.msk.f32.vlgmr.msra.gmra.mxu0 %vm285_vm4, %v5717_v28 }
 0xcf0   :  { %3416 = vmatmul.msk.f32.gmra.mxu0 %vm285_vm4, %v5729_v43 }
 0xcf8   :  { %3417 = vmatmul.msk.f32.gmra.mxu0 %vm285_vm4, %v5742_v26 }
 0xd00   :  { %3418 = vmatmul.msk.f32.gmra.mxu0 %vm285_vm4, %v5755_v45 }
 0xd65   :  { %v3001_v27 = vpop.f32.mrf.mxu0 }
 0xd66   :  { %v3002_v5 = vadd.f32 %v3001_v27, %v6373_v52 }
 0xd68   :  { %v3013_v20 = vadd.f32 %v3002_v5, %v5880_v56 }
 0xd6a   :  { %3419 = vst [vmem:[%s6055_s10 + $0x60] sm:$0xff] %v3013_v20 }
 0xd6d   :  { %v3004_v0 = vpop.f32.mrf.mxu0 }
 0xd6e   :  { %v3005_v28 = vadd.f32 %v3004_v0, %v6478_v7 }
 0xd70   :  { %v3014_v43 = vadd.f32 %v3005_v28, %v5886_v53 }
 0xd72   :  { %3420 = vst [vmem:[%s6055_s10 + $0x68] sm:$0xff] %v3014_v43 }
 0xd75   :  { %v3007_v26 = vpop.f32.mrf.mxu0 }
 0xd76   :  { %v3008_v45 = vadd.f32 %v3007_v26, %v6480_v34 }
 0xd78   :  { %v3015_v52 = vadd.f32 %v3008_v45, %v5900_v10 }
 0xd7a   :  { %3421 = vst [vmem:[%s6055_s10 + $0x70] sm:$0xff] %v3015_v52 }
 0xd7d   :  { %v3010_v56 = vpop.f32.mrf.mxu0 }
 0xd7e   :  { %v3011_v13 = vadd.f32 %v3010_v56, %v6482_v33 }
 0xd80   :  { %v3016_v7 = vadd.f32 %v3011_v13, %v5911_v24 }
 0xd82   :  { %3422 = vst [vmem:[%s6055_s10 + $0x78] sm:$0xff] %v3016_v7 }

</bundles_post_ra>
